<compile_context>
chip_gen: v6e
topology: v6e:2x2x1
jax: 0.10.0
libtpu: 0.0.40
codegen_flags: <defaults>
</compile_context>

<pallas_src>
import functools

import jax
import jax.numpy as jnp
from jax import lax
from jax.experimental import pallas as pl
from jax.experimental.pallas import tpu as pltpu


# ----------------------------------------------------------------------------
# Hardware-aware knobs.
# ----------------------------------------------------------------------------
@functools.lru_cache(maxsize=None)
def _vmem_limit_bytes():
    """~half of physical VMEM: 64 MiB on v5e/v6e (128 MiB), 32 MiB on v7x (64)."""
    cap = 128 * 1024 * 1024
    try:
        info = pltpu.get_tpu_info()
        cap = int(getattr(info, "vmem_capacity_bytes", cap) or cap)
    except Exception:
        pass
    return int(max(32 * 1024 * 1024, min(96 * 1024 * 1024, cap // 2)))


@functools.lru_cache(maxsize=None)
def _buffered_single_ok():
    """Probe whether pipeline_mode=pl.Buffered(1) (single-buffering of
    constant-index blocks) compiles and runs on this jax/Mosaic build."""
    try:
        def _k(x_ref, o_ref):
            o_ref[...] = x_ref[...] + 1.0

        fn = pl.pallas_call(
            _k,
            out_shape=jax.ShapeDtypeStruct((16, 128), jnp.float32),
            grid_spec=pltpu.PrefetchScalarGridSpec(
                num_scalar_prefetch=0,
                grid=(2,),
                in_specs=[pl.BlockSpec((8, 128), lambda i: (0, 0),
                                       pipeline_mode=pl.Buffered(1))],
                out_specs=pl.BlockSpec((8, 128), lambda i: (i, 0)),
            ),
        )
        jax.block_until_ready(fn(jnp.zeros((8, 128), jnp.float32)))
        return True
    except Exception:
        return False


def _maybe_single_buffered(block_shape, index_map):
    """Constant-index block: single-buffer it if the jax build supports it."""
    if _buffered_single_ok():
        return pl.BlockSpec(block_shape, index_map, pipeline_mode=pl.Buffered(1))
    return pl.BlockSpec(block_shape, index_map)


def _round_up(x, m):
    return (x + m - 1) // m * m


# ----------------------------------------------------------------------------
# Kernel 1: fused input projection (both directions in ONE GEMM).
#   gates[m-tile] = sum_p x[p, m-tile] @ W_ih_packed[p] + bias     (N = D*4H)
# ----------------------------------------------------------------------------
def _make_projection_kernel(P, D, G):
    def kernel(x_ref, w_ref, b_ref, o_ref):
        # x_ref: (P, m, F) bf16, w_ref: (P, F, D*G) bf16, b_ref: (1, D*G) f32,
        # o_ref: (D, m, G) f32.
        acc = jnp.dot(x_ref[0], w_ref[0], preferred_element_type=jnp.float32)
        for p in range(1, P):          # P in {1, 2}: static unroll
            acc += jnp.dot(x_ref[p], w_ref[p],
                           preferred_element_type=jnp.float32)
        acc += b_ref[...]              # (1, D*G) broadcasts over rows
        for d in range(D):             # static per-direction panel writes
            o_ref[d] = acc[:, d * G:(d + 1) * G]
    return kernel


def _input_projection(x_ptbf, w_ih, bias, num_dirs):
    """(P,T,B,F) bf16, (P,F,D*4H) bf16, (1,D*4H) f32 -> (D,T,B,4H) f32."""
    P, T, B, F = x_ptbf.shape
    DG = w_ih.shape[-1]
    D = num_dirs
    G = DG // D
    TB = T * B
    x_flat = x_ptbf.reshape(P, TB, F)

    # M tiling: prefer 512/256-row tiles (MXU-friendly, >=85% of HBM roofline);
    # pad TB up to the tile instead of degenerating to one giant block.
    if TB >= 512:
        m_block = 512
    elif TB >= 256:
        m_block = 256
    else:
        m_block = max(8, _round_up(TB, 8))
    TBp = _round_up(TB, m_block)
    if TBp != TB:
        x_flat = jnp.pad(x_flat, ((0, 0), (0, TBp - TB), (0, 0)))

    # TODO(synk): add K (over F) / N (over 4H) tiling with an f32 accumulator
    # for very large F/H so m_block=512 still fits the v7x VMEM budget.
    # TODO(synk): an fp8 W_ih path (per-channel scales) would double MXU rate
    # on v7x; not applicable to v5e/v6e.
    gates = pl.pallas_call(
        _make_projection_kernel(P, D, G),
        out_shape=jax.ShapeDtypeStruct((D, TBp, G), jnp.float32),
        grid_spec=pltpu.PrefetchScalarGridSpec(
            num_scalar_prefetch=0,
            grid=(TBp // m_block,),
            in_specs=[
                pl.BlockSpec((P, m_block, F), lambda m: (0, m, 0)),
                _maybe_single_buffered((P, F, DG), lambda m: (0, 0, 0)),
                _maybe_single_buffered((1, DG), lambda m: (0, 0)),
            ],
            out_specs=pl.BlockSpec((D, m_block, G), lambda m: (0, m, 0)),
        ),
        compiler_params=pltpu.CompilerParams(
            dimension_semantics=("parallel",),
            vmem_limit_bytes=_vmem_limit_bytes()),
    )(x_flat, w_ih, bias)
    if TBp != TB:
        gates = gates[:, :TB]
    # TODO(synk): storing gates in bf16 would halve the largest intermediate's
    # HBM traffic; kept f32 pending accuracy validation near gate saturation.
    return gates.reshape(D, T, B, G)


# ----------------------------------------------------------------------------
# Kernel 2: the recurrence.  grid = (direction, batch-tile, time-chunk).
# ----------------------------------------------------------------------------
def _make_recurrence_kernel(num_dirs, Tc, H):
    def kernel(gx_ref, whh_ref, out_ref, h_sc, c_sc):
        """gx_ref:  (1, Tc, Bt, 4H) f32   precomputed x@W_ih^T + bias
           whh_ref: (1, H, 4H)      bf16  recurrent weights of this direction
           out_ref: (1, Tc, Bt, H)  bf16  per-timestep hidden states
           h_sc: (Bt, H) bf16 / c_sc: (Bt, H) f32 carried across chunks."""
        d = pl.program_id(0)
        c = pl.program_id(2)

        @pl.when(c == 0)
        def _():
            h_sc[...] = jnp.zeros_like(h_sc)
            c_sc[...] = jnp.zeros_like(c_sc)

        whh = whh_ref[0]               # (H, 4H) bf16, hoisted out of the loop

        def cell(t_loc):
            # t_loc is a Python int -> plain (non-dynamic) vld/vst addressing.
            gates = gx_ref[0, t_loc] + jnp.dot(
                h_sc[...], whh, preferred_element_type=jnp.float32)  # (Bt,4H)
            # PyTorch gate order [i, f, g, o]; sigmoid via tanh: 1 EUP op/gate.
            # NOTE: keep H a multiple of 128 at production sizes so these
            # slices stay lane-aligned.
            i_g = 0.5 * (jnp.tanh(0.5 * gates[:, 0 * H:1 * H]) + 1.0)
            f_g = 0.5 * (jnp.tanh(0.5 * gates[:, 1 * H:2 * H]) + 1.0)
            g_g = jnp.tanh(gates[:, 2 * H:3 * H])
            o_g = 0.5 * (jnp.tanh(0.5 * gates[:, 3 * H:4 * H]) + 1.0)
            c_new = f_g * c_sc[...] + i_g * g_g
            h_new = (o_g * jnp.tanh(c_new)).astype(jnp.bfloat16)  # one cast
            c_sc[...] = c_new
            h_sc[...] = h_new
            out_ref[0, t_loc] = h_new

        # Forward walks the chunk 0..Tc-1; backward walks it Tc-1..0 so the
        # state written at global time t has consumed x_{T-1..t} (PyTorch
        # bidirectional semantics) -- no HBM reversal passes needed.
        # TODO(synk): for large Tc switch to a partially-unrolled fori_loop to
        # bound vreg live ranges (full static unroll can spill).
        def fwd_walk():
            for tau in range(Tc):
                cell(tau)

        def bwd_walk():
            for tau in range(Tc):
                cell(Tc - 1 - tau)

        if num_dirs == 1:
            fwd_walk()
        else:
            pl.when(d == 0)(fwd_walk)
            pl.when(d == 1)(bwd_walk)

    return kernel


def _choose_batch_tile(B, D):
    """Batch tile (multiple of 8) so D * num_batch_tiles >= 2 when possible
    (keeps v7x's second TensorCore busy, shrinks per-step VMEM blocks)."""
    if B % 8 != 0:
        return B
    for cand in (64, 32, 16, 8):
        if B % cand == 0 and (B // cand) * D >= 2:
            return cand
    return B


def _lstm_recurrence(gates_x, w_hh, *, max_time_chunk=8):
    """(D,T,B,4H) f32, (D,H,4H) bf16 -> (D,T,B,H) bf16 hidden-state sequence."""
    D, T, B, G = gates_x.shape
    H = w_hh.shape[1]
    # TODO(synk): pad/mask the time axis instead of degenerating to Tc=1 when
    # T has no divisor <= max_time_chunk (prime-ish T).
    Tc = 1
    for cand in range(min(T, max_time_chunk), 0, -1):
        if T % cand == 0:
            Tc = cand
            break
    C = T // Tc
    Bt = _choose_batch_tile(B, D)
    NB = B // Bt

    def t_idx(d, c):
        # forward (d=0): chunks 0..C-1; backward (d=1): chunks C-1..0.
        return (1 - d) * c + d * (C - 1 - c)

    # TODO(synk): for bandwidth-starved v5e, fusing the per-chunk projection
    # into this kernel (M = Tc*Bt) removes the gates_x HBM round trip entirely.
    return pl.pallas_call(
        _make_recurrence_kernel(D, Tc, H),
        out_shape=jax.ShapeDtypeStruct((D, T, B, H), jnp.bfloat16),
        grid_spec=pltpu.PrefetchScalarGridSpec(
            num_scalar_prefetch=0,
            grid=(D, NB, C),
            in_specs=[
                pl.BlockSpec((1, Tc, Bt, G),
                             lambda d, b, c: (d, t_idx(d, c), b, 0)),
                _maybe_single_buffered((1, H, G), lambda d, b, c: (d, 0, 0)),
            ],
            out_specs=pl.BlockSpec((1, Tc, Bt, H),
                                   lambda d, b, c: (d, t_idx(d, c), b, 0)),
            scratch_shapes=[
                pltpu.VMEM((Bt, H), jnp.bfloat16),   # h state (matmul operand)
                pltpu.VMEM((Bt, H), jnp.float32),    # c state
            ],
        ),
        compiler_params=pltpu.CompilerParams(
            # direction & batch tiles are independent -> "parallel";
            # the time-chunk axis is a true recurrence -> "arbitrary".
            dimension_semantics=("parallel", "parallel", "arbitrary"),
            vmem_limit_bytes=_vmem_limit_bytes()),
    )(gates_x, w_hh)


# ----------------------------------------------------------------------------
# Parameters (mimic nn.LSTM / nn.Linear init; gate order [i, f, g, o]).
# W_ih of both directions is packed along the output axis -> (P, F, D*4H) so
# the projection is a single GEMM; W_hh stays per-direction (D, H, 4H).
# ----------------------------------------------------------------------------
def init_params(key, input_dim, hidden_dim, layer_dim, output_dim, bichoice):
    H = hidden_dim
    D = 2 if bichoice else 1
    k = 1.0 / (hidden_dim ** 0.5)

    params = {"layers": []}
    for layer in range(layer_dim):
        in_size = input_dim if layer == 0 else H * D
        P = 1 if layer == 0 else D
        F = in_size // P
        w_ih_dirs, w_hh_dirs, bias_dirs = [], [], []
        for _ in range(D):
            key, k1, k2, k3, k4 = jax.random.split(key, 5)
            w_ih = jax.random.uniform(k1, (4 * H, in_size), jnp.float32, -k, k)
            w_hh = jax.random.uniform(k2, (4 * H, H), jnp.float32, -k, k)
            b_ih = jax.random.uniform(k3, (4 * H,), jnp.float32, -k, k)
            b_hh = jax.random.uniform(k4, (4 * H,), jnp.float32, -k, k)
            w_ih_dirs.append(w_ih.T.reshape(P, F, 4 * H))   # per-input panels
            w_hh_dirs.append(w_hh.T)                        # (H, 4H)
            bias_dirs.append(b_ih + b_hh)                   # (4H,)
        params["layers"].append({
            # (P, F, D*4H) bf16: both directions fused along N.
            "w_ih": jnp.concatenate(w_ih_dirs, axis=-1).astype(jnp.bfloat16),
            "w_hh": jnp.stack(w_hh_dirs).astype(jnp.bfloat16),   # (D, H, 4H)
            "bias": jnp.concatenate(bias_dirs, -1).reshape(1, -1),  # (1,D*4H)
        })

    fc_in = H * D
    kf = 1.0 / (fc_in ** 0.5)
    key, k5, k6 = jax.random.split(key, 3)
    params["fc_w_t"] = jax.random.uniform(k5, (output_dim, fc_in),
                                          jnp.float32, -kf, kf).T  # (fc_in, O)
    params["fc_b"] = jax.random.uniform(k6, (output_dim,),
                                        jnp.float32, -kf, kf).reshape(1, -1)
    return params


# ----------------------------------------------------------------------------
# Full forward pass.
# ----------------------------------------------------------------------------
@functools.partial(jax.jit, static_argnames=("bichoice",))
def lstm_forward(x_btd, params, bichoice=True):
    num_dirs = 2 if bichoice else 1
    assert params["layers"][0]["w_hh"].shape[0] == num_dirs
    B = x_btd.shape[0]
    # Cast to bf16 BEFORE the one-time (B,T,F)->(T,B,F) relayout: halves that
    # HBM pass (layer-0 weights are bf16 anyway).
    # TODO(synk): fold this relayout into the first projection's index_map.
    h_seq = jnp.transpose(x_btd.astype(jnp.bfloat16), (1, 0, 2))[None]  # (1,T,B,F)
    for layer in params["layers"]:
        gates_x = _input_projection(h_seq, layer["w_ih"], layer["bias"],
                                    num_dirs)                  # (D,T,B,4H) f32
        h_seq = _lstm_recurrence(gates_x, layer["w_hh"])       # (D,T,B,H) bf16
    # out[:, -1, :] == [h_fw(T-1), h_bw(T-1)]; tiny FC left to XLA.
    last = jnp.transpose(h_seq[:, -1], (1, 0, 2)).reshape(B, -1)
    return jnp.dot(last.astype(jnp.float32), params["fc_w_t"]) + params["fc_b"]


# ----------------------------------------------------------------------------
# Pure-JAX (lax.scan) reference with identical bf16/f32 mixed precision.
# ----------------------------------------------------------------------------
def _ref_forward(x_btd, params, bichoice):
    num_dirs = 2 if bichoice else 1
    x = jnp.transpose(x_btd.astype(jnp.bfloat16), (1, 0, 2))[None]  # (1,T,B,F)
    for lp in params["layers"]:
        w_ih, w_hh, bias = lp["w_ih"], lp["w_hh"], lp["bias"]
        H = w_hh.shape[1]
        G = 4 * H
        gx_all = jnp.einsum("ptbf,pfg->tbg", x, w_ih,
                            preferred_element_type=jnp.float32) + bias[0]
        outs = []
        for d in range(num_dirs):
            gx = gx_all[..., d * G:(d + 1) * G]                 # (T,B,4H) f32

            def step(carry, g, d=d):
                h, c = carry
                gates = g + jnp.dot(h, w_hh[d],
                                    preferred_element_type=jnp.float32)
                i = 0.5 * (jnp.tanh(0.5 * gates[:, 0 * H:1 * H]) + 1.0)
                f = 0.5 * (jnp.tanh(0.5 * gates[:, 1 * H:2 * H]) + 1.0)
                gg = jnp.tanh(gates[:, 2 * H:3 * H])
                o = 0.5 * (jnp.tanh(0.5 * gates[:, 3 * H:4 * H]) + 1.0)
                c_new = f * c + i * gg
                h_new = (o * jnp.tanh(c_new)).astype(jnp.bfloat16)
                return (h_new, c_new), h_new

            Bsz = gx.shape[1]
            init = (jnp.zeros((Bsz, H), jnp.bfloat16),
                    jnp.zeros((Bsz, H), jnp.float32))
            _, hs = lax.scan(step, init, gx, reverse=(d == 1))
            outs.append(hs)
        x = jnp.stack(outs, axis=0)                             # (D,T,B,H) bf16
    last = jnp.transpose(x[:, -1], (1, 0, 2)).reshape(x.shape[2], -1)
    return jnp.dot(last.astype(jnp.float32), params["fc_w_t"]) + params["fc_b"]


if __name__ == "__main__":
    B, T = 2, 8
    input_dim, hidden_dim, layer_dim, output_dim = 16, 32, 2, 4

    key = jax.random.PRNGKey(0)
    key, kx, kp1, kp2 = jax.random.split(key, 4)
    x = jax.random.normal(kx, (B, T, input_dim), dtype=jnp.float32)

    # Bidirectional (matches the module's global bichoice=True).
    params_bi = init_params(kp1, input_dim, hidden_dim, layer_dim, output_dim,
                            bichoice=True)
    out_bi = lstm_forward(x, params_bi, bichoice=True)
    jax.block_until_ready(out_bi)
    assert out_bi.shape == (B, output_dim)
    ref_bi = _ref_forward(x, params_bi, True)
    err_bi = float(jnp.max(jnp.abs(out_bi - ref_bi)))
    assert err_bi < 2e-2, f"bidirectional mismatch: max|diff|={err_bi}"

    # Unidirectional path (exercises the D=1 specialization).
    params_uni = init_params(kp2, input_dim, hidden_dim, layer_dim, output_dim,
                             bichoice=False)
    out_uni = lstm_forward(x, params_uni, bichoice=False)
    jax.block_until_ready(out_uni)
    assert out_uni.shape == (B, output_dim)
    ref_uni = _ref_forward(x, params_uni, False)
    err_uni = float(jnp.max(jnp.abs(out_uni - ref_uni)))
    assert err_uni < 2e-2, f"unidirectional mismatch: max|diff|={err_uni}"

    print("KERNEL_OK")
</pallas_src>

<mosaic_0001>
module attributes {stable_mosaic.version = 11 : i64} {
  func.func @kernel(%arg0: i32, %arg1: memref<1x16x16xbf16, #tpu.memory_space<vmem>>, %arg2: memref<1x16x256xbf16, #tpu.memory_space<vmem>>, %arg3: memref<1x256xf32, #tpu.memory_space<vmem>>, %arg4: memref<2x16x128xf32, #tpu.memory_space<vmem>>) attributes {dimension_semantics = [#tpu.dimension_semantics<parallel>], iteration_bounds = array<i64: 1>, scalar_prefetch = 0 : i64, scratch_operands = 0 : i64, tpu.core_type = #tpu.core_type<tc>, window_params = [{transform_indices = @transform_0, window_bounds = array<i64: 1, 16, 16>}, {pipeline_mode = #tpu.pipeline_mode<synchronous>, transform_indices = @transform_1, window_bounds = array<i64: 1, 16, 256>}, {pipeline_mode = #tpu.pipeline_mode<synchronous>, transform_indices = @transform_2, window_bounds = array<i64: 1, 256>}, {transform_indices = @transform_3, window_bounds = array<i64: 2, 16, 128>}]} {
    %c0 = arith.constant 0 : index
    %c0_0 = arith.constant 0 : index
    %c0_1 = arith.constant 0 : index
    %0 = vector.load %arg1[%c0, %c0_0, %c0_1] : memref<1x16x16xbf16, #tpu.memory_space<vmem>>, vector<1x16x16xbf16>
    %1 = vector.shape_cast %0 : vector<1x16x16xbf16> to vector<16x16xbf16>
    %c0_2 = arith.constant 0 : index
    %c0_3 = arith.constant 0 : index
    %c0_4 = arith.constant 0 : index
    %2 = vector.load %arg2[%c0_2, %c0_3, %c0_4] : memref<1x16x256xbf16, #tpu.memory_space<vmem>>, vector<1x16x256xbf16>
    %3 = vector.shape_cast %2 : vector<1x16x256xbf16> to vector<16x256xbf16>
    %cst = arith.constant dense<0.000000e+00> : vector<16x256xf32>
    %4 = tpu.matmul %1, %3, %cst {dimension_numbers = #tpu.dot_dimension_numbers<[1], [0], [0], [1], [0, 0, 1, 1], [], []>} : vector<16x16xbf16>, vector<16x256xbf16>, vector<16x256xf32> -> vector<16x256xf32>
    %c0_5 = arith.constant 0 : index
    %c0_6 = arith.constant 0 : index
    %5 = vector.load %arg3[%c0_5, %c0_6] : memref<1x256xf32, #tpu.memory_space<vmem>>, vector<1x256xf32>
    %6 = vector.broadcast %5 : vector<1x256xf32> to vector<16x256xf32>
    %7 = arith.addf %4, %6 : vector<16x256xf32>
    %8 = vector.extract_strided_slice %7 {offsets = [0, 0], sizes = [16, 128], strides = [1, 1]} : vector<16x256xf32> to vector<16x128xf32>
    %c0_7 = arith.constant 0 : index
    %c0_8 = arith.constant 0 : index
    %c0_9 = arith.constant 0 : index
    %9 = vector.load %arg4[%c0_7, %c0_8, %c0_9] : memref<2x16x128xf32, #tpu.memory_space<vmem>>, vector<1x16x128xf32>
    %10 = vector.shape_cast %9 : vector<1x16x128xf32> to vector<16x128xf32>
    %11 = vector.shape_cast %8 : vector<16x128xf32> to vector<1x16x128xf32>
    tpu.vector_store %arg4[%c0_7, %c0_8, %c0_9], %11 {strides = array<i32>} : memref<2x16x128xf32, #tpu.memory_space<vmem>>, vector<1x16x128xf32>,
    %12 = vector.extract_strided_slice %7 {offsets = [0, 128], sizes = [16, 128], strides = [1, 1]} : vector<16x256xf32> to vector<16x128xf32>
    %c1 = arith.constant 1 : index
    %c0_10 = arith.constant 0 : index
    %c0_11 = arith.constant 0 : index
    %13 = vector.load %arg4[%c1, %c0_10, %c0_11] : memref<2x16x128xf32, #tpu.memory_space<vmem>>, vector<1x16x128xf32>
    %14 = vector.shape_cast %13 : vector<1x16x128xf32> to vector<16x128xf32>
    %15 = vector.shape_cast %12 : vector<16x128xf32> to vector<1x16x128xf32>
    tpu.vector_store %arg4[%c1, %c0_10, %c0_11], %15 {strides = array<i32>} : memref<2x16x128xf32, #tpu.memory_space<vmem>>, vector<1x16x128xf32>,
    return
  }
  func.func @transform_0(%arg0: i32) -> (i32, i32, i32) {
    %c0_i32 = arith.constant 0 : i32
    %c0_i32_0 = arith.constant 0 : i32
    %c0_i32_1 = arith.constant 0 : i32
    return %c0_i32, %arg0, %c0_i32_0 : i32, i32, i32
  }
  func.func @transform_1(%arg0: i32) -> (i32, i32, i32) {
    %c0_i32 = arith.constant 0 : i32
    %c0_i32_0 = arith.constant 0 : i32
    %c0_i32_1 = arith.constant 0 : i32
    %c0_i32_2 = arith.constant 0 : i32
    return %c0_i32, %c0_i32_0, %c0_i32_1 : i32, i32, i32
  }
  func.func @transform_2(%arg0: i32) -> (i32, i32) {
    %c0_i32 = arith.constant 0 : i32
    %c0_i32_0 = arith.constant 0 : i32
    %c0_i32_1 = arith.constant 0 : i32
    return %c0_i32, %c0_i32_0 : i32, i32
  }
  func.func @transform_3(%arg0: i32) -> (i32, i32, i32) {
    %c0_i32 = arith.constant 0 : i32
    %c0_i32_0 = arith.constant 0 : i32
    %c0_i32_1 = arith.constant 0 : i32
    return %c0_i32, %arg0, %c0_i32_0 : i32, i32, i32
  }
}

module attributes {stable_mosaic.version = 11 : i64} {
  func.func @kernel(%arg0: i32, %arg1: i32, %arg2: i32, %arg3: memref<1x8x2x128xf32, #tpu.memory_space<vmem>>, %arg4: memref<1x32x128xbf16, #tpu.memory_space<vmem>>, %arg5: memref<1x8x2x32xbf16, #tpu.memory_space<vmem>>, %arg6: memref<2x32xbf16, #tpu.memory_space<vmem>>, %arg7: memref<2x32xf32, #tpu.memory_space<vmem>>) attributes {dimension_semantics = [#tpu.dimension_semantics<parallel>, #tpu.dimension_semantics<parallel>, #tpu.dimension_semantics<arbitrary>], iteration_bounds = array<i64: 2, 1, 1>, scalar_prefetch = 0 : i64, scratch_operands = 2 : i64, tpu.core_type = #tpu.core_type<tc>, window_params = [{transform_indices = @transform_0, window_bounds = array<i64: 1, 8, 2, 128>}, {pipeline_mode = #tpu.pipeline_mode<synchronous>, transform_indices = @transform_1, window_bounds = array<i64: 1, 32, 128>}, {transform_indices = @transform_2, window_bounds = array<i64: 1, 8, 2, 32>}]} {
    %c0_i32 = arith.constant 0 : i32
    %0 = arith.cmpi eq, %arg2, %c0_i32 : i32
    %1 = arith.extui %0 : i1 to i32
    %c0_i32_0 = arith.constant 0 : i32
    %2 = arith.cmpi ne, %1, %c0_i32_0 : i32
    scf.if %2 {
      %cst = arith.constant 0.000000e+00 : bf16
      %11 = vector.broadcast %cst : bf16 to vector<2x32xbf16>
      %c0_6 = arith.constant 0 : index
      %c0_7 = arith.constant 0 : index
      %12 = vector.load %arg6[%c0_6, %c0_7] : memref<2x32xbf16, #tpu.memory_space<vmem>>, vector<2x32xbf16>
      tpu.vector_store %arg6[%c0_6, %c0_7], %11 {strides = array<i32>} : memref<2x32xbf16, #tpu.memory_space<vmem>>, vector<2x32xbf16>,
      %cst_8 = arith.constant 0.000000e+00 : f32
      %13 = vector.broadcast %cst_8 : f32 to vector<2x32xf32>
      %c0_9 = arith.constant 0 : index
      %c0_10 = arith.constant 0 : index
      %14 = vector.load %arg7[%c0_9, %c0_10] : memref<2x32xf32, #tpu.memory_space<vmem>>, vector<2x32xf32>
      tpu.vector_store %arg7[%c0_9, %c0_10], %13 {strides = array<i32>} : memref<2x32xf32, #tpu.memory_space<vmem>>, vector<2x32xf32>,
    } else {
    }
    %c0 = arith.constant 0 : index
    %c0_1 = arith.constant 0 : index
    %c0_2 = arith.constant 0 : index
    %3 = vector.load %arg4[%c0, %c0_1, %c0_2] : memref<1x32x128xbf16, #tpu.memory_space<vmem>>, vector<1x32x128xbf16>
    %4 = vector.shape_cast %3 : vector<1x32x128xbf16> to vector<32x128xbf16>
    %c0_i32_3 = arith.constant 0 : i32
    %5 = arith.cmpi eq, %arg0, %c0_i32_3 : i32
    %6 = arith.extui %5 : i1 to i32
    %c0_i32_4 = arith.constant 0 : i32
    %7 = arith.cmpi ne, %6, %c0_i32_4 : i32
    scf.if %7 {
      %c0_6 = arith.constant 0 : index
      %c0_7 = arith.constant 0 : index
      %c0_8 = arith.constant 0 : index
      %c0_9 = arith.constant 0 : index
      %11 = vector.load %arg3[%c0_6, %c0_7, %c0_8, %c0_9] : memref<1x8x2x128xf32, #tpu.memory_space<vmem>>, vector<1x1x2x128xf32>
      %12 = vector.shape_cast %11 : vector<1x1x2x128xf32> to vector<2x128xf32>
      %c0_10 = arith.constant 0 : index
      %c0_11 = arith.constant 0 : index
      %13 = vector.load %arg6[%c0_10, %c0_11] : memref<2x32xbf16, #tpu.memory_space<vmem>>, vector<2x32xbf16>
      %cst = arith.constant dense<0.000000e+00> : vector<2x128xf32>
      %14 = tpu.matmul %13, %4, %cst {dimension_numbers = #tpu.dot_dimension_numbers<[1], [0], [0], [1], [0, 0, 1, 1], [], []>} : vector<2x32xbf16>, vector<32x128xbf16>, vector<2x128xf32> -> vector<2x128xf32>
      %15 = arith.addf %12, %14 : vector<2x128xf32>
      %16 = vector.extract_strided_slice %15 {offsets = [0, 0], sizes = [2, 32], strides = [1, 1]} : vector<2x128xf32> to vector<2x32xf32>
      %cst_12 = arith.constant 5.000000e-01 : f32
      %17 = vector.broadcast %cst_12 : f32 to vector<2x32xf32>
      %18 = arith.mulf %17, %16 : vector<2x32xf32>
      %19 = math.tanh %18 : vector<2x32xf32>
      %cst_13 = arith.constant 1.000000e+00 : f32
      %20 = vector.broadcast %cst_13 : f32 to vector<2x32xf32>
      %21 = arith.addf %19, %20 : vector<2x32xf32>
      %cst_14 = arith.constant 5.000000e-01 : f32
      %22 = vector.broadcast %cst_14 : f32 to vector<2x32xf32>
      %23 = arith.mulf %22, %21 : vector<2x32xf32>
      %24 = vector.extract_strided_slice %15 {offsets = [0, 32], sizes = [2, 32], strides = [1, 1]} : vector<2x128xf32> to vector<2x32xf32>
      %cst_15 = arith.constant 5.000000e-01 : f32
      %25 = vector.broadcast %cst_15 : f32 to vector<2x32xf32>
      %26 = arith.mulf %25, %24 : vector<2x32xf32>
      %27 = math.tanh %26 : vector<2x32xf32>
      %cst_16 = arith.constant 1.000000e+00 : f32
      %28 = vector.broadcast %cst_16 : f32 to vector<2x32xf32>
      %29 = arith.addf %27, %28 : vector<2x32xf32>
      %cst_17 = arith.constant 5.000000e-01 : f32
      %30 = vector.broadcast %cst_17 : f32 to vector<2x32xf32>
      %31 = arith.mulf %30, %29 : vector<2x32xf32>
      %32 = vector.extract_strided_slice %15 {offsets = [0, 64], sizes = [2, 32], strides = [1, 1]} : vector<2x128xf32> to vector<2x32xf32>
      %33 = math.tanh %32 : vector<2x32xf32>
      %34 = vector.extract_strided_slice %15 {offsets = [0, 96], sizes = [2, 32], strides = [1, 1]} : vector<2x128xf32> to vector<2x32xf32>
      %cst_18 = arith.constant 5.000000e-01 : f32
      %35 = vector.broadcast %cst_18 : f32 to vector<2x32xf32>
      %36 = arith.mulf %35, %34 : vector<2x32xf32>
      %37 = math.tanh %36 : vector<2x32xf32>
      %cst_19 = arith.constant 1.000000e+00 : f32
      %38 = vector.broadcast %cst_19 : f32 to vector<2x32xf32>
      %39 = arith.addf %37, %38 : vector<2x32xf32>
      %cst_20 = arith.constant 5.000000e-01 : f32
      %40 = vector.broadcast %cst_20 : f32 to vector<2x32xf32>
      %41 = arith.mulf %40, %39 : vector<2x32xf32>
      %c0_21 = arith.constant 0 : index
      %c0_22 = arith.constant 0 : index
      %42 = vector.load %arg7[%c0_21, %c0_22] : memref<2x32xf32, #tpu.memory_space<vmem>>, vector<2x32xf32>
      %43 = arith.mulf %31, %42 : vector<2x32xf32>
      %44 = arith.mulf %23, %33 : vector<2x32xf32>
      %45 = arith.addf %43, %44 : vector<2x32xf32>
      %46 = math.tanh %45 : vector<2x32xf32>
      %47 = arith.mulf %41, %46 : vector<2x32xf32>
      %48 = arith.truncf %47 : vector<2x32xf32> to vector<2x32xbf16>
      %c0_23 = arith.constant 0 : index
      %c0_24 = arith.constant 0 : index
      %49 = vector.load %arg7[%c0_23, %c0_24] : memref<2x32xf32, #tpu.memory_space<vmem>>, vector<2x32xf32>
      tpu.vector_store %arg7[%c0_23, %c0_24], %45 {strides = array<i32>} : memref<2x32xf32, #tpu.memory_space<vmem>>, vector<2x32xf32>,
      %c0_25 = arith.constant 0 : index
      %c0_26 = arith.constant 0 : index
      %50 = vector.load %arg6[%c0_25, %c0_26] : memref<2x32xbf16, #tpu.memory_space<vmem>>, vector<2x32xbf16>
      tpu.vector_store %arg6[%c0_25, %c0_26], %48 {strides = array<i32>} : memref<2x32xbf16, #tpu.memory_space<vmem>>, vector<2x32xbf16>,
      %c0_27 = arith.constant 0 : index
      %c0_28 = arith.constant 0 : index
      %c0_29 = arith.constant 0 : index
      %c0_30 = arith.constant 0 : index
      %51 = vector.load %arg5[%c0_27, %c0_28, %c0_29, %c0_30] : memref<1x8x2x32xbf16, #tpu.memory_space<vmem>>, vector<1x1x2x32xbf16>
      %52 = vector.shape_cast %51 : vector<1x1x2x32xbf16> to vector<2x32xbf16>
      %53 = vector.shape_cast %48 : vector<2x32xbf16> to vector<1x1x2x32xbf16>
      tpu.vector_store %arg5[%c0_27, %c0_28, %c0_29, %c0_30], %53 {strides = array<i32>} : memref<1x8x2x32xbf16, #tpu.memory_space<vmem>>, vector<1x1x2x32xbf16>,
      %c0_31 = arith.constant 0 : index
      %c1 = arith.constant 1 : index
      %c0_32 = arith.constant 0 : index
      %c0_33 = arith.constant 0 : index
      %54 = vector.load %arg3[%c0_31, %c1, %c0_32, %c0_33] : memref<1x8x2x128xf32, #tpu.memory_space<vmem>>, vector<1x1x2x128xf32>
      %55 = vector.shape_cast %54 : vector<1x1x2x128xf32> to vector<2x128xf32>
      %c0_34 = arith.constant 0 : index
      %c0_35 = arith.constant 0 : index
      %56 = vector.load %arg6[%c0_34, %c0_35] : memref<2x32xbf16, #tpu.memory_space<vmem>>, vector<2x32xbf16>
      %cst_36 = arith.constant dense<0.000000e+00> : vector<2x128xf32>
      %57 = tpu.matmul %56, %4, %cst_36 {dimension_numbers = #tpu.dot_dimension_numbers<[1], [0], [0], [1], [0, 0, 1, 1], [], []>} : vector<2x32xbf16>, vector<32x128xbf16>, vector<2x128xf32> -> vector<2x128xf32>
      %58 = arith.addf %55, %57 : vector<2x128xf32>
      %59 = vector.extract_strided_slice %58 {offsets = [0, 0], sizes = [2, 32], strides = [1, 1]} : vector<2x128xf32> to vector<2x32xf32>
      %cst_37 = arith.constant 5.000000e-01 : f32
      %60 = vector.broadcast %cst_37 : f32 to vector<2x32xf32>
      %61 = arith.mulf %60, %59 : vector<2x32xf32>
      %62 = math.tanh %61 : vector<2x32xf32>
      %cst_38 = arith.constant 1.000000e+00 : f32
      %63 = vector.broadcast %cst_38 : f32 to vector<2x32xf32>
      %64 = arith.addf %62, %63 : vector<2x32xf32>
      %cst_39 = arith.constant 5.000000e-01 : f32
      %65 = vector.broadcast %cst_39 : f32 to vector<2x32xf32>
      %66 = arith.mulf %65, %64 : vector<2x32xf32>
      %67 = vector.extract_strided_slice %58 {offsets = [0, 32], sizes = [2, 32], strides = [1, 1]} : vector<2x128xf32> to vector<2x32xf32>
      %cst_40 = arith.constant 5.000000e-01 : f32
      %68 = vector.broadcast %cst_40 : f32 to vector<2x32xf32>
      %69 = arith.mulf %68, %67 : vector<2x32xf32>
      %70 = math.tanh %69 : vector<2x32xf32>
      %cst_41 = arith.constant 1.000000e+00 : f32
      %71 = vector.broadcast %cst_41 : f32 to vector<2x32xf32>
      %72 = arith.addf %70, %71 : vector<2x32xf32>
      %cst_42 = arith.constant 5.000000e-01 : f32
      %73 = vector.broadcast %cst_42 : f32 to vector<2x32xf32>
      %74 = arith.mulf %73, %72 : vector<2x32xf32>
      %75 = vector.extract_strided_slice %58 {offsets = [0, 64], sizes = [2, 32], strides = [1, 1]} : vector<2x128xf32> to vector<2x32xf32>
      %76 = math.tanh %75 : vector<2x32xf32>
      %77 = vector.extract_strided_slice %58 {offsets = [0, 96], sizes = [2, 32], strides = [1, 1]} : vector<2x128xf32> to vector<2x32xf32>
      %cst_43 = arith.constant 5.000000e-01 : f32
      %78 = vector.broadcast %cst_43 : f32 to vector<2x32xf32>
      %79 = arith.mulf %78, %77 : vector<2x32xf32>
      %80 = math.tanh %79 : vector<2x32xf32>
      %cst_44 = arith.constant 1.000000e+00 : f32
      %81 = vector.broadcast %cst_44 : f32 to vector<2x32xf32>
      %82 = arith.addf %80, %81 : vector<2x32xf32>
      %cst_45 = arith.constant 5.000000e-01 : f32
      %83 = vector.broadcast %cst_45 : f32 to vector<2x32xf32>
      %84 = arith.mulf %83, %82 : vector<2x32xf32>
      %c0_46 = arith.constant 0 : index
      %c0_47 = arith.constant 0 : index
      %85 = vector.load %arg7[%c0_46, %c0_47] : memref<2x32xf32, #tpu.memory_space<vmem>>, vector<2x32xf32>
      %86 = arith.mulf %74, %85 : vector<2x32xf32>
      %87 = arith.mulf %66, %76 : vector<2x32xf32>
      %88 = arith.addf %86, %87 : vector<2x32xf32>
      %89 = math.tanh %88 : vector<2x32xf32>
      %90 = arith.mulf %84, %89 : vector<2x32xf32>
      %91 = arith.truncf %90 : vector<2x32xf32> to vector<2x32xbf16>
      %c0_48 = arith.constant 0 : index
      %c0_49 = arith.constant 0 : index
      %92 = vector.load %arg7[%c0_48, %c0_49] : memref<2x32xf32, #tpu.memory_space<vmem>>, vector<2x32xf32>
      tpu.vector_store %arg7[%c0_48, %c0_49], %88 {strides = array<i32>} : memref<2x32xf32, #tpu.memory_space<vmem>>, vector<2x32xf32>,
      %c0_50 = arith.constant 0 : index
      %c0_51 = arith.constant 0 : index
      %93 = vector.load %arg6[%c0_50, %c0_51] : memref<2x32xbf16, #tpu.memory_space<vmem>>, vector<2x32xbf16>
      tpu.vector_store %arg6[%c0_50, %c0_51], %91 {strides = array<i32>} : memref<2x32xbf16, #tpu.memory_space<vmem>>, vector<2x32xbf16>,
      %c0_52 = arith.constant 0 : index
      %c1_53 = arith.constant 1 : index
      %c0_54 = arith.constant 0 : index
      %c0_55 = arith.constant 0 : index
      %94 = vector.load %arg5[%c0_52, %c1_53, %c0_54, %c0_55] : memref<1x8x2x32xbf16, #tpu.memory_space<vmem>>, vector<1x1x2x32xbf16>
      %95 = vector.shape_cast %94 : vector<1x1x2x32xbf16> to vector<2x32xbf16>
      %96 = vector.shape_cast %91 : vector<2x32xbf16> to vector<1x1x2x32xbf16>
      tpu.vector_store %arg5[%c0_52, %c1_53, %c0_54, %c0_55], %96 {strides = array<i32>} : memref<1x8x2x32xbf16, #tpu.memory_space<vmem>>, vector<1x1x2x32xbf16>,
      %c0_56 = arith.constant 0 : index
      %c2 = arith.constant 2 : index
      %c0_57 = arith.constant 0 : index
      %c0_58 = arith.constant 0 : index
      %97 = vector.load %arg3[%c0_56, %c2, %c0_57, %c0_58] : memref<1x8x2x128xf32, #tpu.memory_space<vmem>>, vector<1x1x2x128xf32>
      %98 = vector.shape_cast %97 : vector<1x1x2x128xf32> to vector<2x128xf32>
      %c0_59 = arith.constant 0 : index
      %c0_60 = arith.constant 0 : index
      %99 = vector.load %arg6[%c0_59, %c0_60] : memref<2x32xbf16, #tpu.memory_space<vmem>>, vector<2x32xbf16>
      %cst_61 = arith.constant dense<0.000000e+00> : vector<2x128xf32>
      %100 = tpu.matmul %99, %4, %cst_61 {dimension_numbers = #tpu.dot_dimension_numbers<[1], [0], [0], [1], [0, 0, 1, 1], [], []>} : vector<2x32xbf16>, vector<32x128xbf16>, vector<2x128xf32> -> vector<2x128xf32>
      %101 = arith.addf %98, %100 : vector<2x128xf32>
      %102 = vector.extract_strided_slice %101 {offsets = [0, 0], sizes = [2, 32], strides = [1, 1]} : vector<2x128xf32> to vector<2x32xf32>
      %cst_62 = arith.constant 5.000000e-01 : f32
      %103 = vector.broadcast %cst_62 : f32 to vector<2x32xf32>
      %104 = arith.mulf %103, %102 : vector<2x32xf32>
      %105 = math.tanh %104 : vector<2x32xf32>
      %cst_63 = arith.constant 1.000000e+00 : f32
      %106 = vector.broadcast %cst_63 : f32 to vector<2x32xf32>
      %107 = arith.addf %105, %106 : vector<2x32xf32>
      %cst_64 = arith.constant 5.000000e-01 : f32
      %108 = vector.broadcast %cst_64 : f32 to vector<2x32xf32>
      %109 = arith.mulf %108, %107 : vector<2x32xf32>
      %110 = vector.extract_strided_slice %101 {offsets = [0, 32], sizes = [2, 32], strides = [1, 1]} : vector<2x128xf32> to vector<2x32xf32>
      %cst_65 = arith.constant 5.000000e-01 : f32
      %111 = vector.broadcast %cst_65 : f32 to vector<2x32xf32>
      %112 = arith.mulf %111, %110 : vector<2x32xf32>
      %113 = math.tanh %112 : vector<2x32xf32>
      %cst_66 = arith.constant 1.000000e+00 : f32
      %114 = vector.broadcast %cst_66 : f32 to vector<2x32xf32>
      %115 = arith.addf %113, %114 : vector<2x32xf32>
      %cst_67 = arith.constant 5.000000e-01 : f32
      %116 = vector.broadcast %cst_67 : f32 to vector<2x32xf32>
      %117 = arith.mulf %116, %115 : vector<2x32xf32>
      %118 = vector.extract_strided_slice %101 {offsets = [0, 64], sizes = [2, 32], strides = [1, 1]} : vector<2x128xf32> to vector<2x32xf32>
      %119 = math.tanh %118 : vector<2x32xf32>
      %120 = vector.extract_strided_slice %101 {offsets = [0, 96], sizes = [2, 32], strides = [1, 1]} : vector<2x128xf32> to vector<2x32xf32>
      %cst_68 = arith.constant 5.000000e-01 : f32
      %121 = vector.broadcast %cst_68 : f32 to vector<2x32xf32>
      %122 = arith.mulf %121, %120 : vector<2x32xf32>
      %123 = math.tanh %122 : vector<2x32xf32>
      %cst_69 = arith.constant 1.000000e+00 : f32
      %124 = vector.broadcast %cst_69 : f32 to vector<2x32xf32>
      %125 = arith.addf %123, %124 : vector<2x32xf32>
      %cst_70 = arith.constant 5.000000e-01 : f32
      %126 = vector.broadcast %cst_70 : f32 to vector<2x32xf32>
      %127 = arith.mulf %126, %125 : vector<2x32xf32>
      %c0_71 = arith.constant 0 : index
      %c0_72 = arith.constant 0 : index
      %128 = vector.load %arg7[%c0_71, %c0_72] : memref<2x32xf32, #tpu.memory_space<vmem>>, vector<2x32xf32>
      %129 = arith.mulf %117, %128 : vector<2x32xf32>
      %130 = arith.mulf %109, %119 : vector<2x32xf32>
      %131 = arith.addf %129, %130 : vector<2x32xf32>
      %132 = math.tanh %131 : vector<2x32xf32>
      %133 = arith.mulf %127, %132 : vector<2x32xf32>
      %134 = arith.truncf %133 : vector<2x32xf32> to vector<2x32xbf16>
      %c0_73 = arith.constant 0 : index
      %c0_74 = arith.constant 0 : index
      %135 = vector.load %arg7[%c0_73, %c0_74] : memref<2x32xf32, #tpu.memory_space<vmem>>, vector<2x32xf32>
      tpu.vector_store %arg7[%c0_73, %c0_74], %131 {strides = array<i32>} : memref<2x32xf32, #tpu.memory_space<vmem>>, vector<2x32xf32>,
      %c0_75 = arith.constant 0 : index
      %c0_76 = arith.constant 0 : index
      %136 = vector.load %arg6[%c0_75, %c0_76] : memref<2x32xbf16, #tpu.memory_space<vmem>>, vector<2x32xbf16>
      tpu.vector_store %arg6[%c0_75, %c0_76], %134 {strides = array<i32>} : memref<2x32xbf16, #tpu.memory_space<vmem>>, vector<2x32xbf16>,
      %c0_77 = arith.constant 0 : index
      %c2_78 = arith.constant 2 : index
      %c0_79 = arith.constant 0 : index
      %c0_80 = arith.constant 0 : index
      %137 = vector.load %arg5[%c0_77, %c2_78, %c0_79, %c0_80] : memref<1x8x2x32xbf16, #tpu.memory_space<vmem>>, vector<1x1x2x32xbf16>
      %138 = vector.shape_cast %137 : vector<1x1x2x32xbf16> to vector<2x32xbf16>
      %139 = vector.shape_cast %134 : vector<2x32xbf16> to vector<1x1x2x32xbf16>
      tpu.vector_store %arg5[%c0_77, %c2_78, %c0_79, %c0_80], %139 {strides = array<i32>} : memref<1x8x2x32xbf16, #tpu.memory_space<vmem>>, vector<1x1x2x32xbf16>,
      %c0_81 = arith.constant 0 : index
      %c3 = arith.constant 3 : index
      %c0_82 = arith.constant 0 : index
      %c0_83 = arith.constant 0 : index
      %140 = vector.load %arg3[%c0_81, %c3, %c0_82, %c0_83] : memref<1x8x2x128xf32, #tpu.memory_space<vmem>>, vector<1x1x2x128xf32>
      %141 = vector.shape_cast %140 : vector<1x1x2x128xf32> to vector<2x128xf32>
      %c0_84 = arith.constant 0 : index
      %c0_85 = arith.constant 0 : index
      %142 = vector.load %arg6[%c0_84, %c0_85] : memref<2x32xbf16, #tpu.memory_space<vmem>>, vector<2x32xbf16>
      %cst_86 = arith.constant dense<0.000000e+00> : vector<2x128xf32>
      %143 = tpu.matmul %142, %4, %cst_86 {dimension_numbers = #tpu.dot_dimension_numbers<[1], [0], [0], [1], [0, 0, 1, 1], [], []>} : vector<2x32xbf16>, vector<32x128xbf16>, vector<2x128xf32> -> vector<2x128xf32>
      %144 = arith.addf %141, %143 : vector<2x128xf32>
      %145 = vector.extract_strided_slice %144 {offsets = [0, 0], sizes = [2, 32], strides = [1, 1]} : vector<2x128xf32> to vector<2x32xf32>
      %cst_87 = arith.constant 5.000000e-01 : f32
      %146 = vector.broadcast %cst_87 : f32 to vector<2x32xf32>
      %147 = arith.mulf %146, %145 : vector<2x32xf32>
      %148 = math.tanh %147 : vector<2x32xf32>
      %cst_88 = arith.constant 1.000000e+00 : f32
      %149 = vector.broadcast %cst_88 : f32 to vector<2x32xf32>
      %150 = arith.addf %148, %149 : vector<2x32xf32>
      %cst_89 = arith.constant 5.000000e-01 : f32
      %151 = vector.broadcast %cst_89 : f32 to vector<2x32xf32>
      %152 = arith.mulf %151, %150 : vector<2x32xf32>
      %153 = vector.extract_strided_slice %144 {offsets = [0, 32], sizes = [2, 32], strides = [1, 1]} : vector<2x128xf32> to vector<2x32xf32>
      %cst_90 = arith.constant 5.000000e-01 : f32
      %154 = vector.broadcast %cst_90 : f32 to vector<2x32xf32>
      %155 = arith.mulf %154, %153 : vector<2x32xf32>
      %156 = math.tanh %155 : vector<2x32xf32>
      %cst_91 = arith.constant 1.000000e+00 : f32
      %157 = vector.broadcast %cst_91 : f32 to vector<2x32xf32>
      %158 = arith.addf %156, %157 : vector<2x32xf32>
      %cst_92 = arith.constant 5.000000e-01 : f32
      %159 = vector.broadcast %cst_92 : f32 to vector<2x32xf32>
      %160 = arith.mulf %159, %158 : vector<2x32xf32>
      %161 = vector.extract_strided_slice %144 {offsets = [0, 64], sizes = [2, 32], strides = [1, 1]} : vector<2x128xf32> to vector<2x32xf32>
      %162 = math.tanh %161 : vector<2x32xf32>
      %163 = vector.extract_strided_slice %144 {offsets = [0, 96], sizes = [2, 32], strides = [1, 1]} : vector<2x128xf32> to vector<2x32xf32>
      %cst_93 = arith.constant 5.000000e-01 : f32
      %164 = vector.broadcast %cst_93 : f32 to vector<2x32xf32>
      %165 = arith.mulf %164, %163 : vector<2x32xf32>
      %166 = math.tanh %165 : vector<2x32xf32>
      %cst_94 = arith.constant 1.000000e+00 : f32
      %167 = vector.broadcast %cst_94 : f32 to vector<2x32xf32>
      %168 = arith.addf %166, %167 : vector<2x32xf32>
      %cst_95 = arith.constant 5.000000e-01 : f32
      %169 = vector.broadcast %cst_95 : f32 to vector<2x32xf32>
      %170 = arith.mulf %169, %168 : vector<2x32xf32>
      %c0_96 = arith.constant 0 : index
      %c0_97 = arith.constant 0 : index
      %171 = vector.load %arg7[%c0_96, %c0_97] : memref<2x32xf32, #tpu.memory_space<vmem>>, vector<2x32xf32>
      %172 = arith.mulf %160, %171 : vector<2x32xf32>
      %173 = arith.mulf %152, %162 : vector<2x32xf32>
      %174 = arith.addf %172, %173 : vector<2x32xf32>
      %175 = math.tanh %174 : vector<2x32xf32>
      %176 = arith.mulf %170, %175 : vector<2x32xf32>
      %177 = arith.truncf %176 : vector<2x32xf32> to vector<2x32xbf16>
      %c0_98 = arith.constant 0 : index
      %c0_99 = arith.constant 0 : index
      %178 = vector.load %arg7[%c0_98, %c0_99] : memref<2x32xf32, #tpu.memory_space<vmem>>, vector<2x32xf32>
      tpu.vector_store %arg7[%c0_98, %c0_99], %174 {strides = array<i32>} : memref<2x32xf32, #tpu.memory_space<vmem>>, vector<2x32xf32>,
      %c0_100 = arith.constant 0 : index
      %c0_101 = arith.constant 0 : index
      %179 = vector.load %arg6[%c0_100, %c0_101] : memref<2x32xbf16, #tpu.memory_space<vmem>>, vector<2x32xbf16>
      tpu.vector_store %arg6[%c0_100, %c0_101], %177 {strides = array<i32>} : memref<2x32xbf16, #tpu.memory_space<vmem>>, vector<2x32xbf16>,
      %c0_102 = arith.constant 0 : index
      %c3_103 = arith.constant 3 : index
      %c0_104 = arith.constant 0 : index
      %c0_105 = arith.constant 0 : index
      %180 = vector.load %arg5[%c0_102, %c3_103, %c0_104, %c0_105] : memref<1x8x2x32xbf16, #tpu.memory_space<vmem>>, vector<1x1x2x32xbf16>
      %181 = vector.shape_cast %180 : vector<1x1x2x32xbf16> to vector<2x32xbf16>
      %182 = vector.shape_cast %177 : vector<2x32xbf16> to vector<1x1x2x32xbf16>
      tpu.vector_store %arg5[%c0_102, %c3_103, %c0_104, %c0_105], %182 {strides = array<i32>} : memref<1x8x2x32xbf16, #tpu.memory_space<vmem>>, vector<1x1x2x32xbf16>,
      %c0_106 = arith.constant 0 : index
      %c4 = arith.constant 4 : index
      %c0_107 = arith.constant 0 : index
      %c0_108 = arith.constant 0 : index
      %183 = vector.load %arg3[%c0_106, %c4, %c0_107, %c0_108] : memref<1x8x2x128xf32, #tpu.memory_space<vmem>>, vector<1x1x2x128xf32>
      %184 = vector.shape_cast %183 : vector<1x1x2x128xf32> to vector<2x128xf32>
      %c0_109 = arith.constant 0 : index
      %c0_110 = arith.constant 0 : index
      %185 = vector.load %arg6[%c0_109, %c0_110] : memref<2x32xbf16, #tpu.memory_space<vmem>>, vector<2x32xbf16>
      %cst_111 = arith.constant dense<0.000000e+00> : vector<2x128xf32>
      %186 = tpu.matmul %185, %4, %cst_111 {dimension_numbers = #tpu.dot_dimension_numbers<[1], [0], [0], [1], [0, 0, 1, 1], [], []>} : vector<2x32xbf16>, vector<32x128xbf16>, vector<2x128xf32> -> vector<2x128xf32>
      %187 = arith.addf %184, %186 : vector<2x128xf32>
      %188 = vector.extract_strided_slice %187 {offsets = [0, 0], sizes = [2, 32], strides = [1, 1]} : vector<2x128xf32> to vector<2x32xf32>
      %cst_112 = arith.constant 5.000000e-01 : f32
      %189 = vector.broadcast %cst_112 : f32 to vector<2x32xf32>
      %190 = arith.mulf %189, %188 : vector<2x32xf32>
      %191 = math.tanh %190 : vector<2x32xf32>
      %cst_113 = arith.constant 1.000000e+00 : f32
      %192 = vector.broadcast %cst_113 : f32 to vector<2x32xf32>
      %193 = arith.addf %191, %192 : vector<2x32xf32>
      %cst_114 = arith.constant 5.000000e-01 : f32
      %194 = vector.broadcast %cst_114 : f32 to vector<2x32xf32>
      %195 = arith.mulf %194, %193 : vector<2x32xf32>
      %196 = vector.extract_strided_slice %187 {offsets = [0, 32], sizes = [2, 32], strides = [1, 1]} : vector<2x128xf32> to vector<2x32xf32>
      %cst_115 = arith.constant 5.000000e-01 : f32
      %197 = vector.broadcast %cst_115 : f32 to vector<2x32xf32>
      %198 = arith.mulf %197, %196 : vector<2x32xf32>
      %199 = math.tanh %198 : vector<2x32xf32>
      %cst_116 = arith.constant 1.000000e+00 : f32
      %200 = vector.broadcast %cst_116 : f32 to vector<2x32xf32>
      %201 = arith.addf %199, %200 : vector<2x32xf32>
      %cst_117 = arith.constant 5.000000e-01 : f32
      %202 = vector.broadcast %cst_117 : f32 to vector<2x32xf32>
      %203 = arith.mulf %202, %201 : vector<2x32xf32>
      %204 = vector.extract_strided_slice %187 {offsets = [0, 64], sizes = [2, 32], strides = [1, 1]} : vector<2x128xf32> to vector<2x32xf32>
      %205 = math.tanh %204 : vector<2x32xf32>
      %206 = vector.extract_strided_slice %187 {offsets = [0, 96], sizes = [2, 32], strides = [1, 1]} : vector<2x128xf32> to vector<2x32xf32>
      %cst_118 = arith.constant 5.000000e-01 : f32
      %207 = vector.broadcast %cst_118 : f32 to vector<2x32xf32>
      %208 = arith.mulf %207, %206 : vector<2x32xf32>
      %209 = math.tanh %208 : vector<2x32xf32>
      %cst_119 = arith.constant 1.000000e+00 : f32
      %210 = vector.broadcast %cst_119 : f32 to vector<2x32xf32>
      %211 = arith.addf %209, %210 : vector<2x32xf32>
      %cst_120 = arith.constant 5.000000e-01 : f32
      %212 = vector.broadcast %cst_120 : f32 to vector<2x32xf32>
      %213 = arith.mulf %212, %211 : vector<2x32xf32>
      %c0_121 = arith.constant 0 : index
      %c0_122 = arith.constant 0 : index
      %214 = vector.load %arg7[%c0_121, %c0_122] : memref<2x32xf32, #tpu.memory_space<vmem>>, vector<2x32xf32>
      %215 = arith.mulf %203, %214 : vector<2x32xf32>
      %216 = arith.mulf %195, %205 : vector<2x32xf32>
      %217 = arith.addf %215, %216 : vector<2x32xf32>
      %218 = math.tanh %217 : vector<2x32xf32>
      %219 = arith.mulf %213, %218 : vector<2x32xf32>
      %220 = arith.truncf %219 : vector<2x32xf32> to vector<2x32xbf16>
      %c0_123 = arith.constant 0 : index
      %c0_124 = arith.constant 0 : index
      %221 = vector.load %arg7[%c0_123, %c0_124] : memref<2x32xf32, #tpu.memory_space<vmem>>, vector<2x32xf32>
      tpu.vector_store %arg7[%c0_123, %c0_124], %217 {strides = array<i32>} : memref<2x32xf32, #tpu.memory_space<vmem>>, vector<2x32xf32>,
      %c0_125 = arith.constant 0 : index
      %c0_126 = arith.constant 0 : index
      %222 = vector.load %arg6[%c0_125, %c0_126] : memref<2x32xbf16, #tpu.memory_space<vmem>>, vector<2x32xbf16>
      tpu.vector_store %arg6[%c0_125, %c0_126], %220 {strides = array<i32>} : memref<2x32xbf16, #tpu.memory_space<vmem>>, vector<2x32xbf16>,
      %c0_127 = arith.constant 0 : index
      %c4_128 = arith.constant 4 : index
      %c0_129 = arith.constant 0 : index
      %c0_130 = arith.constant 0 : index
      %223 = vector.load %arg5[%c0_127, %c4_128, %c0_129, %c0_130] : memref<1x8x2x32xbf16, #tpu.memory_space<vmem>>, vector<1x1x2x32xbf16>
      %224 = vector.shape_cast %223 : vector<1x1x2x32xbf16> to vector<2x32xbf16>
      %225 = vector.shape_cast %220 : vector<2x32xbf16> to vector<1x1x2x32xbf16>
      tpu.vector_store %arg5[%c0_127, %c4_128, %c0_129, %c0_130], %225 {strides = array<i32>} : memref<1x8x2x32xbf16, #tpu.memory_space<vmem>>, vector<1x1x2x32xbf16>,
      %c0_131 = arith.constant 0 : index
      %c5 = arith.constant 5 : index
      %c0_132 = arith.constant 0 : index
      %c0_133 = arith.constant 0 : index
      %226 = vector.load %arg3[%c0_131, %c5, %c0_132, %c0_133] : memref<1x8x2x128xf32, #tpu.memory_space<vmem>>, vector<1x1x2x128xf32>
      %227 = vector.shape_cast %226 : vector<1x1x2x128xf32> to vector<2x128xf32>
      %c0_134 = arith.constant 0 : index
      %c0_135 = arith.constant 0 : index
      %228 = vector.load %arg6[%c0_134, %c0_135] : memref<2x32xbf16, #tpu.memory_space<vmem>>, vector<2x32xbf16>
      %cst_136 = arith.constant dense<0.000000e+00> : vector<2x128xf32>
      %229 = tpu.matmul %228, %4, %cst_136 {dimension_numbers = #tpu.dot_dimension_numbers<[1], [0], [0], [1], [0, 0, 1, 1], [], []>} : vector<2x32xbf16>, vector<32x128xbf16>, vector<2x128xf32> -> vector<2x128xf32>
      %230 = arith.addf %227, %229 : vector<2x128xf32>
      %231 = vector.extract_strided_slice %230 {offsets = [0, 0], sizes = [2, 32], strides = [1, 1]} : vector<2x128xf32> to vector<2x32xf32>
      %cst_137 = arith.constant 5.000000e-01 : f32
      %232 = vector.broadcast %cst_137 : f32 to vector<2x32xf32>
      %233 = arith.mulf %232, %231 : vector<2x32xf32>
      %234 = math.tanh %233 : vector<2x32xf32>
      %cst_138 = arith.constant 1.000000e+00 : f32
      %235 = vector.broadcast %cst_138 : f32 to vector<2x32xf32>
      %236 = arith.addf %234, %235 : vector<2x32xf32>
      %cst_139 = arith.constant 5.000000e-01 : f32
      %237 = vector.broadcast %cst_139 : f32 to vector<2x32xf32>
      %238 = arith.mulf %237, %236 : vector<2x32xf32>
      %239 = vector.extract_strided_slice %230 {offsets = [0, 32], sizes = [2, 32], strides = [1, 1]} : vector<2x128xf32> to vector<2x32xf32>
      %cst_140 = arith.constant 5.000000e-01 : f32
      %240 = vector.broadcast %cst_140 : f32 to vector<2x32xf32>
      %241 = arith.mulf %240, %239 : vector<2x32xf32>
      %242 = math.tanh %241 : vector<2x32xf32>
      %cst_141 = arith.constant 1.000000e+00 : f32
      %243 = vector.broadcast %cst_141 : f32 to vector<2x32xf32>
      %244 = arith.addf %242, %243 : vector<2x32xf32>
      %cst_142 = arith.constant 5.000000e-01 : f32
      %245 = vector.broadcast %cst_142 : f32 to vector<2x32xf32>
      %246 = arith.mulf %245, %244 : vector<2x32xf32>
      %247 = vector.extract_strided_slice %230 {offsets = [0, 64], sizes = [2, 32], strides = [1, 1]} : vector<2x128xf32> to vector<2x32xf32>
      %248 = math.tanh %247 : vector<2x32xf32>
      %249 = vector.extract_strided_slice %230 {offsets = [0, 96], sizes = [2, 32], strides = [1, 1]} : vector<2x128xf32> to vector<2x32xf32>
      %cst_143 = arith.constant 5.000000e-01 : f32
      %250 = vector.broadcast %cst_143 : f32 to vector<2x32xf32>
      %251 = arith.mulf %250, %249 : vector<2x32xf32>
      %252 = math.tanh %251 : vector<2x32xf32>
      %cst_144 = arith.constant 1.000000e+00 : f32
      %253 = vector.broadcast %cst_144 : f32 to vector<2x32xf32>
      %254 = arith.addf %252, %253 : vector<2x32xf32>
      %cst_145 = arith.constant 5.000000e-01 : f32
      %255 = vector.broadcast %cst_145 : f32 to vector<2x32xf32>
      %256 = arith.mulf %255, %254 : vector<2x32xf32>
      %c0_146 = arith.constant 0 : index
      %c0_147 = arith.constant 0 : index
      %257 = vector.load %arg7[%c0_146, %c0_147] : memref<2x32xf32, #tpu.memory_space<vmem>>, vector<2x32xf32>
      %258 = arith.mulf %246, %257 : vector<2x32xf32>
      %259 = arith.mulf %238, %248 : vector<2x32xf32>
      %260 = arith.addf %258, %259 : vector<2x32xf32>
      %261 = math.tanh %260 : vector<2x32xf32>
      %262 = arith.mulf %256, %261 : vector<2x32xf32>
      %263 = arith.truncf %262 : vector<2x32xf32> to vector<2x32xbf16>
      %c0_148 = arith.constant 0 : index
      %c0_149 = arith.constant 0 : index
      %264 = vector.load %arg7[%c0_148, %c0_149] : memref<2x32xf32, #tpu.memory_space<vmem>>, vector<2x32xf32>
      tpu.vector_store %arg7[%c0_148, %c0_149], %260 {strides = array<i32>} : memref<2x32xf32, #tpu.memory_space<vmem>>, vector<2x32xf32>,
      %c0_150 = arith.constant 0 : index
      %c0_151 = arith.constant 0 : index
      %265 = vector.load %arg6[%c0_150, %c0_151] : memref<2x32xbf16, #tpu.memory_space<vmem>>, vector<2x32xbf16>
      tpu.vector_store %arg6[%c0_150, %c0_151], %263 {strides = array<i32>} : memref<2x32xbf16, #tpu.memory_space<vmem>>, vector<2x32xbf16>,
      %c0_152 = arith.constant 0 : index
      %c5_153 = arith.constant 5 : index
      %c0_154 = arith.constant 0 : index
      %c0_155 = arith.constant 0 : index
      %266 = vector.load %arg5[%c0_152, %c5_153, %c0_154, %c0_155] : memref<1x8x2x32xbf16, #tpu.memory_space<vmem>>, vector<1x1x2x32xbf16>
      %267 = vector.shape_cast %266 : vector<1x1x2x32xbf16> to vector<2x32xbf16>
      %268 = vector.shape_cast %263 : vector<2x32xbf16> to vector<1x1x2x32xbf16>
      tpu.vector_store %arg5[%c0_152, %c5_153, %c0_154, %c0_155], %268 {strides = array<i32>} : memref<1x8x2x32xbf16, #tpu.memory_space<vmem>>, vector<1x1x2x32xbf16>,
      %c0_156 = arith.constant 0 : index
      %c6 = arith.constant 6 : index
      %c0_157 = arith.constant 0 : index
      %c0_158 = arith.constant 0 : index
      %269 = vector.load %arg3[%c0_156, %c6, %c0_157, %c0_158] : memref<1x8x2x128xf32, #tpu.memory_space<vmem>>, vector<1x1x2x128xf32>
      %270 = vector.shape_cast %269 : vector<1x1x2x128xf32> to vector<2x128xf32>
      %c0_159 = arith.constant 0 : index
      %c0_160 = arith.constant 0 : index
      %271 = vector.load %arg6[%c0_159, %c0_160] : memref<2x32xbf16, #tpu.memory_space<vmem>>, vector<2x32xbf16>
      %cst_161 = arith.constant dense<0.000000e+00> : vector<2x128xf32>
      %272 = tpu.matmul %271, %4, %cst_161 {dimension_numbers = #tpu.dot_dimension_numbers<[1], [0], [0], [1], [0, 0, 1, 1], [], []>} : vector<2x32xbf16>, vector<32x128xbf16>, vector<2x128xf32> -> vector<2x128xf32>
      %273 = arith.addf %270, %272 : vector<2x128xf32>
      %274 = vector.extract_strided_slice %273 {offsets = [0, 0], sizes = [2, 32], strides = [1, 1]} : vector<2x128xf32> to vector<2x32xf32>
      %cst_162 = arith.constant 5.000000e-01 : f32
      %275 = vector.broadcast %cst_162 : f32 to vector<2x32xf32>
      %276 = arith.mulf %275, %274 : vector<2x32xf32>
      %277 = math.tanh %276 : vector<2x32xf32>
      %cst_163 = arith.constant 1.000000e+00 : f32
      %278 = vector.broadcast %cst_163 : f32 to vector<2x32xf32>
      %279 = arith.addf %277, %278 : vector<2x32xf32>
      %cst_164 = arith.constant 5.000000e-01 : f32
      %280 = vector.broadcast %cst_164 : f32 to vector<2x32xf32>
      %281 = arith.mulf %280, %279 : vector<2x32xf32>
      %282 = vector.extract_strided_slice %273 {offsets = [0, 32], sizes = [2, 32], strides = [1, 1]} : vector<2x128xf32> to vector<2x32xf32>
      %cst_165 = arith.constant 5.000000e-01 : f32
      %283 = vector.broadcast %cst_165 : f32 to vector<2x32xf32>
      %284 = arith.mulf %283, %282 : vector<2x32xf32>
      %285 = math.tanh %284 : vector<2x32xf32>
      %cst_166 = arith.constant 1.000000e+00 : f32
      %286 = vector.broadcast %cst_166 : f32 to vector<2x32xf32>
      %287 = arith.addf %285, %286 : vector<2x32xf32>
      %cst_167 = arith.constant 5.000000e-01 : f32
      %288 = vector.broadcast %cst_167 : f32 to vector<2x32xf32>
      %289 = arith.mulf %288, %287 : vector<2x32xf32>
      %290 = vector.extract_strided_slice %273 {offsets = [0, 64], sizes = [2, 32], strides = [1, 1]} : vector<2x128xf32> to vector<2x32xf32>
      %291 = math.tanh %290 : vector<2x32xf32>
      %292 = vector.extract_strided_slice %273 {offsets = [0, 96], sizes = [2, 32], strides = [1, 1]} : vector<2x128xf32> to vector<2x32xf32>
      %cst_168 = arith.constant 5.000000e-01 : f32
      %293 = vector.broadcast %cst_168 : f32 to vector<2x32xf32>
      %294 = arith.mulf %293, %292 : vector<2x32xf32>
      %295 = math.tanh %294 : vector<2x32xf32>
      %cst_169 = arith.constant 1.000000e+00 : f32
      %296 = vector.broadcast %cst_169 : f32 to vector<2x32xf32>
      %297 = arith.addf %295, %296 : vector<2x32xf32>
      %cst_170 = arith.constant 5.000000e-01 : f32
      %298 = vector.broadcast %cst_170 : f32 to vector<2x32xf32>
      %299 = arith.mulf %298, %297 : vector<2x32xf32>
      %c0_171 = arith.constant 0 : index
      %c0_172 = arith.constant 0 : index
      %300 = vector.load %arg7[%c0_171, %c0_172] : memref<2x32xf32, #tpu.memory_space<vmem>>, vector<2x32xf32>
      %301 = arith.mulf %289, %300 : vector<2x32xf32>
      %302 = arith.mulf %281, %291 : vector<2x32xf32>
      %303 = arith.addf %301, %302 : vector<2x32xf32>
      %304 = math.tanh %303 : vector<2x32xf32>
      %305 = arith.mulf %299, %304 : vector<2x32xf32>
      %306 = arith.truncf %305 : vector<2x32xf32> to vector<2x32xbf16>
      %c0_173 = arith.constant 0 : index
      %c0_174 = arith.constant 0 : index
      %307 = vector.load %arg7[%c0_173, %c0_174] : memref<2x32xf32, #tpu.memory_space<vmem>>, vector<2x32xf32>
      tpu.vector_store %arg7[%c0_173, %c0_174], %303 {strides = array<i32>} : memref<2x32xf32, #tpu.memory_space<vmem>>, vector<2x32xf32>,
      %c0_175 = arith.constant 0 : index
      %c0_176 = arith.constant 0 : index
      %308 = vector.load %arg6[%c0_175, %c0_176] : memref<2x32xbf16, #tpu.memory_space<vmem>>, vector<2x32xbf16>
      tpu.vector_store %arg6[%c0_175, %c0_176], %306 {strides = array<i32>} : memref<2x32xbf16, #tpu.memory_space<vmem>>, vector<2x32xbf16>,
      %c0_177 = arith.constant 0 : index
      %c6_178 = arith.constant 6 : index
      %c0_179 = arith.constant 0 : index
      %c0_180 = arith.constant 0 : index
      %309 = vector.load %arg5[%c0_177, %c6_178, %c0_179, %c0_180] : memref<1x8x2x32xbf16, #tpu.memory_space<vmem>>, vector<1x1x2x32xbf16>
      %310 = vector.shape_cast %309 : vector<1x1x2x32xbf16> to vector<2x32xbf16>
      %311 = vector.shape_cast %306 : vector<2x32xbf16> to vector<1x1x2x32xbf16>
      tpu.vector_store %arg5[%c0_177, %c6_178, %c0_179, %c0_180], %311 {strides = array<i32>} : memref<1x8x2x32xbf16, #tpu.memory_space<vmem>>, vector<1x1x2x32xbf16>,
      %c0_181 = arith.constant 0 : index
      %c7 = arith.constant 7 : index
      %c0_182 = arith.constant 0 : index
      %c0_183 = arith.constant 0 : index
      %312 = vector.load %arg3[%c0_181, %c7, %c0_182, %c0_183] : memref<1x8x2x128xf32, #tpu.memory_space<vmem>>, vector<1x1x2x128xf32>
      %313 = vector.shape_cast %312 : vector<1x1x2x128xf32> to vector<2x128xf32>
      %c0_184 = arith.constant 0 : index
      %c0_185 = arith.constant 0 : index
      %314 = vector.load %arg6[%c0_184, %c0_185] : memref<2x32xbf16, #tpu.memory_space<vmem>>, vector<2x32xbf16>
      %cst_186 = arith.constant dense<0.000000e+00> : vector<2x128xf32>
      %315 = tpu.matmul %314, %4, %cst_186 {dimension_numbers = #tpu.dot_dimension_numbers<[1], [0], [0], [1], [0, 0, 1, 1], [], []>} : vector<2x32xbf16>, vector<32x128xbf16>, vector<2x128xf32> -> vector<2x128xf32>
      %316 = arith.addf %313, %315 : vector<2x128xf32>
      %317 = vector.extract_strided_slice %316 {offsets = [0, 0], sizes = [2, 32], strides = [1, 1]} : vector<2x128xf32> to vector<2x32xf32>
      %cst_187 = arith.constant 5.000000e-01 : f32
      %318 = vector.broadcast %cst_187 : f32 to vector<2x32xf32>
      %319 = arith.mulf %318, %317 : vector<2x32xf32>
      %320 = math.tanh %319 : vector<2x32xf32>
      %cst_188 = arith.constant 1.000000e+00 : f32
      %321 = vector.broadcast %cst_188 : f32 to vector<2x32xf32>
      %322 = arith.addf %320, %321 : vector<2x32xf32>
      %cst_189 = arith.constant 5.000000e-01 : f32
      %323 = vector.broadcast %cst_189 : f32 to vector<2x32xf32>
      %324 = arith.mulf %323, %322 : vector<2x32xf32>
      %325 = vector.extract_strided_slice %316 {offsets = [0, 32], sizes = [2, 32], strides = [1, 1]} : vector<2x128xf32> to vector<2x32xf32>
      %cst_190 = arith.constant 5.000000e-01 : f32
      %326 = vector.broadcast %cst_190 : f32 to vector<2x32xf32>
      %327 = arith.mulf %326, %325 : vector<2x32xf32>
      %328 = math.tanh %327 : vector<2x32xf32>
      %cst_191 = arith.constant 1.000000e+00 : f32
      %329 = vector.broadcast %cst_191 : f32 to vector<2x32xf32>
      %330 = arith.addf %328, %329 : vector<2x32xf32>
      %cst_192 = arith.constant 5.000000e-01 : f32
      %331 = vector.broadcast %cst_192 : f32 to vector<2x32xf32>
      %332 = arith.mulf %331, %330 : vector<2x32xf32>
      %333 = vector.extract_strided_slice %316 {offsets = [0, 64], sizes = [2, 32], strides = [1, 1]} : vector<2x128xf32> to vector<2x32xf32>
      %334 = math.tanh %333 : vector<2x32xf32>
      %335 = vector.extract_strided_slice %316 {offsets = [0, 96], sizes = [2, 32], strides = [1, 1]} : vector<2x128xf32> to vector<2x32xf32>
      %cst_193 = arith.constant 5.000000e-01 : f32
      %336 = vector.broadcast %cst_193 : f32 to vector<2x32xf32>
      %337 = arith.mulf %336, %335 : vector<2x32xf32>
      %338 = math.tanh %337 : vector<2x32xf32>
      %cst_194 = arith.constant 1.000000e+00 : f32
      %339 = vector.broadcast %cst_194 : f32 to vector<2x32xf32>
      %340 = arith.addf %338, %339 : vector<2x32xf32>
      %cst_195 = arith.constant 5.000000e-01 : f32
      %341 = vector.broadcast %cst_195 : f32 to vector<2x32xf32>
      %342 = arith.mulf %341, %340 : vector<2x32xf32>
      %c0_196 = arith.constant 0 : index
      %c0_197 = arith.constant 0 : index
      %343 = vector.load %arg7[%c0_196, %c0_197] : memref<2x32xf32, #tpu.memory_space<vmem>>, vector<2x32xf32>
      %344 = arith.mulf %332, %343 : vector<2x32xf32>
      %345 = arith.mulf %324, %334 : vector<2x32xf32>
      %346 = arith.addf %344, %345 : vector<2x32xf32>
      %347 = math.tanh %346 : vector<2x32xf32>
      %348 = arith.mulf %342, %347 : vector<2x32xf32>
      %349 = arith.truncf %348 : vector<2x32xf32> to vector<2x32xbf16>
      %c0_198 = arith.constant 0 : index
      %c0_199 = arith.constant 0 : index
      %350 = vector.load %arg7[%c0_198, %c0_199] : memref<2x32xf32, #tpu.memory_space<vmem>>, vector<2x32xf32>
      tpu.vector_store %arg7[%c0_198, %c0_199], %346 {strides = array<i32>} : memref<2x32xf32, #tpu.memory_space<vmem>>, vector<2x32xf32>,
      %c0_200 = arith.constant 0 : index
      %c0_201 = arith.constant 0 : index
      %351 = vector.load %arg6[%c0_200, %c0_201] : memref<2x32xbf16, #tpu.memory_space<vmem>>, vector<2x32xbf16>
      tpu.vector_store %arg6[%c0_200, %c0_201], %349 {strides = array<i32>} : memref<2x32xbf16, #tpu.memory_space<vmem>>, vector<2x32xbf16>,
      %c0_202 = arith.constant 0 : index
      %c7_203 = arith.constant 7 : index
      %c0_204 = arith.constant 0 : index
      %c0_205 = arith.constant 0 : index
      %352 = vector.load %arg5[%c0_202, %c7_203, %c0_204, %c0_205] : memref<1x8x2x32xbf16, #tpu.memory_space<vmem>>, vector<1x1x2x32xbf16>
      %353 = vector.shape_cast %352 : vector<1x1x2x32xbf16> to vector<2x32xbf16>
      %354 = vector.shape_cast %349 : vector<2x32xbf16> to vector<1x1x2x32xbf16>
      tpu.vector_store %arg5[%c0_202, %c7_203, %c0_204, %c0_205], %354 {strides = array<i32>} : memref<1x8x2x32xbf16, #tpu.memory_space<vmem>>, vector<1x1x2x32xbf16>,
    } else {
    }
    %c1_i32 = arith.constant 1 : i32
    %8 = arith.cmpi eq, %arg0, %c1_i32 : i32
    %9 = arith.extui %8 : i1 to i32
    %c0_i32_5 = arith.constant 0 : i32
    %10 = arith.cmpi ne, %9, %c0_i32_5 : i32
    scf.if %10 {
      %c0_6 = arith.constant 0 : index
      %c7 = arith.constant 7 : index
      %c0_7 = arith.constant 0 : index
      %c0_8 = arith.constant 0 : index
      %11 = vector.load %arg3[%c0_6, %c7, %c0_7, %c0_8] : memref<1x8x2x128xf32, #tpu.memory_space<vmem>>, vector<1x1x2x128xf32>
      %12 = vector.shape_cast %11 : vector<1x1x2x128xf32> to vector<2x128xf32>
      %c0_9 = arith.constant 0 : index
      %c0_10 = arith.constant 0 : index
      %13 = vector.load %arg6[%c0_9, %c0_10] : memref<2x32xbf16, #tpu.memory_space<vmem>>, vector<2x32xbf16>
      %cst = arith.constant dense<0.000000e+00> : vector<2x128xf32>
      %14 = tpu.matmul %13, %4, %cst {dimension_numbers = #tpu.dot_dimension_numbers<[1], [0], [0], [1], [0, 0, 1, 1], [], []>} : vector<2x32xbf16>, vector<32x128xbf16>, vector<2x128xf32> -> vector<2x128xf32>
      %15 = arith.addf %12, %14 : vector<2x128xf32>
      %16 = vector.extract_strided_slice %15 {offsets = [0, 0], sizes = [2, 32], strides = [1, 1]} : vector<2x128xf32> to vector<2x32xf32>
      %cst_11 = arith.constant 5.000000e-01 : f32
      %17 = vector.broadcast %cst_11 : f32 to vector<2x32xf32>
      %18 = arith.mulf %17, %16 : vector<2x32xf32>
      %19 = math.tanh %18 : vector<2x32xf32>
      %cst_12 = arith.constant 1.000000e+00 : f32
      %20 = vector.broadcast %cst_12 : f32 to vector<2x32xf32>
      %21 = arith.addf %19, %20 : vector<2x32xf32>
      %cst_13 = arith.constant 5.000000e-01 : f32
      %22 = vector.broadcast %cst_13 : f32 to vector<2x32xf32>
      %23 = arith.mulf %22, %21 : vector<2x32xf32>
      %24 = vector.extract_strided_slice %15 {offsets = [0, 32], sizes = [2, 32], strides = [1, 1]} : vector<2x128xf32> to vector<2x32xf32>
      %cst_14 = arith.constant 5.000000e-01 : f32
      %25 = vector.broadcast %cst_14 : f32 to vector<2x32xf32>
      %26 = arith.mulf %25, %24 : vector<2x32xf32>
      %27 = math.tanh %26 : vector<2x32xf32>
      %cst_15 = arith.constant 1.000000e+00 : f32
      %28 = vector.broadcast %cst_15 : f32 to vector<2x32xf32>
      %29 = arith.addf %27, %28 : vector<2x32xf32>
      %cst_16 = arith.constant 5.000000e-01 : f32
      %30 = vector.broadcast %cst_16 : f32 to vector<2x32xf32>
      %31 = arith.mulf %30, %29 : vector<2x32xf32>
      %32 = vector.extract_strided_slice %15 {offsets = [0, 64], sizes = [2, 32], strides = [1, 1]} : vector<2x128xf32> to vector<2x32xf32>
      %33 = math.tanh %32 : vector<2x32xf32>
      %34 = vector.extract_strided_slice %15 {offsets = [0, 96], sizes = [2, 32], strides = [1, 1]} : vector<2x128xf32> to vector<2x32xf32>
      %cst_17 = arith.constant 5.000000e-01 : f32
      %35 = vector.broadcast %cst_17 : f32 to vector<2x32xf32>
      %36 = arith.mulf %35, %34 : vector<2x32xf32>
      %37 = math.tanh %36 : vector<2x32xf32>
      %cst_18 = arith.constant 1.000000e+00 : f32
      %38 = vector.broadcast %cst_18 : f32 to vector<2x32xf32>
      %39 = arith.addf %37, %38 : vector<2x32xf32>
      %cst_19 = arith.constant 5.000000e-01 : f32
      %40 = vector.broadcast %cst_19 : f32 to vector<2x32xf32>
      %41 = arith.mulf %40, %39 : vector<2x32xf32>
      %c0_20 = arith.constant 0 : index
      %c0_21 = arith.constant 0 : index
      %42 = vector.load %arg7[%c0_20, %c0_21] : memref<2x32xf32, #tpu.memory_space<vmem>>, vector<2x32xf32>
      %43 = arith.mulf %31, %42 : vector<2x32xf32>
      %44 = arith.mulf %23, %33 : vector<2x32xf32>
      %45 = arith.addf %43, %44 : vector<2x32xf32>
      %46 = math.tanh %45 : vector<2x32xf32>
      %47 = arith.mulf %41, %46 : vector<2x32xf32>
      %48 = arith.truncf %47 : vector<2x32xf32> to vector<2x32xbf16>
      %c0_22 = arith.constant 0 : index
      %c0_23 = arith.constant 0 : index
      %49 = vector.load %arg7[%c0_22, %c0_23] : memref<2x32xf32, #tpu.memory_space<vmem>>, vector<2x32xf32>
      tpu.vector_store %arg7[%c0_22, %c0_23], %45 {strides = array<i32>} : memref<2x32xf32, #tpu.memory_space<vmem>>, vector<2x32xf32>,
      %c0_24 = arith.constant 0 : index
      %c0_25 = arith.constant 0 : index
      %50 = vector.load %arg6[%c0_24, %c0_25] : memref<2x32xbf16, #tpu.memory_space<vmem>>, vector<2x32xbf16>
      tpu.vector_store %arg6[%c0_24, %c0_25], %48 {strides = array<i32>} : memref<2x32xbf16, #tpu.memory_space<vmem>>, vector<2x32xbf16>,
      %c0_26 = arith.constant 0 : index
      %c7_27 = arith.constant 7 : index
      %c0_28 = arith.constant 0 : index
      %c0_29 = arith.constant 0 : index
      %51 = vector.load %arg5[%c0_26, %c7_27, %c0_28, %c0_29] : memref<1x8x2x32xbf16, #tpu.memory_space<vmem>>, vector<1x1x2x32xbf16>
      %52 = vector.shape_cast %51 : vector<1x1x2x32xbf16> to vector<2x32xbf16>
      %53 = vector.shape_cast %48 : vector<2x32xbf16> to vector<1x1x2x32xbf16>
      tpu.vector_store %arg5[%c0_26, %c7_27, %c0_28, %c0_29], %53 {strides = array<i32>} : memref<1x8x2x32xbf16, #tpu.memory_space<vmem>>, vector<1x1x2x32xbf16>,
      %c0_30 = arith.constant 0 : index
      %c6 = arith.constant 6 : index
      %c0_31 = arith.constant 0 : index
      %c0_32 = arith.constant 0 : index
      %54 = vector.load %arg3[%c0_30, %c6, %c0_31, %c0_32] : memref<1x8x2x128xf32, #tpu.memory_space<vmem>>, vector<1x1x2x128xf32>
      %55 = vector.shape_cast %54 : vector<1x1x2x128xf32> to vector<2x128xf32>
      %c0_33 = arith.constant 0 : index
      %c0_34 = arith.constant 0 : index
      %56 = vector.load %arg6[%c0_33, %c0_34] : memref<2x32xbf16, #tpu.memory_space<vmem>>, vector<2x32xbf16>
      %cst_35 = arith.constant dense<0.000000e+00> : vector<2x128xf32>
      %57 = tpu.matmul %56, %4, %cst_35 {dimension_numbers = #tpu.dot_dimension_numbers<[1], [0], [0], [1], [0, 0, 1, 1], [], []>} : vector<2x32xbf16>, vector<32x128xbf16>, vector<2x128xf32> -> vector<2x128xf32>
      %58 = arith.addf %55, %57 : vector<2x128xf32>
      %59 = vector.extract_strided_slice %58 {offsets = [0, 0], sizes = [2, 32], strides = [1, 1]} : vector<2x128xf32> to vector<2x32xf32>
      %cst_36 = arith.constant 5.000000e-01 : f32
      %60 = vector.broadcast %cst_36 : f32 to vector<2x32xf32>
      %61 = arith.mulf %60, %59 : vector<2x32xf32>
      %62 = math.tanh %61 : vector<2x32xf32>
      %cst_37 = arith.constant 1.000000e+00 : f32
      %63 = vector.broadcast %cst_37 : f32 to vector<2x32xf32>
      %64 = arith.addf %62, %63 : vector<2x32xf32>
      %cst_38 = arith.constant 5.000000e-01 : f32
      %65 = vector.broadcast %cst_38 : f32 to vector<2x32xf32>
      %66 = arith.mulf %65, %64 : vector<2x32xf32>
      %67 = vector.extract_strided_slice %58 {offsets = [0, 32], sizes = [2, 32], strides = [1, 1]} : vector<2x128xf32> to vector<2x32xf32>
      %cst_39 = arith.constant 5.000000e-01 : f32
      %68 = vector.broadcast %cst_39 : f32 to vector<2x32xf32>
      %69 = arith.mulf %68, %67 : vector<2x32xf32>
      %70 = math.tanh %69 : vector<2x32xf32>
      %cst_40 = arith.constant 1.000000e+00 : f32
      %71 = vector.broadcast %cst_40 : f32 to vector<2x32xf32>
      %72 = arith.addf %70, %71 : vector<2x32xf32>
      %cst_41 = arith.constant 5.000000e-01 : f32
      %73 = vector.broadcast %cst_41 : f32 to vector<2x32xf32>
      %74 = arith.mulf %73, %72 : vector<2x32xf32>
      %75 = vector.extract_strided_slice %58 {offsets = [0, 64], sizes = [2, 32], strides = [1, 1]} : vector<2x128xf32> to vector<2x32xf32>
      %76 = math.tanh %75 : vector<2x32xf32>
      %77 = vector.extract_strided_slice %58 {offsets = [0, 96], sizes = [2, 32], strides = [1, 1]} : vector<2x128xf32> to vector<2x32xf32>
      %cst_42 = arith.constant 5.000000e-01 : f32
      %78 = vector.broadcast %cst_42 : f32 to vector<2x32xf32>
      %79 = arith.mulf %78, %77 : vector<2x32xf32>
      %80 = math.tanh %79 : vector<2x32xf32>
      %cst_43 = arith.constant 1.000000e+00 : f32
      %81 = vector.broadcast %cst_43 : f32 to vector<2x32xf32>
      %82 = arith.addf %80, %81 : vector<2x32xf32>
      %cst_44 = arith.constant 5.000000e-01 : f32
      %83 = vector.broadcast %cst_44 : f32 to vector<2x32xf32>
      %84 = arith.mulf %83, %82 : vector<2x32xf32>
      %c0_45 = arith.constant 0 : index
      %c0_46 = arith.constant 0 : index
      %85 = vector.load %arg7[%c0_45, %c0_46] : memref<2x32xf32, #tpu.memory_space<vmem>>, vector<2x32xf32>
      %86 = arith.mulf %74, %85 : vector<2x32xf32>
      %87 = arith.mulf %66, %76 : vector<2x32xf32>
      %88 = arith.addf %86, %87 : vector<2x32xf32>
      %89 = math.tanh %88 : vector<2x32xf32>
      %90 = arith.mulf %84, %89 : vector<2x32xf32>
      %91 = arith.truncf %90 : vector<2x32xf32> to vector<2x32xbf16>
      %c0_47 = arith.constant 0 : index
      %c0_48 = arith.constant 0 : index
      %92 = vector.load %arg7[%c0_47, %c0_48] : memref<2x32xf32, #tpu.memory_space<vmem>>, vector<2x32xf32>
      tpu.vector_store %arg7[%c0_47, %c0_48], %88 {strides = array<i32>} : memref<2x32xf32, #tpu.memory_space<vmem>>, vector<2x32xf32>,
      %c0_49 = arith.constant 0 : index
      %c0_50 = arith.constant 0 : index
      %93 = vector.load %arg6[%c0_49, %c0_50] : memref<2x32xbf16, #tpu.memory_space<vmem>>, vector<2x32xbf16>
      tpu.vector_store %arg6[%c0_49, %c0_50], %91 {strides = array<i32>} : memref<2x32xbf16, #tpu.memory_space<vmem>>, vector<2x32xbf16>,
      %c0_51 = arith.constant 0 : index
      %c6_52 = arith.constant 6 : index
      %c0_53 = arith.constant 0 : index
      %c0_54 = arith.constant 0 : index
      %94 = vector.load %arg5[%c0_51, %c6_52, %c0_53, %c0_54] : memref<1x8x2x32xbf16, #tpu.memory_space<vmem>>, vector<1x1x2x32xbf16>
      %95 = vector.shape_cast %94 : vector<1x1x2x32xbf16> to vector<2x32xbf16>
      %96 = vector.shape_cast %91 : vector<2x32xbf16> to vector<1x1x2x32xbf16>
      tpu.vector_store %arg5[%c0_51, %c6_52, %c0_53, %c0_54], %96 {strides = array<i32>} : memref<1x8x2x32xbf16, #tpu.memory_space<vmem>>, vector<1x1x2x32xbf16>,
      %c0_55 = arith.constant 0 : index
      %c5 = arith.constant 5 : index
      %c0_56 = arith.constant 0 : index
      %c0_57 = arith.constant 0 : index
      %97 = vector.load %arg3[%c0_55, %c5, %c0_56, %c0_57] : memref<1x8x2x128xf32, #tpu.memory_space<vmem>>, vector<1x1x2x128xf32>
      %98 = vector.shape_cast %97 : vector<1x1x2x128xf32> to vector<2x128xf32>
      %c0_58 = arith.constant 0 : index
      %c0_59 = arith.constant 0 : index
      %99 = vector.load %arg6[%c0_58, %c0_59] : memref<2x32xbf16, #tpu.memory_space<vmem>>, vector<2x32xbf16>
      %cst_60 = arith.constant dense<0.000000e+00> : vector<2x128xf32>
      %100 = tpu.matmul %99, %4, %cst_60 {dimension_numbers = #tpu.dot_dimension_numbers<[1], [0], [0], [1], [0, 0, 1, 1], [], []>} : vector<2x32xbf16>, vector<32x128xbf16>, vector<2x128xf32> -> vector<2x128xf32>
      %101 = arith.addf %98, %100 : vector<2x128xf32>
      %102 = vector.extract_strided_slice %101 {offsets = [0, 0], sizes = [2, 32], strides = [1, 1]} : vector<2x128xf32> to vector<2x32xf32>
      %cst_61 = arith.constant 5.000000e-01 : f32
      %103 = vector.broadcast %cst_61 : f32 to vector<2x32xf32>
      %104 = arith.mulf %103, %102 : vector<2x32xf32>
      %105 = math.tanh %104 : vector<2x32xf32>
      %cst_62 = arith.constant 1.000000e+00 : f32
      %106 = vector.broadcast %cst_62 : f32 to vector<2x32xf32>
      %107 = arith.addf %105, %106 : vector<2x32xf32>
      %cst_63 = arith.constant 5.000000e-01 : f32
      %108 = vector.broadcast %cst_63 : f32 to vector<2x32xf32>
      %109 = arith.mulf %108, %107 : vector<2x32xf32>
      %110 = vector.extract_strided_slice %101 {offsets = [0, 32], sizes = [2, 32], strides = [1, 1]} : vector<2x128xf32> to vector<2x32xf32>
      %cst_64 = arith.constant 5.000000e-01 : f32
      %111 = vector.broadcast %cst_64 : f32 to vector<2x32xf32>
      %112 = arith.mulf %111, %110 : vector<2x32xf32>
      %113 = math.tanh %112 : vector<2x32xf32>
      %cst_65 = arith.constant 1.000000e+00 : f32
      %114 = vector.broadcast %cst_65 : f32 to vector<2x32xf32>
      %115 = arith.addf %113, %114 : vector<2x32xf32>
      %cst_66 = arith.constant 5.000000e-01 : f32
      %116 = vector.broadcast %cst_66 : f32 to vector<2x32xf32>
      %117 = arith.mulf %116, %115 : vector<2x32xf32>
      %118 = vector.extract_strided_slice %101 {offsets = [0, 64], sizes = [2, 32], strides = [1, 1]} : vector<2x128xf32> to vector<2x32xf32>
      %119 = math.tanh %118 : vector<2x32xf32>
      %120 = vector.extract_strided_slice %101 {offsets = [0, 96], sizes = [2, 32], strides = [1, 1]} : vector<2x128xf32> to vector<2x32xf32>
      %cst_67 = arith.constant 5.000000e-01 : f32
      %121 = vector.broadcast %cst_67 : f32 to vector<2x32xf32>
      %122 = arith.mulf %121, %120 : vector<2x32xf32>
      %123 = math.tanh %122 : vector<2x32xf32>
      %cst_68 = arith.constant 1.000000e+00 : f32
      %124 = vector.broadcast %cst_68 : f32 to vector<2x32xf32>
      %125 = arith.addf %123, %124 : vector<2x32xf32>
      %cst_69 = arith.constant 5.000000e-01 : f32
      %126 = vector.broadcast %cst_69 : f32 to vector<2x32xf32>
      %127 = arith.mulf %126, %125 : vector<2x32xf32>
      %c0_70 = arith.constant 0 : index
      %c0_71 = arith.constant 0 : index
      %128 = vector.load %arg7[%c0_70, %c0_71] : memref<2x32xf32, #tpu.memory_space<vmem>>, vector<2x32xf32>
      %129 = arith.mulf %117, %128 : vector<2x32xf32>
      %130 = arith.mulf %109, %119 : vector<2x32xf32>
      %131 = arith.addf %129, %130 : vector<2x32xf32>
      %132 = math.tanh %131 : vector<2x32xf32>
      %133 = arith.mulf %127, %132 : vector<2x32xf32>
      %134 = arith.truncf %133 : vector<2x32xf32> to vector<2x32xbf16>
      %c0_72 = arith.constant 0 : index
      %c0_73 = arith.constant 0 : index
      %135 = vector.load %arg7[%c0_72, %c0_73] : memref<2x32xf32, #tpu.memory_space<vmem>>, vector<2x32xf32>
      tpu.vector_store %arg7[%c0_72, %c0_73], %131 {strides = array<i32>} : memref<2x32xf32, #tpu.memory_space<vmem>>, vector<2x32xf32>,
      %c0_74 = arith.constant 0 : index
      %c0_75 = arith.constant 0 : index
      %136 = vector.load %arg6[%c0_74, %c0_75] : memref<2x32xbf16, #tpu.memory_space<vmem>>, vector<2x32xbf16>
      tpu.vector_store %arg6[%c0_74, %c0_75], %134 {strides = array<i32>} : memref<2x32xbf16, #tpu.memory_space<vmem>>, vector<2x32xbf16>,
      %c0_76 = arith.constant 0 : index
      %c5_77 = arith.constant 5 : index
      %c0_78 = arith.constant 0 : index
      %c0_79 = arith.constant 0 : index
      %137 = vector.load %arg5[%c0_76, %c5_77, %c0_78, %c0_79] : memref<1x8x2x32xbf16, #tpu.memory_space<vmem>>, vector<1x1x2x32xbf16>
      %138 = vector.shape_cast %137 : vector<1x1x2x32xbf16> to vector<2x32xbf16>
      %139 = vector.shape_cast %134 : vector<2x32xbf16> to vector<1x1x2x32xbf16>
      tpu.vector_store %arg5[%c0_76, %c5_77, %c0_78, %c0_79], %139 {strides = array<i32>} : memref<1x8x2x32xbf16, #tpu.memory_space<vmem>>, vector<1x1x2x32xbf16>,
      %c0_80 = arith.constant 0 : index
      %c4 = arith.constant 4 : index
      %c0_81 = arith.constant 0 : index
      %c0_82 = arith.constant 0 : index
      %140 = vector.load %arg3[%c0_80, %c4, %c0_81, %c0_82] : memref<1x8x2x128xf32, #tpu.memory_space<vmem>>, vector<1x1x2x128xf32>
      %141 = vector.shape_cast %140 : vector<1x1x2x128xf32> to vector<2x128xf32>
      %c0_83 = arith.constant 0 : index
      %c0_84 = arith.constant 0 : index
      %142 = vector.load %arg6[%c0_83, %c0_84] : memref<2x32xbf16, #tpu.memory_space<vmem>>, vector<2x32xbf16>
      %cst_85 = arith.constant dense<0.000000e+00> : vector<2x128xf32>
      %143 = tpu.matmul %142, %4, %cst_85 {dimension_numbers = #tpu.dot_dimension_numbers<[1], [0], [0], [1], [0, 0, 1, 1], [], []>} : vector<2x32xbf16>, vector<32x128xbf16>, vector<2x128xf32> -> vector<2x128xf32>
      %144 = arith.addf %141, %143 : vector<2x128xf32>
      %145 = vector.extract_strided_slice %144 {offsets = [0, 0], sizes = [2, 32], strides = [1, 1]} : vector<2x128xf32> to vector<2x32xf32>
      %cst_86 = arith.constant 5.000000e-01 : f32
      %146 = vector.broadcast %cst_86 : f32 to vector<2x32xf32>
      %147 = arith.mulf %146, %145 : vector<2x32xf32>
      %148 = math.tanh %147 : vector<2x32xf32>
      %cst_87 = arith.constant 1.000000e+00 : f32
      %149 = vector.broadcast %cst_87 : f32 to vector<2x32xf32>
      %150 = arith.addf %148, %149 : vector<2x32xf32>
      %cst_88 = arith.constant 5.000000e-01 : f32
      %151 = vector.broadcast %cst_88 : f32 to vector<2x32xf32>
      %152 = arith.mulf %151, %150 : vector<2x32xf32>
      %153 = vector.extract_strided_slice %144 {offsets = [0, 32], sizes = [2, 32], strides = [1, 1]} : vector<2x128xf32> to vector<2x32xf32>
      %cst_89 = arith.constant 5.000000e-01 : f32
      %154 = vector.broadcast %cst_89 : f32 to vector<2x32xf32>
      %155 = arith.mulf %154, %153 : vector<2x32xf32>
      %156 = math.tanh %155 : vector<2x32xf32>
      %cst_90 = arith.constant 1.000000e+00 : f32
      %157 = vector.broadcast %cst_90 : f32 to vector<2x32xf32>
      %158 = arith.addf %156, %157 : vector<2x32xf32>
      %cst_91 = arith.constant 5.000000e-01 : f32
      %159 = vector.broadcast %cst_91 : f32 to vector<2x32xf32>
      %160 = arith.mulf %159, %158 : vector<2x32xf32>
      %161 = vector.extract_strided_slice %144 {offsets = [0, 64], sizes = [2, 32], strides = [1, 1]} : vector<2x128xf32> to vector<2x32xf32>
      %162 = math.tanh %161 : vector<2x32xf32>
      %163 = vector.extract_strided_slice %144 {offsets = [0, 96], sizes = [2, 32], strides = [1, 1]} : vector<2x128xf32> to vector<2x32xf32>
      %cst_92 = arith.constant 5.000000e-01 : f32
      %164 = vector.broadcast %cst_92 : f32 to vector<2x32xf32>
      %165 = arith.mulf %164, %163 : vector<2x32xf32>
      %166 = math.tanh %165 : vector<2x32xf32>
      %cst_93 = arith.constant 1.000000e+00 : f32
      %167 = vector.broadcast %cst_93 : f32 to vector<2x32xf32>
      %168 = arith.addf %166, %167 : vector<2x32xf32>
      %cst_94 = arith.constant 5.000000e-01 : f32
      %169 = vector.broadcast %cst_94 : f32 to vector<2x32xf32>
      %170 = arith.mulf %169, %168 : vector<2x32xf32>
      %c0_95 = arith.constant 0 : index
      %c0_96 = arith.constant 0 : index
      %171 = vector.load %arg7[%c0_95, %c0_96] : memref<2x32xf32, #tpu.memory_space<vmem>>, vector<2x32xf32>
      %172 = arith.mulf %160, %171 : vector<2x32xf32>
      %173 = arith.mulf %152, %162 : vector<2x32xf32>
      %174 = arith.addf %172, %173 : vector<2x32xf32>
      %175 = math.tanh %174 : vector<2x32xf32>
      %176 = arith.mulf %170, %175 : vector<2x32xf32>
      %177 = arith.truncf %176 : vector<2x32xf32> to vector<2x32xbf16>
      %c0_97 = arith.constant 0 : index
      %c0_98 = arith.constant 0 : index
      %178 = vector.load %arg7[%c0_97, %c0_98] : memref<2x32xf32, #tpu.memory_space<vmem>>, vector<2x32xf32>
      tpu.vector_store %arg7[%c0_97, %c0_98], %174 {strides = array<i32>} : memref<2x32xf32, #tpu.memory_space<vmem>>, vector<2x32xf32>,
      %c0_99 = arith.constant 0 : index
      %c0_100 = arith.constant 0 : index
      %179 = vector.load %arg6[%c0_99, %c0_100] : memref<2x32xbf16, #tpu.memory_space<vmem>>, vector<2x32xbf16>
      tpu.vector_store %arg6[%c0_99, %c0_100], %177 {strides = array<i32>} : memref<2x32xbf16, #tpu.memory_space<vmem>>, vector<2x32xbf16>,
      %c0_101 = arith.constant 0 : index
      %c4_102 = arith.constant 4 : index
      %c0_103 = arith.constant 0 : index
      %c0_104 = arith.constant 0 : index
      %180 = vector.load %arg5[%c0_101, %c4_102, %c0_103, %c0_104] : memref<1x8x2x32xbf16, #tpu.memory_space<vmem>>, vector<1x1x2x32xbf16>
      %181 = vector.shape_cast %180 : vector<1x1x2x32xbf16> to vector<2x32xbf16>
      %182 = vector.shape_cast %177 : vector<2x32xbf16> to vector<1x1x2x32xbf16>
      tpu.vector_store %arg5[%c0_101, %c4_102, %c0_103, %c0_104], %182 {strides = array<i32>} : memref<1x8x2x32xbf16, #tpu.memory_space<vmem>>, vector<1x1x2x32xbf16>,
      %c0_105 = arith.constant 0 : index
      %c3 = arith.constant 3 : index
      %c0_106 = arith.constant 0 : index
      %c0_107 = arith.constant 0 : index
      %183 = vector.load %arg3[%c0_105, %c3, %c0_106, %c0_107] : memref<1x8x2x128xf32, #tpu.memory_space<vmem>>, vector<1x1x2x128xf32>
      %184 = vector.shape_cast %183 : vector<1x1x2x128xf32> to vector<2x128xf32>
      %c0_108 = arith.constant 0 : index
      %c0_109 = arith.constant 0 : index
      %185 = vector.load %arg6[%c0_108, %c0_109] : memref<2x32xbf16, #tpu.memory_space<vmem>>, vector<2x32xbf16>
      %cst_110 = arith.constant dense<0.000000e+00> : vector<2x128xf32>
      %186 = tpu.matmul %185, %4, %cst_110 {dimension_numbers = #tpu.dot_dimension_numbers<[1], [0], [0], [1], [0, 0, 1, 1], [], []>} : vector<2x32xbf16>, vector<32x128xbf16>, vector<2x128xf32> -> vector<2x128xf32>
      %187 = arith.addf %184, %186 : vector<2x128xf32>
      %188 = vector.extract_strided_slice %187 {offsets = [0, 0], sizes = [2, 32], strides = [1, 1]} : vector<2x128xf32> to vector<2x32xf32>
      %cst_111 = arith.constant 5.000000e-01 : f32
      %189 = vector.broadcast %cst_111 : f32 to vector<2x32xf32>
      %190 = arith.mulf %189, %188 : vector<2x32xf32>
      %191 = math.tanh %190 : vector<2x32xf32>
      %cst_112 = arith.constant 1.000000e+00 : f32
      %192 = vector.broadcast %cst_112 : f32 to vector<2x32xf32>
      %193 = arith.addf %191, %192 : vector<2x32xf32>
      %cst_113 = arith.constant 5.000000e-01 : f32
      %194 = vector.broadcast %cst_113 : f32 to vector<2x32xf32>
      %195 = arith.mulf %194, %193 : vector<2x32xf32>
      %196 = vector.extract_strided_slice %187 {offsets = [0, 32], sizes = [2, 32], strides = [1, 1]} : vector<2x128xf32> to vector<2x32xf32>
      %cst_114 = arith.constant 5.000000e-01 : f32
      %197 = vector.broadcast %cst_114 : f32 to vector<2x32xf32>
      %198 = arith.mulf %197, %196 : vector<2x32xf32>
      %199 = math.tanh %198 : vector<2x32xf32>
      %cst_115 = arith.constant 1.000000e+00 : f32
      %200 = vector.broadcast %cst_115 : f32 to vector<2x32xf32>
      %201 = arith.addf %199, %200 : vector<2x32xf32>
      %cst_116 = arith.constant 5.000000e-01 : f32
      %202 = vector.broadcast %cst_116 : f32 to vector<2x32xf32>
      %203 = arith.mulf %202, %201 : vector<2x32xf32>
      %204 = vector.extract_strided_slice %187 {offsets = [0, 64], sizes = [2, 32], strides = [1, 1]} : vector<2x128xf32> to vector<2x32xf32>
      %205 = math.tanh %204 : vector<2x32xf32>
      %206 = vector.extract_strided_slice %187 {offsets = [0, 96], sizes = [2, 32], strides = [1, 1]} : vector<2x128xf32> to vector<2x32xf32>
      %cst_117 = arith.constant 5.000000e-01 : f32
      %207 = vector.broadcast %cst_117 : f32 to vector<2x32xf32>
      %208 = arith.mulf %207, %206 : vector<2x32xf32>
      %209 = math.tanh %208 : vector<2x32xf32>
      %cst_118 = arith.constant 1.000000e+00 : f32
      %210 = vector.broadcast %cst_118 : f32 to vector<2x32xf32>
      %211 = arith.addf %209, %210 : vector<2x32xf32>
      %cst_119 = arith.constant 5.000000e-01 : f32
      %212 = vector.broadcast %cst_119 : f32 to vector<2x32xf32>
      %213 = arith.mulf %212, %211 : vector<2x32xf32>
      %c0_120 = arith.constant 0 : index
      %c0_121 = arith.constant 0 : index
      %214 = vector.load %arg7[%c0_120, %c0_121] : memref<2x32xf32, #tpu.memory_space<vmem>>, vector<2x32xf32>
      %215 = arith.mulf %203, %214 : vector<2x32xf32>
      %216 = arith.mulf %195, %205 : vector<2x32xf32>
      %217 = arith.addf %215, %216 : vector<2x32xf32>
      %218 = math.tanh %217 : vector<2x32xf32>
      %219 = arith.mulf %213, %218 : vector<2x32xf32>
      %220 = arith.truncf %219 : vector<2x32xf32> to vector<2x32xbf16>
      %c0_122 = arith.constant 0 : index
      %c0_123 = arith.constant 0 : index
      %221 = vector.load %arg7[%c0_122, %c0_123] : memref<2x32xf32, #tpu.memory_space<vmem>>, vector<2x32xf32>
      tpu.vector_store %arg7[%c0_122, %c0_123], %217 {strides = array<i32>} : memref<2x32xf32, #tpu.memory_space<vmem>>, vector<2x32xf32>,
      %c0_124 = arith.constant 0 : index
      %c0_125 = arith.constant 0 : index
      %222 = vector.load %arg6[%c0_124, %c0_125] : memref<2x32xbf16, #tpu.memory_space<vmem>>, vector<2x32xbf16>
      tpu.vector_store %arg6[%c0_124, %c0_125], %220 {strides = array<i32>} : memref<2x32xbf16, #tpu.memory_space<vmem>>, vector<2x32xbf16>,
      %c0_126 = arith.constant 0 : index
      %c3_127 = arith.constant 3 : index
      %c0_128 = arith.constant 0 : index
      %c0_129 = arith.constant 0 : index
      %223 = vector.load %arg5[%c0_126, %c3_127, %c0_128, %c0_129] : memref<1x8x2x32xbf16, #tpu.memory_space<vmem>>, vector<1x1x2x32xbf16>
      %224 = vector.shape_cast %223 : vector<1x1x2x32xbf16> to vector<2x32xbf16>
      %225 = vector.shape_cast %220 : vector<2x32xbf16> to vector<1x1x2x32xbf16>
      tpu.vector_store %arg5[%c0_126, %c3_127, %c0_128, %c0_129], %225 {strides = array<i32>} : memref<1x8x2x32xbf16, #tpu.memory_space<vmem>>, vector<1x1x2x32xbf16>,
      %c0_130 = arith.constant 0 : index
      %c2 = arith.constant 2 : index
      %c0_131 = arith.constant 0 : index
      %c0_132 = arith.constant 0 : index
      %226 = vector.load %arg3[%c0_130, %c2, %c0_131, %c0_132] : memref<1x8x2x128xf32, #tpu.memory_space<vmem>>, vector<1x1x2x128xf32>
      %227 = vector.shape_cast %226 : vector<1x1x2x128xf32> to vector<2x128xf32>
      %c0_133 = arith.constant 0 : index
      %c0_134 = arith.constant 0 : index
      %228 = vector.load %arg6[%c0_133, %c0_134] : memref<2x32xbf16, #tpu.memory_space<vmem>>, vector<2x32xbf16>
      %cst_135 = arith.constant dense<0.000000e+00> : vector<2x128xf32>
      %229 = tpu.matmul %228, %4, %cst_135 {dimension_numbers = #tpu.dot_dimension_numbers<[1], [0], [0], [1], [0, 0, 1, 1], [], []>} : vector<2x32xbf16>, vector<32x128xbf16>, vector<2x128xf32> -> vector<2x128xf32>
      %230 = arith.addf %227, %229 : vector<2x128xf32>
      %231 = vector.extract_strided_slice %230 {offsets = [0, 0], sizes = [2, 32], strides = [1, 1]} : vector<2x128xf32> to vector<2x32xf32>
      %cst_136 = arith.constant 5.000000e-01 : f32
      %232 = vector.broadcast %cst_136 : f32 to vector<2x32xf32>
      %233 = arith.mulf %232, %231 : vector<2x32xf32>
      %234 = math.tanh %233 : vector<2x32xf32>
      %cst_137 = arith.constant 1.000000e+00 : f32
      %235 = vector.broadcast %cst_137 : f32 to vector<2x32xf32>
      %236 = arith.addf %234, %235 : vector<2x32xf32>
      %cst_138 = arith.constant 5.000000e-01 : f32
      %237 = vector.broadcast %cst_138 : f32 to vector<2x32xf32>
      %238 = arith.mulf %237, %236 : vector<2x32xf32>
      %239 = vector.extract_strided_slice %230 {offsets = [0, 32], sizes = [2, 32], strides = [1, 1]} : vector<2x128xf32> to vector<2x32xf32>
      %cst_139 = arith.constant 5.000000e-01 : f32
      %240 = vector.broadcast %cst_139 : f32 to vector<2x32xf32>
      %241 = arith.mulf %240, %239 : vector<2x32xf32>
      %242 = math.tanh %241 : vector<2x32xf32>
      %cst_140 = arith.constant 1.000000e+00 : f32
      %243 = vector.broadcast %cst_140 : f32 to vector<2x32xf32>
      %244 = arith.addf %242, %243 : vector<2x32xf32>
      %cst_141 = arith.constant 5.000000e-01 : f32
      %245 = vector.broadcast %cst_141 : f32 to vector<2x32xf32>
      %246 = arith.mulf %245, %244 : vector<2x32xf32>
      %247 = vector.extract_strided_slice %230 {offsets = [0, 64], sizes = [2, 32], strides = [1, 1]} : vector<2x128xf32> to vector<2x32xf32>
      %248 = math.tanh %247 : vector<2x32xf32>
      %249 = vector.extract_strided_slice %230 {offsets = [0, 96], sizes = [2, 32], strides = [1, 1]} : vector<2x128xf32> to vector<2x32xf32>
      %cst_142 = arith.constant 5.000000e-01 : f32
      %250 = vector.broadcast %cst_142 : f32 to vector<2x32xf32>
      %251 = arith.mulf %250, %249 : vector<2x32xf32>
      %252 = math.tanh %251 : vector<2x32xf32>
      %cst_143 = arith.constant 1.000000e+00 : f32
      %253 = vector.broadcast %cst_143 : f32 to vector<2x32xf32>
      %254 = arith.addf %252, %253 : vector<2x32xf32>
      %cst_144 = arith.constant 5.000000e-01 : f32
      %255 = vector.broadcast %cst_144 : f32 to vector<2x32xf32>
      %256 = arith.mulf %255, %254 : vector<2x32xf32>
      %c0_145 = arith.constant 0 : index
      %c0_146 = arith.constant 0 : index
      %257 = vector.load %arg7[%c0_145, %c0_146] : memref<2x32xf32, #tpu.memory_space<vmem>>, vector<2x32xf32>
      %258 = arith.mulf %246, %257 : vector<2x32xf32>
      %259 = arith.mulf %238, %248 : vector<2x32xf32>
      %260 = arith.addf %258, %259 : vector<2x32xf32>
      %261 = math.tanh %260 : vector<2x32xf32>
      %262 = arith.mulf %256, %261 : vector<2x32xf32>
      %263 = arith.truncf %262 : vector<2x32xf32> to vector<2x32xbf16>
      %c0_147 = arith.constant 0 : index
      %c0_148 = arith.constant 0 : index
      %264 = vector.load %arg7[%c0_147, %c0_148] : memref<2x32xf32, #tpu.memory_space<vmem>>, vector<2x32xf32>
      tpu.vector_store %arg7[%c0_147, %c0_148], %260 {strides = array<i32>} : memref<2x32xf32, #tpu.memory_space<vmem>>, vector<2x32xf32>,
      %c0_149 = arith.constant 0 : index
      %c0_150 = arith.constant 0 : index
      %265 = vector.load %arg6[%c0_149, %c0_150] : memref<2x32xbf16, #tpu.memory_space<vmem>>, vector<2x32xbf16>
      tpu.vector_store %arg6[%c0_149, %c0_150], %263 {strides = array<i32>} : memref<2x32xbf16, #tpu.memory_space<vmem>>, vector<2x32xbf16>,
      %c0_151 = arith.constant 0 : index
      %c2_152 = arith.constant 2 : index
      %c0_153 = arith.constant 0 : index
      %c0_154 = arith.constant 0 : index
      %266 = vector.load %arg5[%c0_151, %c2_152, %c0_153, %c0_154] : memref<1x8x2x32xbf16, #tpu.memory_space<vmem>>, vector<1x1x2x32xbf16>
      %267 = vector.shape_cast %266 : vector<1x1x2x32xbf16> to vector<2x32xbf16>
      %268 = vector.shape_cast %263 : vector<2x32xbf16> to vector<1x1x2x32xbf16>
      tpu.vector_store %arg5[%c0_151, %c2_152, %c0_153, %c0_154], %268 {strides = array<i32>} : memref<1x8x2x32xbf16, #tpu.memory_space<vmem>>, vector<1x1x2x32xbf16>,
      %c0_155 = arith.constant 0 : index
      %c1 = arith.constant 1 : index
      %c0_156 = arith.constant 0 : index
      %c0_157 = arith.constant 0 : index
      %269 = vector.load %arg3[%c0_155, %c1, %c0_156, %c0_157] : memref<1x8x2x128xf32, #tpu.memory_space<vmem>>, vector<1x1x2x128xf32>
      %270 = vector.shape_cast %269 : vector<1x1x2x128xf32> to vector<2x128xf32>
      %c0_158 = arith.constant 0 : index
      %c0_159 = arith.constant 0 : index
      %271 = vector.load %arg6[%c0_158, %c0_159] : memref<2x32xbf16, #tpu.memory_space<vmem>>, vector<2x32xbf16>
      %cst_160 = arith.constant dense<0.000000e+00> : vector<2x128xf32>
      %272 = tpu.matmul %271, %4, %cst_160 {dimension_numbers = #tpu.dot_dimension_numbers<[1], [0], [0], [1], [0, 0, 1, 1], [], []>} : vector<2x32xbf16>, vector<32x128xbf16>, vector<2x128xf32> -> vector<2x128xf32>
      %273 = arith.addf %270, %272 : vector<2x128xf32>
      %274 = vector.extract_strided_slice %273 {offsets = [0, 0], sizes = [2, 32], strides = [1, 1]} : vector<2x128xf32> to vector<2x32xf32>
      %cst_161 = arith.constant 5.000000e-01 : f32
      %275 = vector.broadcast %cst_161 : f32 to vector<2x32xf32>
      %276 = arith.mulf %275, %274 : vector<2x32xf32>
      %277 = math.tanh %276 : vector<2x32xf32>
      %cst_162 = arith.constant 1.000000e+00 : f32
      %278 = vector.broadcast %cst_162 : f32 to vector<2x32xf32>
      %279 = arith.addf %277, %278 : vector<2x32xf32>
      %cst_163 = arith.constant 5.000000e-01 : f32
      %280 = vector.broadcast %cst_163 : f32 to vector<2x32xf32>
      %281 = arith.mulf %280, %279 : vector<2x32xf32>
      %282 = vector.extract_strided_slice %273 {offsets = [0, 32], sizes = [2, 32], strides = [1, 1]} : vector<2x128xf32> to vector<2x32xf32>
      %cst_164 = arith.constant 5.000000e-01 : f32
      %283 = vector.broadcast %cst_164 : f32 to vector<2x32xf32>
      %284 = arith.mulf %283, %282 : vector<2x32xf32>
      %285 = math.tanh %284 : vector<2x32xf32>
      %cst_165 = arith.constant 1.000000e+00 : f32
      %286 = vector.broadcast %cst_165 : f32 to vector<2x32xf32>
      %287 = arith.addf %285, %286 : vector<2x32xf32>
      %cst_166 = arith.constant 5.000000e-01 : f32
      %288 = vector.broadcast %cst_166 : f32 to vector<2x32xf32>
      %289 = arith.mulf %288, %287 : vector<2x32xf32>
      %290 = vector.extract_strided_slice %273 {offsets = [0, 64], sizes = [2, 32], strides = [1, 1]} : vector<2x128xf32> to vector<2x32xf32>
      %291 = math.tanh %290 : vector<2x32xf32>
      %292 = vector.extract_strided_slice %273 {offsets = [0, 96], sizes = [2, 32], strides = [1, 1]} : vector<2x128xf32> to vector<2x32xf32>
      %cst_167 = arith.constant 5.000000e-01 : f32
      %293 = vector.broadcast %cst_167 : f32 to vector<2x32xf32>
      %294 = arith.mulf %293, %292 : vector<2x32xf32>
      %295 = math.tanh %294 : vector<2x32xf32>
      %cst_168 = arith.constant 1.000000e+00 : f32
      %296 = vector.broadcast %cst_168 : f32 to vector<2x32xf32>
      %297 = arith.addf %295, %296 : vector<2x32xf32>
      %cst_169 = arith.constant 5.000000e-01 : f32
      %298 = vector.broadcast %cst_169 : f32 to vector<2x32xf32>
      %299 = arith.mulf %298, %297 : vector<2x32xf32>
      %c0_170 = arith.constant 0 : index
      %c0_171 = arith.constant 0 : index
      %300 = vector.load %arg7[%c0_170, %c0_171] : memref<2x32xf32, #tpu.memory_space<vmem>>, vector<2x32xf32>
      %301 = arith.mulf %289, %300 : vector<2x32xf32>
      %302 = arith.mulf %281, %291 : vector<2x32xf32>
      %303 = arith.addf %301, %302 : vector<2x32xf32>
      %304 = math.tanh %303 : vector<2x32xf32>
      %305 = arith.mulf %299, %304 : vector<2x32xf32>
      %306 = arith.truncf %305 : vector<2x32xf32> to vector<2x32xbf16>
      %c0_172 = arith.constant 0 : index
      %c0_173 = arith.constant 0 : index
      %307 = vector.load %arg7[%c0_172, %c0_173] : memref<2x32xf32, #tpu.memory_space<vmem>>, vector<2x32xf32>
      tpu.vector_store %arg7[%c0_172, %c0_173], %303 {strides = array<i32>} : memref<2x32xf32, #tpu.memory_space<vmem>>, vector<2x32xf32>,
      %c0_174 = arith.constant 0 : index
      %c0_175 = arith.constant 0 : index
      %308 = vector.load %arg6[%c0_174, %c0_175] : memref<2x32xbf16, #tpu.memory_space<vmem>>, vector<2x32xbf16>
      tpu.vector_store %arg6[%c0_174, %c0_175], %306 {strides = array<i32>} : memref<2x32xbf16, #tpu.memory_space<vmem>>, vector<2x32xbf16>,
      %c0_176 = arith.constant 0 : index
      %c1_177 = arith.constant 1 : index
      %c0_178 = arith.constant 0 : index
      %c0_179 = arith.constant 0 : index
      %309 = vector.load %arg5[%c0_176, %c1_177, %c0_178, %c0_179] : memref<1x8x2x32xbf16, #tpu.memory_space<vmem>>, vector<1x1x2x32xbf16>
      %310 = vector.shape_cast %309 : vector<1x1x2x32xbf16> to vector<2x32xbf16>
      %311 = vector.shape_cast %306 : vector<2x32xbf16> to vector<1x1x2x32xbf16>
      tpu.vector_store %arg5[%c0_176, %c1_177, %c0_178, %c0_179], %311 {strides = array<i32>} : memref<1x8x2x32xbf16, #tpu.memory_space<vmem>>, vector<1x1x2x32xbf16>,
      %c0_180 = arith.constant 0 : index
      %c0_181 = arith.constant 0 : index
      %c0_182 = arith.constant 0 : index
      %c0_183 = arith.constant 0 : index
      %312 = vector.load %arg3[%c0_180, %c0_181, %c0_182, %c0_183] : memref<1x8x2x128xf32, #tpu.memory_space<vmem>>, vector<1x1x2x128xf32>
      %313 = vector.shape_cast %312 : vector<1x1x2x128xf32> to vector<2x128xf32>
      %c0_184 = arith.constant 0 : index
      %c0_185 = arith.constant 0 : index
      %314 = vector.load %arg6[%c0_184, %c0_185] : memref<2x32xbf16, #tpu.memory_space<vmem>>, vector<2x32xbf16>
      %cst_186 = arith.constant dense<0.000000e+00> : vector<2x128xf32>
      %315 = tpu.matmul %314, %4, %cst_186 {dimension_numbers = #tpu.dot_dimension_numbers<[1], [0], [0], [1], [0, 0, 1, 1], [], []>} : vector<2x32xbf16>, vector<32x128xbf16>, vector<2x128xf32> -> vector<2x128xf32>
      %316 = arith.addf %313, %315 : vector<2x128xf32>
      %317 = vector.extract_strided_slice %316 {offsets = [0, 0], sizes = [2, 32], strides = [1, 1]} : vector<2x128xf32> to vector<2x32xf32>
      %cst_187 = arith.constant 5.000000e-01 : f32
      %318 = vector.broadcast %cst_187 : f32 to vector<2x32xf32>
      %319 = arith.mulf %318, %317 : vector<2x32xf32>
      %320 = math.tanh %319 : vector<2x32xf32>
      %cst_188 = arith.constant 1.000000e+00 : f32
      %321 = vector.broadcast %cst_188 : f32 to vector<2x32xf32>
      %322 = arith.addf %320, %321 : vector<2x32xf32>
      %cst_189 = arith.constant 5.000000e-01 : f32
      %323 = vector.broadcast %cst_189 : f32 to vector<2x32xf32>
      %324 = arith.mulf %323, %322 : vector<2x32xf32>
      %325 = vector.extract_strided_slice %316 {offsets = [0, 32], sizes = [2, 32], strides = [1, 1]} : vector<2x128xf32> to vector<2x32xf32>
      %cst_190 = arith.constant 5.000000e-01 : f32
      %326 = vector.broadcast %cst_190 : f32 to vector<2x32xf32>
      %327 = arith.mulf %326, %325 : vector<2x32xf32>
      %328 = math.tanh %327 : vector<2x32xf32>
      %cst_191 = arith.constant 1.000000e+00 : f32
      %329 = vector.broadcast %cst_191 : f32 to vector<2x32xf32>
      %330 = arith.addf %328, %329 : vector<2x32xf32>
      %cst_192 = arith.constant 5.000000e-01 : f32
      %331 = vector.broadcast %cst_192 : f32 to vector<2x32xf32>
      %332 = arith.mulf %331, %330 : vector<2x32xf32>
      %333 = vector.extract_strided_slice %316 {offsets = [0, 64], sizes = [2, 32], strides = [1, 1]} : vector<2x128xf32> to vector<2x32xf32>
      %334 = math.tanh %333 : vector<2x32xf32>
      %335 = vector.extract_strided_slice %316 {offsets = [0, 96], sizes = [2, 32], strides = [1, 1]} : vector<2x128xf32> to vector<2x32xf32>
      %cst_193 = arith.constant 5.000000e-01 : f32
      %336 = vector.broadcast %cst_193 : f32 to vector<2x32xf32>
      %337 = arith.mulf %336, %335 : vector<2x32xf32>
      %338 = math.tanh %337 : vector<2x32xf32>
      %cst_194 = arith.constant 1.000000e+00 : f32
      %339 = vector.broadcast %cst_194 : f32 to vector<2x32xf32>
      %340 = arith.addf %338, %339 : vector<2x32xf32>
      %cst_195 = arith.constant 5.000000e-01 : f32
      %341 = vector.broadcast %cst_195 : f32 to vector<2x32xf32>
      %342 = arith.mulf %341, %340 : vector<2x32xf32>
      %c0_196 = arith.constant 0 : index
      %c0_197 = arith.constant 0 : index
      %343 = vector.load %arg7[%c0_196, %c0_197] : memref<2x32xf32, #tpu.memory_space<vmem>>, vector<2x32xf32>
      %344 = arith.mulf %332, %343 : vector<2x32xf32>
      %345 = arith.mulf %324, %334 : vector<2x32xf32>
      %346 = arith.addf %344, %345 : vector<2x32xf32>
      %347 = math.tanh %346 : vector<2x32xf32>
      %348 = arith.mulf %342, %347 : vector<2x32xf32>
      %349 = arith.truncf %348 : vector<2x32xf32> to vector<2x32xbf16>
      %c0_198 = arith.constant 0 : index
      %c0_199 = arith.constant 0 : index
      %350 = vector.load %arg7[%c0_198, %c0_199] : memref<2x32xf32, #tpu.memory_space<vmem>>, vector<2x32xf32>
      tpu.vector_store %arg7[%c0_198, %c0_199], %346 {strides = array<i32>} : memref<2x32xf32, #tpu.memory_space<vmem>>, vector<2x32xf32>,
      %c0_200 = arith.constant 0 : index
      %c0_201 = arith.constant 0 : index
      %351 = vector.load %arg6[%c0_200, %c0_201] : memref<2x32xbf16, #tpu.memory_space<vmem>>, vector<2x32xbf16>
      tpu.vector_store %arg6[%c0_200, %c0_201], %349 {strides = array<i32>} : memref<2x32xbf16, #tpu.memory_space<vmem>>, vector<2x32xbf16>,
      %c0_202 = arith.constant 0 : index
      %c0_203 = arith.constant 0 : index
      %c0_204 = arith.constant 0 : index
      %c0_205 = arith.constant 0 : index
      %352 = vector.load %arg5[%c0_202, %c0_203, %c0_204, %c0_205] : memref<1x8x2x32xbf16, #tpu.memory_space<vmem>>, vector<1x1x2x32xbf16>
      %353 = vector.shape_cast %352 : vector<1x1x2x32xbf16> to vector<2x32xbf16>
      %354 = vector.shape_cast %349 : vector<2x32xbf16> to vector<1x1x2x32xbf16>
      tpu.vector_store %arg5[%c0_202, %c0_203, %c0_204, %c0_205], %354 {strides = array<i32>} : memref<1x8x2x32xbf16, #tpu.memory_space<vmem>>, vector<1x1x2x32xbf16>,
    } else {
    }
    return
  }
  func.func @transform_0(%arg0: i32, %arg1: i32, %arg2: i32) -> (i32, i32, i32, i32) {
    %c1_i32 = arith.constant 1 : i32
    %0 = arith.subi %c1_i32, %arg0 : i32
    %1 = arith.muli %0, %arg2 : i32
    %c0_i32 = arith.constant 0 : i32
    %2 = arith.subi %c0_i32, %arg2 : i32
    %3 = arith.muli %arg0, %2 : i32
    %4 = arith.addi %1, %3 : i32
    %c0_i32_0 = arith.constant 0 : i32
    %c0_i32_1 = arith.constant 0 : i32
    return %arg0, %4, %arg1, %c0_i32_0 : i32, i32, i32, i32
  }
  func.func @transform_1(%arg0: i32, %arg1: i32, %arg2: i32) -> (i32, i32, i32) {
    %c0_i32 = arith.constant 0 : i32
    %c0_i32_0 = arith.constant 0 : i32
    %c0_i32_1 = arith.constant 0 : i32
    return %arg0, %c0_i32, %c0_i32_0 : i32, i32, i32
  }
  func.func @transform_2(%arg0: i32, %arg1: i32, %arg2: i32) -> (i32, i32, i32, i32) {
    %c1_i32 = arith.constant 1 : i32
    %0 = arith.subi %c1_i32, %arg0 : i32
    %1 = arith.muli %0, %arg2 : i32
    %c0_i32 = arith.constant 0 : i32
    %2 = arith.subi %c0_i32, %arg2 : i32
    %3 = arith.muli %arg0, %2 : i32
    %4 = arith.addi %1, %3 : i32
    %c0_i32_0 = arith.constant 0 : i32
    %c0_i32_1 = arith.constant 0 : i32
    return %arg0, %4, %arg1, %c0_i32_0 : i32, i32, i32, i32
  }
}

module attributes {stable_mosaic.version = 11 : i64} {
  func.func @kernel(%arg0: i32, %arg1: memref<2x16x32xbf16, #tpu.memory_space<vmem>>, %arg2: memref<2x32x256xbf16, #tpu.memory_space<vmem>>, %arg3: memref<1x256xf32, #tpu.memory_space<vmem>>, %arg4: memref<2x16x128xf32, #tpu.memory_space<vmem>>) attributes {dimension_semantics = [#tpu.dimension_semantics<parallel>], iteration_bounds = array<i64: 1>, scalar_prefetch = 0 : i64, scratch_operands = 0 : i64, tpu.core_type = #tpu.core_type<tc>, window_params = [{transform_indices = @transform_0, window_bounds = array<i64: 2, 16, 32>}, {pipeline_mode = #tpu.pipeline_mode<synchronous>, transform_indices = @transform_1, window_bounds = array<i64: 2, 32, 256>}, {pipeline_mode = #tpu.pipeline_mode<synchronous>, transform_indices = @transform_2, window_bounds = array<i64: 1, 256>}, {transform_indices = @transform_3, window_bounds = array<i64: 2, 16, 128>}]} {
    %c0 = arith.constant 0 : index
    %c0_0 = arith.constant 0 : index
    %c0_1 = arith.constant 0 : index
    %0 = vector.load %arg1[%c0, %c0_0, %c0_1] : memref<2x16x32xbf16, #tpu.memory_space<vmem>>, vector<1x16x32xbf16>
    %1 = vector.shape_cast %0 : vector<1x16x32xbf16> to vector<16x32xbf16>
    %c0_2 = arith.constant 0 : index
    %c0_3 = arith.constant 0 : index
    %c0_4 = arith.constant 0 : index
    %2 = vector.load %arg2[%c0_2, %c0_3, %c0_4] : memref<2x32x256xbf16, #tpu.memory_space<vmem>>, vector<1x32x256xbf16>
    %3 = vector.shape_cast %2 : vector<1x32x256xbf16> to vector<32x256xbf16>
    %cst = arith.constant dense<0.000000e+00> : vector<16x256xf32>
    %4 = tpu.matmul %1, %3, %cst {dimension_numbers = #tpu.dot_dimension_numbers<[1], [0], [0], [1], [0, 0, 1, 1], [], []>} : vector<16x32xbf16>, vector<32x256xbf16>, vector<16x256xf32> -> vector<16x256xf32>
    %c1 = arith.constant 1 : index
    %c0_5 = arith.constant 0 : index
    %c0_6 = arith.constant 0 : index
    %5 = vector.load %arg1[%c1, %c0_5, %c0_6] : memref<2x16x32xbf16, #tpu.memory_space<vmem>>, vector<1x16x32xbf16>
    %6 = vector.shape_cast %5 : vector<1x16x32xbf16> to vector<16x32xbf16>
    %c1_7 = arith.constant 1 : index
    %c0_8 = arith.constant 0 : index
    %c0_9 = arith.constant 0 : index
    %7 = vector.load %arg2[%c1_7, %c0_8, %c0_9] : memref<2x32x256xbf16, #tpu.memory_space<vmem>>, vector<1x32x256xbf16>
    %8 = vector.shape_cast %7 : vector<1x32x256xbf16> to vector<32x256xbf16>
    %cst_10 = arith.constant dense<0.000000e+00> : vector<16x256xf32>
    %9 = tpu.matmul %6, %8, %cst_10 {dimension_numbers = #tpu.dot_dimension_numbers<[1], [0], [0], [1], [0, 0, 1, 1], [], []>} : vector<16x32xbf16>, vector<32x256xbf16>, vector<16x256xf32> -> vector<16x256xf32>
    %10 = arith.addf %4, %9 : vector<16x256xf32>
    %c0_11 = arith.constant 0 : index
    %c0_12 = arith.constant 0 : index
    %11 = vector.load %arg3[%c0_11, %c0_12] : memref<1x256xf32, #tpu.memory_space<vmem>>, vector<1x256xf32>
    %12 = vector.broadcast %11 : vector<1x256xf32> to vector<16x256xf32>
    %13 = arith.addf %10, %12 : vector<16x256xf32>
    %14 = vector.extract_strided_slice %13 {offsets = [0, 0], sizes = [16, 128], strides = [1, 1]} : vector<16x256xf32> to vector<16x128xf32>
    %c0_13 = arith.constant 0 : index
    %c0_14 = arith.constant 0 : index
    %c0_15 = arith.constant 0 : index
    %15 = vector.load %arg4[%c0_13, %c0_14, %c0_15] : memref<2x16x128xf32, #tpu.memory_space<vmem>>, vector<1x16x128xf32>
    %16 = vector.shape_cast %15 : vector<1x16x128xf32> to vector<16x128xf32>
    %17 = vector.shape_cast %14 : vector<16x128xf32> to vector<1x16x128xf32>
    tpu.vector_store %arg4[%c0_13, %c0_14, %c0_15], %17 {strides = array<i32>} : memref<2x16x128xf32, #tpu.memory_space<vmem>>, vector<1x16x128xf32>,
    %18 = vector.extract_strided_slice %13 {offsets = [0, 128], sizes = [16, 128], strides = [1, 1]} : vector<16x256xf32> to vector<16x128xf32>
    %c1_16 = arith.constant 1 : index
    %c0_17 = arith.constant 0 : index
    %c0_18 = arith.constant 0 : index
    %19 = vector.load %arg4[%c1_16, %c0_17, %c0_18] : memref<2x16x128xf32, #tpu.memory_space<vmem>>, vector<1x16x128xf32>
    %20 = vector.shape_cast %19 : vector<1x16x128xf32> to vector<16x128xf32>
    %21 = vector.shape_cast %18 : vector<16x128xf32> to vector<1x16x128xf32>
    tpu.vector_store %arg4[%c1_16, %c0_17, %c0_18], %21 {strides = array<i32>} : memref<2x16x128xf32, #tpu.memory_space<vmem>>, vector<1x16x128xf32>,
    return
  }
  func.func @transform_0(%arg0: i32) -> (i32, i32, i32) {
    %c0_i32 = arith.constant 0 : i32
    %c0_i32_0 = arith.constant 0 : i32
    %c0_i32_1 = arith.constant 0 : i32
    return %c0_i32, %arg0, %c0_i32_0 : i32, i32, i32
  }
  func.func @transform_1(%arg0: i32) -> (i32, i32, i32) {
    %c0_i32 = arith.constant 0 : i32
    %c0_i32_0 = arith.constant 0 : i32
    %c0_i32_1 = arith.constant 0 : i32
    %c0_i32_2 = arith.constant 0 : i32
    return %c0_i32, %c0_i32_0, %c0_i32_1 : i32, i32, i32
  }
  func.func @transform_2(%arg0: i32) -> (i32, i32) {
    %c0_i32 = arith.constant 0 : i32
    %c0_i32_0 = arith.constant 0 : i32
    %c0_i32_1 = arith.constant 0 : i32
    return %c0_i32, %c0_i32_0 : i32, i32
  }
  func.func @transform_3(%arg0: i32) -> (i32, i32, i32) {
    %c0_i32 = arith.constant 0 : i32
    %c0_i32_0 = arith.constant 0 : i32
    %c0_i32_1 = arith.constant 0 : i32
    return %c0_i32, %arg0, %c0_i32_0 : i32, i32, i32
  }
}

</mosaic_0001>

<bundles_post_ra>
// kernel: lstm_forward.4
= control target key start
LH: loop header
LB: loop body
LE: loop exit
PB: predicated region body
PF: predicated region fallthrough
CT: control target
= control target key end

     0   :  { %v113_v1 = vmov 0   ;;  %vm46_vm0 = vcmask 130048   ;;  %v21_v4 = vlaneseq  ;;  %s158_s1 = inlined_call_operand.vmem [shape: bf16[1,16,256], index: 1, kind: input, shape index: {}]   ;;  %s159_s0 = inlined_call_operand.vmem [shape: bf16[1,16,16], index: 0, kind: input, shape index: {}]   ;;  %s160_s2 = inlined_call_operand.vmem [shape: f32[1,256], index: 2, kind: input, shape index: {}]   ;;  %s161_s3 = inlined_call_operand.vmem [shape: f32[2,16,128], index: 3, kind: output, shape index: {}]  }
   0x1   :  { %v109_v0 = vld [vmem:[%s158_s1 + $0x4] ss:$8 sps:$4 sm:$0xff]   ;;  %82 = vmatprep.mubr.bf16.mxu0 %v113_v1  ;;  %v111_v2 = vld [vmem:[%s158_s1] ss:$8 sps:$4 sm:$0xff]  }
   0x2   :  { %64 = vmatprep.subr.bf16.mxu0 %v109_v0  ;;  %v112_v3 = vld [vmem:[%s159_s0] sm:$0xff]   ;;  %v22_v5 = vshrl.u32 %v21_v4, 7 }
   0x3   :  { %65 = vmatpush1.bf16.msra.mxu0 %v111_v2  ;;  %v19_v7 = vld [vmem:[%s160_s2] sm:$0x3] }
   0x4   :  { %v23_v6 = vsub.s32 0, %v22_v5  ;;  %v27_v8 = vsub.s32 1, %v22_v5 }
   0x6   :  { %105 = vmatmul.mubr.msk.bf16.vlgmr.msra.gmra.mxu0 %vm46_vm0, %v112_v3  ;;  %v24_v9 = vrot.slane %v19_v7, %v23_v6  ;;  %v28_v10 = vrot.slane %v19_v7, %v27_v8 }
  0xc6   :  { %v84_v11 = vpop.f32.mrf.mxu0 }
  0xc7   :  { %v85_v12 = vadd.f32 %v84_v11, %v24_v9 }
  0xc8   :  { %v86_v13 = vpop.f32.mrf.mxu0 }
  0xc9   :  { %93 = vst [vmem:[%s161_s3] sm:$0xff] %v85_v12  ;;  %v87_v14 = vadd.f32 %v86_v13, %v28_v10 }
  0xca   :  { %v88_v15 = vpop.f32.mrf.mxu0 }
  0xcb   :  { %106 = vst [vmem:[%s161_s3 + $0x10] sm:$0xff] %v87_v14  ;;  %v89_v16 = vadd.f32 %v88_v15, %v24_v9 }
  0xcc   :  { %v90_v17 = vpop.f32.mrf.mxu0 }
  0xcd   :  { %94 = vst [vmem:[%s161_s3 + $0x8] sm:$0xff] %v89_v16  ;;  %v91_v18 = vadd.f32 %v90_v17, %v28_v10 }
  0xcf   :  { %107 = vst [vmem:[%s161_s3 + $0x18] sm:$0xff] %v91_v18 }

// kernel: lstm_forward.6
= control target key start
LH: loop header
LB: loop body
LE: loop exit
PB: predicated region body
PF: predicated region fallthrough
CT: control target
= control target key end

     0   :  { %v232_v1 = vmov 0   ;;  %vm54_vm0 = vcmask 261120   ;;  %v174_v11 = vlaneseq  ;;  %s298_s1 = inlined_call_operand.vmem [shape: bf16[2,32,256], index: 1, kind: input, shape index: {}]   ;;  %s299_s0 = inlined_call_operand.vmem [shape: bf16[2,16,32], index: 0, kind: input, shape index: {}]   ;;  %s300_s2 = inlined_call_operand.vmem [shape: f32[1,256], index: 2, kind: input, shape index: {}]   ;;  %s301_s3 = inlined_call_operand.vmem [shape: f32[2,16,128], index: 3, kind: output, shape index: {}]  }
   0x1   :  { %v218_v0 = vld [vmem:[%s298_s1 + $0x34] ss:$8 sps:$4 sm:$0xff]   ;;  %90 = vmatprep.mubr.bf16.mxu0 %v232_v1  ;;  %161 = vmatprep.mubr.bf16.mxu1 %v232_v1  ;;  %v222_v3 = vld [vmem:[%s298_s1 + $0x30] ss:$8 sps:$4 sm:$0xff]   ;;  %v224_v5 = vld [vmem:[%s298_s1 + $0x24] ss:$8 sps:$4 sm:$0xff]  }
   0x2   :  { %v220_v2 = vld [vmem:[%s298_s1 + $0x14] ss:$8 sps:$4 sm:$0xff]   ;;  %70 = vmatprep.subr.bf16.mxu0 %v218_v0  ;;  %v223_v4 = vld [vmem:[%s298_s1 + $0x10] ss:$8 sps:$4 sm:$0xff]   ;;  %v226_v6 = vld [vmem:[%s298_s1 + $0x4] ss:$8 sps:$4 sm:$0xff]  }
   0x3   :  { %141 = vmatprep.subr.bf16.mxu1 %v220_v2  ;;  %71 = vmatpush1.bf16.msra.mxu0 %v222_v3  ;;  %v228_v7 = vld [vmem:[%s298_s1 + $0x20] ss:$8 sps:$4 sm:$0xff]   ;;  %v175_v12 = vshrl.u32 %v174_v11, 7 }
   0x4   :  { %142 = vmatpush1.bf16.msra.mxu1 %v223_v4  ;;  %72 = vmatprep.subr.bf16.mxu0 %v224_v5  ;;  %v229_v8 = vld [vmem:[%s298_s1] ss:$8 sps:$4 sm:$0xff]  }
   0x5   :  { %143 = vmatprep.subr.bf16.mxu1 %v226_v6  ;;  %v230_v9 = vld [vmem:[%s299_s0 + $0x8] sm:$0xff]   ;;  %v231_v10 = vld [vmem:[%s299_s0] sm:$0xff]   ;;  %v176_v13 = vsub.s32 0, %v175_v12  ;;  %v180_v15 = vsub.s32 1, %v175_v12 }
   0x6   :  { %v172_v14 = vld [vmem:[%s300_s2] sm:$0x3] }
   0x7   :  { %73 = vmatpush1.bf16.msra.mxu0 %v228_v7  ;;  %v177_v16 = vrot.slane %v172_v14, %v176_v13  ;;  %v181_v20 = vrot.slane %v172_v14, %v180_v15 }
   0x8   :  { %144 = vmatpush1.bf16.msra.mxu1 %v229_v8 }
   0xa   :  { %208 = vmatmul.mubr.msk.bf16.vlgmr.msra.gmra.mxu0 %vm54_vm0, %v230_v9 }
   0xb   :  { %214 = vmatmul.mubr.msk.bf16.vlgmr.msra.gmra.mxu1 %vm54_vm0, %v231_v10 }
  0xca   :  { %v92_v17 = vpop.f32.mrf.mxu0 }
  0xcb   :  { %v163_v18 = vpop.f32.mrf.mxu1 }
  0xcc   :  { %v164_v19 = vadd.f32 %v163_v18, %v92_v17  ;;  %v94_v21 = vpop.f32.mrf.mxu0 }
  0xcd   :  { %v165_v22 = vpop.f32.mrf.mxu1 }
  0xce   :  { %v184_v23 = vadd.f32 %v177_v16, %v164_v19  ;;  %v166_v24 = vadd.f32 %v165_v22, %v94_v21  ;;  %v96_v25 = vpop.f32.mrf.mxu0 }
  0xcf   :  { %v167_v26 = vpop.f32.mrf.mxu1 }
  0xd0   :  { %188 = vst [vmem:[%s301_s3] sm:$0xff] %v184_v23  ;;  %v185_v27 = vadd.f32 %v181_v20, %v166_v24  ;;  %v168_v28 = vadd.f32 %v167_v26, %v96_v25  ;;  %v98_v29 = vpop.f32.mrf.mxu0 }
  0xd1   :  { %v169_v30 = vpop.f32.mrf.mxu1 }
  0xd2   :  { %215 = vst [vmem:[%s301_s3 + $0x10] sm:$0xff] %v185_v27  ;;  %v186_v31 = vadd.f32 %v177_v16, %v168_v28  ;;  %v170_v32 = vadd.f32 %v169_v30, %v98_v29 }
  0xd4   :  { %189 = vst [vmem:[%s301_s3 + $0x8] sm:$0xff] %v186_v31  ;;  %v187_v33 = vadd.f32 %v181_v20, %v170_v32 }
  0xd6   :  { %216 = vst [vmem:[%s301_s3 + $0x18] sm:$0xff] %v187_v33 }

// kernel: lstm_forward.5
= control target key start
LH: loop header
LB: loop body
LE: loop exit
PB: predicated region body
PF: predicated region fallthrough
CT: control target
= control target key end

     0   :  { %s2504_s9 = smov 0   ;;  %s2506_s10 = smov 0   ;;  %s2900_s0 = inlined_call_operand.vmem [shape: f32[2,8,2,128], index: 0, kind: input, shape index: {}]   ;;  %s2901_s1 = inlined_call_operand.vmem [shape: bf16[2,32,128], index: 1, kind: input, shape index: {}]   ;;  %s2902_s2 = inlined_call_operand.vmem [shape: bf16[2,8,2,32], index: 2, kind: output, shape index: {}]  }
   0x1   :  { %s2508_s11 = smov 0  }
   0x2 LB: > { %s31_s12 = sadd.s32 1, %s2469_s10  ;;  %p2081_p0 = scmp.ge.s32.totalorder %s2473_s11, 1  ;;  %s2473_s11 = sphi %s2508_s11, %s12_s11   ;;  %s2469_s10 = sphi %s2506_s10, %s2904_s10   ;;  %s2465_s9 = sphi %s2504_s9, %s2903_s9  }
   0x3   : > { %p33_p1 = scmp.ge.s32.totalorder %s31_s12, 2  ;;  %p187_p2 = scmp.lt.s32.totalorder %s2473_s11, 3 }
   0x5   : > { %s2906_s12 = smov (%p33_p1, %s31_s12), 0  ;;  %p188_p3 = pnand %p2081_p0, %p187_p2 }
   0x6   : > { %p243_p4 = scmp.lt.s32.totalorder (!%p188_p3), %s2465_s9, 1  ;;  %p2087_p5 = scmp.ne.s32.totalorder (!%p188_p3), %s2465_s9, 0 }
   0x7   : > { %191 = sbr.rel (%p188_p3) target bundleno = 11277 (0x2c0d), region = 28 }
   0xc   : > { %vm292_vm0 = vcmask 253952   ;;  %vm294_vm1 = vcmask 254976   ;;  %v2475_v0 = vmov 0   ;;  %v2476_v1 = vmov 0.0   ;;  %s244_s13 = scalar_select %p243_p4, %s2465_s9, 1 }
   0xd   : > { %293 = vst.msk [vmem:[#allocation2] sm:$0x1] %vm292_vm0, %v2475_v0  ;;  %303 = sbr.rel (%p2087_p5) target bundleno = 5644 (0x160c), region = 36  ;;  %s2479_s25 = smov (!%p2087_p5), 64  }
   0xe   : > { %295 = vst.msk [vmem:[#allocation3] sm:$0x3] %vm294_vm1, %v2476_v1  ;;  %s2139_s14 = sshll.u32 %s244_s13, 4  ;;  %s2086_s15 = sshll.u32 %s244_s13, 3 }
   0xf   : > { %s2531_s18 = scalar_lea.vmem %s2900_s0, %s2139_s14  ;;  %s264_s21 = scalar_lea.vmem %s2901_s1, %s2139_s14 }
  0x10   : > { %s2539_s24 = scalar_lea.vmem %s2902_s2, %s2086_s15  ;;  %v2541_v2 = vld [vmem:[%s264_s21] sm:$0xf]  ;;  %v2543_v3 = vld [vmem:[%s264_s21 + $0x4] sm:$0xf]  ;;  %v2545_v4 = vld [vmem:[%s264_s21 + $0x8] sm:$0xf] }
  0x11   : > { %v2547_v5 = vld [vmem:[%s264_s21 + $0xc] sm:$0xf]  ;;  %s2480_s26 = smov (!%p2087_p5), 32   ;;  %s2481_s27 = smov (!%p2087_p5), 96  }
  0x12   : > { %v2552_v6 = vcombine.low %v2545_v4, %v2547_v5  ;;  %v2477_v7 = vmov 0.0   ;;  %vm2478_vm2 = vmmov 0   ;;  %v2560_v8 = vcombine.low %v2541_v2, %v2543_v3  ;;  %v304_v10 = vld [vmem:[%s2531_s18] sm:$0x3]  ;;  %v2091_v44 = vld [vmem:[%s2531_s18 + $0x2] sm:$0x3] }
  0x13   : > { %2189 = vmatprep.subr.bf16.mxu0 %v2477_v7  ;;  %2193 = vmatprep.mubr.msk.bf16.mxu0 %vm2478_vm2, %v2477_v7  ;;  %vm318_vm3 = vcmask 261120   ;;  %v2482_v29 = vmov 1966171168   ;;  %v401_v31 = vlaneseq }
  0x14   : > { %2190 = vmatpush3.bf16.msra.mxu0 %v2552_v6  ;;  %2197 = vmatprep.subr.bf16.mxu1 %v2477_v7  ;;  %v305_v9 = vld [vmem:[#allocation2] sm:$0x1]  ;;  %v399_v30 = vunpack.c.l.s4 %v2482_v29 }
  0x15   : > { %2191 = vmatprep.subr.bf16.mxu0 %v2477_v7  ;;  %2198 = vmatpush3.bf16.msra.mxu1 %v2552_v6  ;;  %v368_v17 = vld [vmem:[#allocation3] sm:$0x3]  ;;  %v402_v33 = vshrl.u32 %v401_v31, 7 }
  0x16   : > { %2199 = vmatprep.subr.bf16.mxu1 %v2477_v7  ;;  %2201 = vmatprep.mubr.msk.bf16.mxu1 %vm2478_vm2, %v2477_v7  ;;  %v400_v32 = vunpack.c.0.s8 %v399_v30 }
  0x18   : > { %2192 = vmatpush3.bf16.msra.mxu0 %v2560_v8  ;;  %v2585_v35 = vsub.s32 %v400_v32, %v402_v33 }
  0x19   : > { %2200 = vmatpush3.bf16.msra.mxu1 %v2560_v8  ;;  %2205 = vmatprep.subr.bf16.mxu0 %v2477_v7 }
  0x1a   : > { %2213 = vmatprep.subr.bf16.mxu1 %v2477_v7 }
  0x1b   : > { %2194 = vmatmul.mubr.msk.bf16.vlgmr.msra.gmra.mxu0 %vm318_vm3, %v305_v9 }
  0x1c   : > { %2206 = vmatpush3.bf16.msra.mxu0 %v2552_v6  ;;  %2209 = vmatprep.mubr.msk.bf16.mxu0 %vm2478_vm2, %v2477_v7 }
  0x1d   : > { %2207 = vmatprep.subr.bf16.mxu0 %v2477_v7 }
  0x20   : > { %2208 = vmatpush3.bf16.msra.mxu0 %v2560_v8 }
  0x21   : > { %2221 = vmatprep.subr.bf16.mxu0 %v2477_v7 }
  0xdb   : > { %v356_v11 = vpop.f32.mrf.mxu0 }
  0xdc   : > { %v362_v12 = vadd.f32 %v356_v11, %v304_v10 }
  0xdd   : > { %v2195_v13 = vpop.f32.mrf.mxu0 }
  0xde   : > { %2355 = vtanh.f32 %v362_v12  ;;  %v363_v18 = vmul.f32 0.5, %v362_v12 }
  0xdf   : > { %v359_v14 = vpop.f32.mrf.mxu0 }
  0xe0   : > { %2357 = vtanh.f32 %v363_v18  ;;  %v2094_v14 = vld [vmem:[%s2531_s18 + $0x4] sm:$0x3] }
  0xe1   : > { %v2196_v15 = vpop.f32.mrf.mxu0 }
  0xeb   : > { %v2356_v16 = vpop.eup %2355 }
  0xec   : > { %375 = vrot.lane.b32.xlu0 %v2356_v16, %s2479_s25 }
  0xed   : > { %v2358_v19 = vpop.eup %2357 }
  0xee   : > { %v365_v20 = vadd.f32 1.0, %v2358_v19 }
  0xf0   : > { %370 = vrot.lane.b32.xlu0 %v368_v17, %s2480_s26  ;;  %v366_v21 = vmul.f32 0.5, %v365_v20 }
 0x15e   : > { %v376_v22 = vpop.permute.xlu0 %375 }
 0x15f   : > { %v378_v23 = vmul.f32 %v376_v22, %v366_v21 }
 0x161   : > { %380 = vrot.lane.b32.xlu1 %v378_v23, %s2480_s26 }
 0x162   : > { %v371_v24 = vpop.permute.xlu0 %370 }
 0x163   : > { %v373_v25 = vmul.f32 %v371_v24, %v366_v21 }
 0x1d3   : > { %v381_v26 = vpop.permute.xlu1 %380 }
 0x1d4   : > { %v383_v27 = vadd.f32 %v381_v26, %v373_v25 }
 0x1d6   : > { %2359 = vtanh.f32 %v383_v27 }
 0x1e3   : > { %v2360_v28 = vpop.eup %2359 }
 0x1e4   : > { %386 = vrot.lane.b32.xlu1 %v2360_v28, %s2479_s25 }
 0x1e8   : > { %392 = vrot.lane.b32.xlu1 %v383_v27, %s2481_s27 }
 0x256   : > { %v387_v34 = vpop.permute.xlu1 %386 }
 0x257   : > { %v389_v36 = vmul.f32 %v387_v34, %v366_v21 }
 0x259   : > { %v390_v37 = vpack.c.bf16 %v389_v36, %v389_v36 }
 0x25a   : > { %v393_v38 = vpop.permute.xlu1 %392 }
 0x25b   : > { %v404_v39 = vrot.slane %v390_v37, %v2585_v35  ;;  %396 = vst.msk [vmem:[#allocation3] sm:$0x3] %vm294_vm1, %v393_v38 }
 0x25d   : > { %v411_v40 = vrot.slane %v404_v39, %v2585_v35 }
 0x25f   : > { %412 = vrot.lane.b32.xlu0 %v411_v40, %s2480_s26 }
 0x262   : > { %v470_v41 = vld [vmem:[#allocation3] sm:$0x3] }
 0x263   : > { %472 = vrot.lane.b32.xlu1 %v470_v41, %s2480_s26 }
 0x2d1   : > { %v413_v42 = vpop.permute.xlu0 %412 }
 0x2d2   : > { %416 = vst.msk [vmem:[#allocation2] sm:$0x1] %vm292_vm0, %v413_v42  ;;  %417 = vst.msk [vmem:[%s2539_s24] sm:$0x1] %vm292_vm0, %v413_v42  ;;  %v2097_v42 = vld [vmem:[%s2531_s18 + $0x6] sm:$0x3] }
 0x2d5   : > { %v473_v57 = vpop.permute.xlu1 %472 }
 0x2d9   : > { %v420_v43 = vld [vmem:[#allocation2] sm:$0x1] }
 0x2da   : > { %2202 = vmatmul.mubr.msk.bf16.vlgmr.msra.gmra.mxu1 %vm318_vm3, %v420_v43 }
 0x2db   : > { %2214 = vmatpush3.bf16.msra.mxu1 %v2552_v6  ;;  %2217 = vmatprep.mubr.msk.bf16.mxu1 %vm2478_vm2, %v2477_v7 }
 0x2dc   : > { %2215 = vmatprep.subr.bf16.mxu1 %v2477_v7 }
 0x2df   : > { %2216 = vmatpush3.bf16.msra.mxu1 %v2560_v8 }
 0x2e0   : > { %2229 = vmatprep.subr.bf16.mxu1 %v2477_v7 }
 0x39a   : > { %v458_v45 = vpop.f32.mrf.mxu1 }
 0x39b   : > { %v464_v46 = vadd.f32 %v2091_v44, %v458_v45 }
 0x39c   : > { %v2203_v47 = vpop.f32.mrf.mxu1 }
 0x39d   : > { %2361 = vtanh.f32 %v464_v46  ;;  %v465_v51 = vmul.f32 0.5, %v464_v46 }
 0x39e   : > { %v461_v48 = vpop.f32.mrf.mxu1 }
 0x39f   : > { %2363 = vtanh.f32 %v465_v51 }
 0x3a0   : > { %v2204_v49 = vpop.f32.mrf.mxu1 }
 0x3aa   : > { %v2362_v50 = vpop.eup %2361 }
 0x3ab   : > { %477 = vrot.lane.b32.xlu0 %v2362_v50, %s2479_s25 }
 0x3ac   : > { %v2364_v52 = vpop.eup %2363 }
 0x3ad   : > { %v467_v53 = vadd.f32 1.0, %v2364_v52 }
 0x3af   : > { %v468_v54 = vmul.f32 0.5, %v467_v53 }
 0x3b1   : > { %v475_v58 = vmul.f32 %v473_v57, %v468_v54 }
 0x41d   : > { %v478_v55 = vpop.permute.xlu0 %477 }
 0x41e   : > { %v480_v56 = vmul.f32 %v478_v55, %v468_v54 }
 0x420   : > { %482 = vrot.lane.b32.xlu0 %v480_v56, %s2480_s26 }
 0x492   : > { %v483_v59 = vpop.permute.xlu0 %482 }
 0x493   : > { %v485_v60 = vadd.f32 %v483_v59, %v475_v58 }
 0x495   : > { %2365 = vtanh.f32 %v485_v60 }
 0x4a2   : > { %v2366_v61 = vpop.eup %2365 }
 0x4a3   : > { %488 = vrot.lane.b32.xlu1 %v2366_v61, %s2479_s25 }
 0x4a7   : > { %494 = vrot.lane.b32.xlu1 %v485_v60, %s2481_s27 }
 0x515   : > { %v489_v62 = vpop.permute.xlu1 %488 }
 0x516   : > { %v491_v63 = vmul.f32 %v489_v62, %v468_v54 }
 0x518   : > { %v492_v0 = vpack.c.bf16 %v491_v63, %v491_v63 }
 0x519   : > { %v495_v1 = vpop.permute.xlu1 %494 }
 0x51a   : > { %v505_v9 = vrot.slane %v492_v0, %v2585_v35  ;;  %497 = vst.msk [vmem:[#allocation3] sm:$0x3] %vm294_vm1, %v495_v1 }
 0x51c   : > { %v512_v10 = vrot.slane %v505_v9, %v2585_v35 }
 0x51e   : > { %513 = vrot.lane.b32.xlu0 %v512_v10, %s2480_s26 }
 0x521   : > { %v571_v11 = vld [vmem:[#allocation3] sm:$0x3] }
 0x522   : > { %573 = vrot.lane.b32.xlu1 %v571_v11, %s2480_s26 }
 0x590   : > { %v514_v12 = vpop.permute.xlu0 %513 }
 0x591   : > { %516 = vst.msk [vmem:[#allocation2] sm:$0x1] %vm292_vm0, %v514_v12  ;;  %2093 = vst.msk [vmem:[%s2539_s24 + $0x1] sm:$0x1] %vm292_vm0, %v514_v12  ;;  %v2100_v12 = vld [vmem:[%s2531_s18 + $0x8] sm:$0x3] }
 0x594   : > { %v574_v27 = vpop.permute.xlu1 %573 }
 0x598   : > { %v521_v13 = vld [vmem:[#allocation2] sm:$0x1] }
 0x599   : > { %2210 = vmatmul.mubr.msk.bf16.vlgmr.msra.gmra.mxu0 %vm318_vm3, %v521_v13 }
 0x59a   : > { %2222 = vmatpush3.bf16.msra.mxu0 %v2552_v6  ;;  %2225 = vmatprep.mubr.msk.bf16.mxu0 %vm2478_vm2, %v2477_v7 }
 0x59b   : > { %2223 = vmatprep.subr.bf16.mxu0 %v2477_v7 }
 0x59e   : > { %2224 = vmatpush3.bf16.msra.mxu0 %v2560_v8 }
 0x59f   : > { %2237 = vmatprep.subr.bf16.mxu0 %v2477_v7 }
 0x659   : > { %v559_v15 = vpop.f32.mrf.mxu0 }
 0x65a   : > { %v565_v16 = vadd.f32 %v2094_v14, %v559_v15 }
 0x65b   : > { %v2211_v17 = vpop.f32.mrf.mxu0 }
 0x65c   : > { %2367 = vtanh.f32 %v565_v16  ;;  %v566_v21 = vmul.f32 0.5, %v565_v16 }
 0x65d   : > { %v562_v18 = vpop.f32.mrf.mxu0 }
 0x65e   : > { %2369 = vtanh.f32 %v566_v21 }
 0x65f   : > { %v2212_v19 = vpop.f32.mrf.mxu0 }
 0x669   : > { %v2368_v20 = vpop.eup %2367 }
 0x66a   : > { %578 = vrot.lane.b32.xlu0 %v2368_v20, %s2479_s25 }
 0x66b   : > { %v2370_v22 = vpop.eup %2369 }
 0x66c   : > { %v568_v23 = vadd.f32 1.0, %v2370_v22 }
 0x66e   : > { %v569_v24 = vmul.f32 0.5, %v568_v23 }
 0x670   : > { %v576_v28 = vmul.f32 %v574_v27, %v569_v24 }
 0x6dc   : > { %v579_v25 = vpop.permute.xlu0 %578 }
 0x6dd   : > { %v581_v26 = vmul.f32 %v579_v25, %v569_v24 }
 0x6df   : > { %583 = vrot.lane.b32.xlu0 %v581_v26, %s2480_s26 }
 0x751   : > { %v584_v29 = vpop.permute.xlu0 %583 }
 0x752   : > { %v586_v30 = vadd.f32 %v584_v29, %v576_v28 }
 0x754   : > { %2371 = vtanh.f32 %v586_v30 }
 0x761   : > { %v2372_v31 = vpop.eup %2371 }
 0x762   : > { %589 = vrot.lane.b32.xlu1 %v2372_v31, %s2479_s25 }
 0x766   : > { %595 = vrot.lane.b32.xlu1 %v586_v30, %s2481_s27 }
 0x7d4   : > { %v590_v32 = vpop.permute.xlu1 %589 }
 0x7d5   : > { %v592_v33 = vmul.f32 %v590_v32, %v569_v24 }
 0x7d7   : > { %v593_v34 = vpack.c.bf16 %v592_v33, %v592_v33 }
 0x7d8   : > { %v596_v36 = vpop.permute.xlu1 %595 }
 0x7d9   : > { %v606_v37 = vrot.slane %v593_v34, %v2585_v35  ;;  %598 = vst.msk [vmem:[#allocation3] sm:$0x3] %vm294_vm1, %v596_v36 }
 0x7db   : > { %v613_v38 = vrot.slane %v606_v37, %v2585_v35 }
 0x7dd   : > { %614 = vrot.lane.b32.xlu0 %v613_v38, %s2480_s26 }
 0x7e0   : > { %v672_v39 = vld [vmem:[#allocation3] sm:$0x3] }
 0x7e1   : > { %674 = vrot.lane.b32.xlu1 %v672_v39, %s2480_s26 }
 0x84f   : > { %v615_v40 = vpop.permute.xlu0 %614 }
 0x850   : > { %617 = vst.msk [vmem:[#allocation2] sm:$0x1] %vm292_vm0, %v615_v40  ;;  %2096 = vst.msk [vmem:[%s2539_s24 + $0x2] sm:$0x1] %vm292_vm0, %v615_v40  ;;  %v2103_v40 = vld [vmem:[%s2531_s18 + $0xa] sm:$0x3] }
 0x853   : > { %v675_v55 = vpop.permute.xlu1 %674 }
 0x857   : > { %v622_v41 = vld [vmem:[#allocation2] sm:$0x1] }
 0x858   : > { %2218 = vmatmul.mubr.msk.bf16.vlgmr.msra.gmra.mxu1 %vm318_vm3, %v622_v41 }
 0x859   : > { %2230 = vmatpush3.bf16.msra.mxu1 %v2552_v6  ;;  %2233 = vmatprep.mubr.msk.bf16.mxu1 %vm2478_vm2, %v2477_v7 }
 0x85a   : > { %2231 = vmatprep.subr.bf16.mxu1 %v2477_v7 }
 0x85d   : > { %2232 = vmatpush3.bf16.msra.mxu1 %v2560_v8 }
 0x85e   : > { %2245 = vmatprep.subr.bf16.mxu1 %v2477_v7 }
 0x918   : > { %v660_v43 = vpop.f32.mrf.mxu1 }
 0x919   : > { %v666_v44 = vadd.f32 %v2097_v42, %v660_v43 }
 0x91a   : > { %v2219_v45 = vpop.f32.mrf.mxu1 }
 0x91b   : > { %2373 = vtanh.f32 %v666_v44  ;;  %v667_v49 = vmul.f32 0.5, %v666_v44 }
 0x91c   : > { %v663_v46 = vpop.f32.mrf.mxu1 }
 0x91d   : > { %2375 = vtanh.f32 %v667_v49 }
 0x91e   : > { %v2220_v47 = vpop.f32.mrf.mxu1 }
 0x928   : > { %v2374_v48 = vpop.eup %2373 }
 0x929   : > { %679 = vrot.lane.b32.xlu0 %v2374_v48, %s2479_s25 }
 0x92a   : > { %v2376_v50 = vpop.eup %2375 }
 0x92b   : > { %v669_v51 = vadd.f32 1.0, %v2376_v50 }
 0x92d   : > { %v670_v52 = vmul.f32 0.5, %v669_v51 }
 0x92f   : > { %v677_v56 = vmul.f32 %v675_v55, %v670_v52 }
 0x99b   : > { %v680_v53 = vpop.permute.xlu0 %679 }
 0x99c   : > { %v682_v54 = vmul.f32 %v680_v53, %v670_v52 }
 0x99e   : > { %684 = vrot.lane.b32.xlu0 %v682_v54, %s2480_s26 }
 0xa10   : > { %v685_v57 = vpop.permute.xlu0 %684 }
 0xa11   : > { %v687_v58 = vadd.f32 %v685_v57, %v677_v56 }
 0xa13   : > { %2377 = vtanh.f32 %v687_v58 }
 0xa20   : > { %v2378_v59 = vpop.eup %2377 }
 0xa21   : > { %690 = vrot.lane.b32.xlu1 %v2378_v59, %s2479_s25 }
 0xa25   : > { %696 = vrot.lane.b32.xlu1 %v687_v58, %s2481_s27 }
 0xa93   : > { %v691_v60 = vpop.permute.xlu1 %690 }
 0xa94   : > { %v693_v61 = vmul.f32 %v691_v60, %v670_v52 }
 0xa96   : > { %v694_v62 = vpack.c.bf16 %v693_v61, %v693_v61 }
 0xa97   : > { %v697_v63 = vpop.permute.xlu1 %696 }
 0xa98   : > { %v707_v0 = vrot.slane %v694_v62, %v2585_v35  ;;  %699 = vst.msk [vmem:[#allocation3] sm:$0x3] %vm294_vm1, %v697_v63 }
 0xa9a   : > { %v714_v1 = vrot.slane %v707_v0, %v2585_v35  ;;  %v2106_v0 = vld [vmem:[%s2531_s18 + $0xc] sm:$0x3] }
 0xa9c   : > { %715 = vrot.lane.b32.xlu0 %v714_v1, %s2480_s26 }
 0xa9f   : > { %v773_v9 = vld [vmem:[#allocation3] sm:$0x3] }
 0xaa0   : > { %775 = vrot.lane.b32.xlu1 %v773_v9, %s2480_s26 }
 0xb0e   : > { %v716_v10 = vpop.permute.xlu0 %715 }
 0xb0f   : > { %718 = vst.msk [vmem:[#allocation2] sm:$0x1] %vm292_vm0, %v716_v10  ;;  %2099 = vst.msk [vmem:[%s2539_s24 + $0x3] sm:$0x1] %vm292_vm0, %v716_v10 }
 0xb12   : > { %v776_v25 = vpop.permute.xlu1 %775 }
 0xb16   : > { %v723_v11 = vld [vmem:[#allocation2] sm:$0x1] }
 0xb17   : > { %2226 = vmatmul.mubr.msk.bf16.vlgmr.msra.gmra.mxu0 %vm318_vm3, %v723_v11 }
 0xb18   : > { %2238 = vmatpush3.bf16.msra.mxu0 %v2552_v6  ;;  %2241 = vmatprep.mubr.msk.bf16.mxu0 %vm2478_vm2, %v2477_v7 }
 0xb19   : > { %2239 = vmatprep.subr.bf16.mxu0 %v2477_v7 }
 0xb1c   : > { %2240 = vmatpush3.bf16.msra.mxu0 %v2560_v8 }
 0xbd7   : > { %v761_v13 = vpop.f32.mrf.mxu0 }
 0xbd8   : > { %v767_v14 = vadd.f32 %v2100_v12, %v761_v13 }
 0xbd9   : > { %v2227_v15 = vpop.f32.mrf.mxu0 }
 0xbda   : > { %2379 = vtanh.f32 %v767_v14  ;;  %v768_v19 = vmul.f32 0.5, %v767_v14 }
 0xbdb   : > { %v764_v16 = vpop.f32.mrf.mxu0 }
 0xbdc   : > { %2381 = vtanh.f32 %v768_v19 }
 0xbdd   : > { %v2228_v17 = vpop.f32.mrf.mxu0 }
 0xbe7   : > { %v2380_v18 = vpop.eup %2379 }
 0xbe8   : > { %780 = vrot.lane.b32.xlu0 %v2380_v18, %s2479_s25 }
 0xbe9   : > { %v2382_v20 = vpop.eup %2381 }
 0xbea   : > { %v770_v21 = vadd.f32 1.0, %v2382_v20 }
 0xbec   : > { %v771_v22 = vmul.f32 0.5, %v770_v21 }
 0xbee   : > { %v778_v26 = vmul.f32 %v776_v25, %v771_v22 }
 0xc5a   : > { %v781_v23 = vpop.permute.xlu0 %780 }
 0xc5b   : > { %v783_v24 = vmul.f32 %v781_v23, %v771_v22 }
 0xc5d   : > { %785 = vrot.lane.b32.xlu0 %v783_v24, %s2480_s26 }
 0xccf   : > { %v786_v27 = vpop.permute.xlu0 %785 }
 0xcd0   : > { %v788_v28 = vadd.f32 %v786_v27, %v778_v26 }
 0xcd2   : > { %2383 = vtanh.f32 %v788_v28 }
 0xcdf   : > { %v2384_v29 = vpop.eup %2383 }
 0xce0   : > { %791 = vrot.lane.b32.xlu1 %v2384_v29, %s2479_s25 }
 0xce4   : > { %797 = vrot.lane.b32.xlu1 %v788_v28, %s2481_s27 }
 0xd52   : > { %v792_v30 = vpop.permute.xlu1 %791 }
 0xd53   : > { %v794_v31 = vmul.f32 %v792_v30, %v771_v22 }
 0xd55   : > { %v795_v32 = vpack.c.bf16 %v794_v31, %v794_v31 }
 0xd56   : > { %v798_v33 = vpop.permute.xlu1 %797 }
 0xd57   : > { %v808_v34 = vrot.slane %v795_v32, %v2585_v35  ;;  %800 = vst.msk [vmem:[#allocation3] sm:$0x3] %vm294_vm1, %v798_v33 }
 0xd59   : > { %v815_v36 = vrot.slane %v808_v34, %v2585_v35  ;;  %v2109_v34 = vld [vmem:[%s2531_s18 + $0xe] sm:$0x3] }
 0xd5b   : > { %816 = vrot.lane.b32.xlu0 %v815_v36, %s2480_s26 }
 0xd5e   : > { %v874_v37 = vld [vmem:[#allocation3] sm:$0x3] }
 0xd5f   : > { %876 = vrot.lane.b32.xlu1 %v874_v37, %s2480_s26 }
 0xdcd   : > { %v817_v38 = vpop.permute.xlu0 %816 }
 0xdce   : > { %819 = vst.msk [vmem:[#allocation2] sm:$0x1] %vm292_vm0, %v817_v38  ;;  %2102 = vst.msk [vmem:[%s2539_s24 + $0x4] sm:$0x1] %vm292_vm0, %v817_v38 }
 0xdd5   : > { %v824_v39 = vld [vmem:[#allocation2] sm:$0x1] }
 0xdd6   : > { %2234 = vmatmul.mubr.msk.bf16.vlgmr.msra.gmra.mxu1 %vm318_vm3, %v824_v39 }
 0xdd7   : > { %2246 = vmatpush3.bf16.msra.mxu1 %v2552_v6  ;;  %2249 = vmatprep.mubr.msk.bf16.mxu1 %vm2478_vm2, %v2477_v7 }
 0xdd8   : > { %2247 = vmatprep.subr.bf16.mxu1 %v2477_v7  ;;  %v877_v7 = vpop.permute.xlu1 %876 }
 0xddb   : > { %2248 = vmatpush3.bf16.msra.mxu1 %v2560_v8 }
 0xe96   : > { %v862_v41 = vpop.f32.mrf.mxu1 }
 0xe97   : > { %v868_v42 = vadd.f32 %v2103_v40, %v862_v41 }
 0xe98   : > { %v2235_v43 = vpop.f32.mrf.mxu1 }
 0xe99   : > { %2385 = vtanh.f32 %v868_v42  ;;  %v869_v47 = vmul.f32 0.5, %v868_v42 }
 0xe9a   : > { %v865_v44 = vpop.f32.mrf.mxu1 }
 0xe9b   : > { %2387 = vtanh.f32 %v869_v47 }
 0xe9c   : > { %v2236_v45 = vpop.f32.mrf.mxu1 }
 0xea6   : > { %v2386_v46 = vpop.eup %2385 }
 0xea7   : > { %881 = vrot.lane.b32.xlu0 %v2386_v46, %s2479_s25 }
 0xea8   : > { %v2388_v6 = vpop.eup %2387 }
 0xea9   : > { %v871_v48 = vadd.f32 1.0, %v2388_v6 }
 0xeab   : > { %v872_v49 = vmul.f32 0.5, %v871_v48 }
 0xead   : > { %v879_v8 = vmul.f32 %v877_v7, %v872_v49 }
 0xf19   : > { %v882_v50 = vpop.permute.xlu0 %881 }
 0xf1a   : > { %v884_v51 = vmul.f32 %v882_v50, %v872_v49 }
 0xf1c   : > { %886 = vrot.lane.b32.xlu0 %v884_v51, %s2480_s26 }
 0xf8e   : > { %v887_v52 = vpop.permute.xlu0 %886 }
 0xf8f   : > { %v889_v53 = vadd.f32 %v887_v52, %v879_v8 }
 0xf91   : > { %2389 = vtanh.f32 %v889_v53 }
 0xf9e   : > { %v2390_v54 = vpop.eup %2389 }
 0xf9f   : > { %892 = vrot.lane.b32.xlu1 %v2390_v54, %s2479_s25 }
 0xfa3   : > { %898 = vrot.lane.b32.xlu1 %v889_v53, %s2481_s27 }
0x1011   : > { %v893_v55 = vpop.permute.xlu1 %892 }
0x1012   : > { %v895_v56 = vmul.f32 %v893_v55, %v872_v49 }
0x1014   : > { %v896_v57 = vpack.c.bf16 %v895_v56, %v895_v56 }
0x1015   : > { %v899_v58 = vpop.permute.xlu1 %898 }
0x1016   : > { %v909_v59 = vrot.slane %v896_v57, %v2585_v35  ;;  %901 = vst.msk [vmem:[#allocation3] sm:$0x3] %vm294_vm1, %v899_v58 }
0x1018   : > { %v916_v60 = vrot.slane %v909_v59, %v2585_v35 }
0x101a   : > { %917 = vrot.lane.b32.xlu0 %v916_v60, %s2480_s26 }
0x101d   : > { %v975_v61 = vld [vmem:[#allocation3] sm:$0x3] }
0x101e   : > { %977 = vrot.lane.b32.xlu1 %v975_v61, %s2480_s26 }
0x108c   : > { %v918_v62 = vpop.permute.xlu0 %917 }
0x108d   : > { %920 = vst.msk [vmem:[#allocation2] sm:$0x1] %vm292_vm0, %v918_v62  ;;  %2105 = vst.msk [vmem:[%s2539_s24 + $0x5] sm:$0x1] %vm292_vm0, %v918_v62 }
0x1090   : > { %v978_v20 = vpop.permute.xlu1 %977 }
0x1094   : > { %v925_v63 = vld [vmem:[#allocation2] sm:$0x1] }
0x1095   : > { %2242 = vmatmul.mubr.msk.bf16.vlgmr.msra.gmra.mxu0 %vm318_vm3, %v925_v63 }
0x1155   : > { %v963_v1 = vpop.f32.mrf.mxu0 }
0x1156   : > { %v969_v9 = vadd.f32 %v2106_v0, %v963_v1 }
0x1157   : > { %v2243_v10 = vpop.f32.mrf.mxu0 }
0x1158   : > { %2391 = vtanh.f32 %v969_v9  ;;  %v970_v14 = vmul.f32 0.5, %v969_v9 }
0x1159   : > { %v966_v11 = vpop.f32.mrf.mxu0 }
0x115a   : > { %2393 = vtanh.f32 %v970_v14 }
0x115b   : > { %v2244_v12 = vpop.f32.mrf.mxu0 }
0x1165   : > { %v2392_v13 = vpop.eup %2391 }
0x1166   : > { %982 = vrot.lane.b32.xlu0 %v2392_v13, %s2479_s25 }
0x1167   : > { %v2394_v15 = vpop.eup %2393 }
0x1168   : > { %v972_v16 = vadd.f32 1.0, %v2394_v15 }
0x116a   : > { %v973_v17 = vmul.f32 0.5, %v972_v16 }
0x116c   : > { %v980_v21 = vmul.f32 %v978_v20, %v973_v17 }
0x11d8   : > { %v983_v18 = vpop.permute.xlu0 %982 }
0x11d9   : > { %v985_v19 = vmul.f32 %v983_v18, %v973_v17 }
0x11db   : > { %987 = vrot.lane.b32.xlu0 %v985_v19, %s2480_s26 }
0x124d   : > { %v988_v22 = vpop.permute.xlu0 %987 }
0x124e   : > { %v990_v23 = vadd.f32 %v988_v22, %v980_v21 }
0x1250   : > { %2395 = vtanh.f32 %v990_v23 }
0x125d   : > { %v2396_v24 = vpop.eup %2395 }
0x125e   : > { %993 = vrot.lane.b32.xlu1 %v2396_v24, %s2479_s25 }
0x1262   : > { %999 = vrot.lane.b32.xlu1 %v990_v23, %s2481_s27 }
0x12d0   : > { %v994_v25 = vpop.permute.xlu1 %993 }
0x12d1   : > { %v996_v26 = vmul.f32 %v994_v25, %v973_v17 }
0x12d3   : > { %v997_v27 = vpack.c.bf16 %v996_v26, %v996_v26 }
0x12d4   : > { %v1000_v28 = vpop.permute.xlu1 %999 }
0x12d5   : > { %v1010_v29 = vrot.slane %v997_v27, %v2585_v35  ;;  %1002 = vst.msk [vmem:[#allocation3] sm:$0x3] %vm294_vm1, %v1000_v28 }
0x12d7   : > { %v1017_v30 = vrot.slane %v1010_v29, %v2585_v35 }
0x12d9   : > { %1018 = vrot.lane.b32.xlu0 %v1017_v30, %s2480_s26 }
0x12dc   : > { %v1076_v31 = vld [vmem:[#allocation3] sm:$0x3] }
0x12dd   : > { %1078 = vrot.lane.b32.xlu1 %v1076_v31, %s2480_s26 }
0x134b   : > { %v1019_v32 = vpop.permute.xlu0 %1018 }
0x134c   : > { %1021 = vst.msk [vmem:[#allocation2] sm:$0x1] %vm292_vm0, %v1019_v32  ;;  %2108 = vst.msk [vmem:[%s2539_s24 + $0x6] sm:$0x1] %vm292_vm0, %v1019_v32 }
0x134f   : > { %v1079_v6 = vpop.permute.xlu1 %1078 }
0x1353   : > { %v1026_v33 = vld [vmem:[#allocation2] sm:$0x1] }
0x1354   : > { %2250 = vmatmul.mubr.msk.bf16.vlgmr.msra.gmra.mxu1 %vm318_vm3, %v1026_v33 }
0x1414   : > { %v1064_v36 = vpop.f32.mrf.mxu1 }
0x1415   : > { %v1070_v37 = vadd.f32 %v2109_v34, %v1064_v36 }
0x1416   : > { %v2251_v38 = vpop.f32.mrf.mxu1 }
0x1417   : > { %2397 = vtanh.f32 %v1070_v37  ;;  %v1071_v42 = vmul.f32 0.5, %v1070_v37 }
0x1418   : > { %v1067_v39 = vpop.f32.mrf.mxu1 }
0x1419   : > { %2399 = vtanh.f32 %v1071_v42 }
0x141a   : > { %v2252_v40 = vpop.f32.mrf.mxu1 }
0x1424   : > { %v2398_v41 = vpop.eup %2397 }
0x1425   : > { %1083 = vrot.lane.b32.xlu0 %v2398_v41, %s2479_s25 }
0x1426   : > { %v2400_v43 = vpop.eup %2399 }
0x1427   : > { %v1073_v44 = vadd.f32 1.0, %v2400_v43 }
0x1429   : > { %v1074_v45 = vmul.f32 0.5, %v1073_v44 }
0x142b   : > { %v1081_v48 = vmul.f32 %v1079_v6, %v1074_v45 }
0x1497   : > { %v1084_v46 = vpop.permute.xlu0 %1083 }
0x1498   : > { %v1086_v47 = vmul.f32 %v1084_v46, %v1074_v45 }
0x149a   : > { %1088 = vrot.lane.b32.xlu0 %v1086_v47, %s2480_s26 }
0x150c   : > { %v1089_v49 = vpop.permute.xlu0 %1088 }
0x150d   : > { %v1091_v50 = vadd.f32 %v1089_v49, %v1081_v48 }
0x150f   : > { %2401 = vtanh.f32 %v1091_v50  ;;  %1100 = vrot.lane.b32.xlu0 %v1091_v50, %s2481_s27 }
0x151c   : > { %v2402_v51 = vpop.eup %2401 }
0x151d   : > { %1094 = vrot.lane.b32.xlu1 %v2402_v51, %s2479_s25 }
0x1581   : > { %v1101_v7 = vpop.permute.xlu0 %1100 }
0x1582   : > { %1103 = vst.msk [vmem:[#allocation3] sm:$0x3] %vm294_vm1, %v1101_v7 }
0x158f   : > { %v1095_v8 = vpop.permute.xlu1 %1094 }
0x1590   : > { %v1097_v52 = vmul.f32 %v1095_v8, %v1074_v45 }
0x1592   : > { %v1098_v53 = vpack.c.bf16 %v1097_v52, %v1097_v52 }
0x1594   : > { %v1111_v54 = vrot.slane %v1098_v53, %v2585_v35 }
0x1596   : > { %v1118_v55 = vrot.slane %v1111_v54, %v2585_v35 }
0x1598   : > { %1119 = vrot.lane.b32.xlu1 %v1118_v55, %s2480_s26 }
0x160a   : > { %v1120_v56 = vpop.permute.xlu1 %1119 }
0x160b   : > { %1122 = vst.msk [vmem:[#allocation2] sm:$0x1] %vm292_vm0, %v1120_v56  ;;  %2111 = vst.msk [vmem:[%s2539_s24 + $0x7] sm:$0x1] %vm292_vm0, %v1120_v56 }
0x160c PF: > { %p2112_p6 = scmp.ne.s32.totalorder %s2465_s9, 1 }
0x160d   : > { %s2485_s28 = smov (!%p2112_p6), 64   ;;  %s2486_s29 = smov (!%p2112_p6), 32  }
0x160e   : > { %1128 = sbr.rel (%p2112_p6) target bundleno = 11277 (0x2c0d), region = 40  ;;  %s2487_s30 = smov (!%p2112_p6), 96  }
0x1613   : > { %v2723_v57 = vcombine.low %v2545_v4, %v2547_v5  ;;  %v2483_v58 = vmov 0.0   ;;  %vm2484_vm4 = vmmov 0   ;;  %v2731_v35 = vcombine.low %v2541_v2, %v2543_v3  ;;  %v1131_v4 = vld [vmem:[#allocation2] sm:$0x1]  ;;  %v2113_v2 = vld [vmem:[%s2531_s18 + $0xe] sm:$0x3] }
0x1614   : > { %2253 = vmatprep.subr.bf16.mxu0 %v2483_v58  ;;  %2257 = vmatprep.mubr.msk.bf16.mxu0 %vm2484_vm4, %v2483_v58  ;;  %vm1144_vm5 = vcmask 261120   ;;  %v1194_v63 = vld [vmem:[#allocation3] sm:$0x3]  ;;  %v2488_v18 = vmov 1966171168   ;;  %v1227_v20 = vlaneseq }
0x1615   : > { %2254 = vmatpush3.bf16.msra.mxu0 %v2723_v57  ;;  %2261 = vmatprep.subr.bf16.mxu1 %v2483_v58  ;;  %v1225_v19 = vunpack.c.l.s4 %v2488_v18  ;;  %v2118_v33 = vld [vmem:[%s2531_s18 + $0xc] sm:$0x3] }
0x1616   : > { %2255 = vmatprep.subr.bf16.mxu0 %v2483_v58  ;;  %2262 = vmatpush3.bf16.msra.mxu1 %v2723_v57  ;;  %v1228_v22 = vshrl.u32 %v1227_v20, 7 }
0x1617   : > { %2263 = vmatprep.subr.bf16.mxu1 %v2483_v58  ;;  %2265 = vmatprep.mubr.msk.bf16.mxu1 %vm2484_vm4, %v2483_v58  ;;  %v1226_v21 = vunpack.c.0.s8 %v1225_v19 }
0x1619   : > { %2256 = vmatpush3.bf16.msra.mxu0 %v2731_v35  ;;  %v2756_v24 = vsub.s32 %v1226_v21, %v1228_v22 }
0x161a   : > { %2264 = vmatpush3.bf16.msra.mxu1 %v2731_v35  ;;  %2269 = vmatprep.subr.bf16.mxu0 %v2483_v58 }
0x161b   : > { %2277 = vmatprep.subr.bf16.mxu1 %v2483_v58 }
0x161c   : > { %2258 = vmatmul.mubr.msk.bf16.vlgmr.msra.gmra.mxu0 %vm1144_vm5, %v1131_v4 }
0x161d   : > { %2270 = vmatpush3.bf16.msra.mxu0 %v2723_v57  ;;  %2273 = vmatprep.mubr.msk.bf16.mxu0 %vm2484_vm4, %v2483_v58 }
0x161e   : > { %2271 = vmatprep.subr.bf16.mxu0 %v2483_v58 }
0x1621   : > { %2272 = vmatpush3.bf16.msra.mxu0 %v2731_v35 }
0x1622   : > { %2285 = vmatprep.subr.bf16.mxu0 %v2483_v58 }
0x16dc   : > { %v1182_v3 = vpop.f32.mrf.mxu0 }
0x16dd   : > { %v1188_v5 = vadd.f32 %v2113_v2, %v1182_v3  ;;  %v2121_v2 = vld [vmem:[%s2531_s18 + $0xa] sm:$0x3] }
0x16de   : > { %v2259_v59 = vpop.f32.mrf.mxu0 }
0x16df   : > { %2403 = vtanh.f32 %v1188_v5  ;;  %v1189_v0 = vmul.f32 0.5, %v1188_v5 }
0x16e0   : > { %v1185_v60 = vpop.f32.mrf.mxu0 }
0x16e1   : > { %2405 = vtanh.f32 %v1189_v0 }
0x16e2   : > { %v2260_v61 = vpop.f32.mrf.mxu0 }
0x16ec   : > { %v2404_v62 = vpop.eup %2403 }
0x16ed   : > { %1201 = vrot.lane.b32.xlu0 %v2404_v62, %s2485_s28 }
0x16ee   : > { %v2406_v1 = vpop.eup %2405 }
0x16ef   : > { %v1191_v9 = vadd.f32 1.0, %v2406_v1 }
0x16f1   : > { %1196 = vrot.lane.b32.xlu0 %v1194_v63, %s2486_s29  ;;  %v1192_v10 = vmul.f32 0.5, %v1191_v9 }
0x175f   : > { %v1202_v11 = vpop.permute.xlu0 %1201 }
0x1760   : > { %v1204_v12 = vmul.f32 %v1202_v11, %v1192_v10 }
0x1762   : > { %1206 = vrot.lane.b32.xlu1 %v1204_v12, %s2486_s29 }
0x1763   : > { %v1197_v13 = vpop.permute.xlu0 %1196 }
0x1764   : > { %v1199_v14 = vmul.f32 %v1197_v13, %v1192_v10 }
0x17d4   : > { %v1207_v15 = vpop.permute.xlu1 %1206 }
0x17d5   : > { %v1209_v16 = vadd.f32 %v1207_v15, %v1199_v14 }
0x17d7   : > { %2407 = vtanh.f32 %v1209_v16 }
0x17e4   : > { %v2408_v17 = vpop.eup %2407 }
0x17e5   : > { %1212 = vrot.lane.b32.xlu1 %v2408_v17, %s2485_s28 }
0x17e9   : > { %1218 = vrot.lane.b32.xlu1 %v1209_v16, %s2487_s30 }
0x1857   : > { %v1213_v23 = vpop.permute.xlu1 %1212 }
0x1858   : > { %v1215_v25 = vmul.f32 %v1213_v23, %v1192_v10 }
0x185a   : > { %v1216_v26 = vpack.c.bf16 %v1215_v25, %v1215_v25 }
0x185b   : > { %v1219_v27 = vpop.permute.xlu1 %1218 }
0x185c   : > { %v1230_v28 = vrot.slane %v1216_v26, %v2756_v24  ;;  %1222 = vst.msk [vmem:[#allocation3] sm:$0x3] %vm294_vm1, %v1219_v27  ;;  %v2124_v27 = vld [vmem:[%s2531_s18 + $0x8] sm:$0x3] }
0x185e   : > { %v1237_v29 = vrot.slane %v1230_v28, %v2756_v24 }
0x1860   : > { %1238 = vrot.lane.b32.xlu0 %v1237_v29, %s2486_s29 }
0x1863   : > { %v1297_v30 = vld [vmem:[#allocation3] sm:$0x3] }
0x1864   : > { %1299 = vrot.lane.b32.xlu1 %v1297_v30, %s2486_s29 }
0x18d2   : > { %v1239_v31 = vpop.permute.xlu0 %1238 }
0x18d3   : > { %1242 = vst.msk [vmem:[#allocation2] sm:$0x1] %vm292_vm0, %v1239_v31  ;;  %2117 = vst.msk [vmem:[%s2539_s24 + $0x7] sm:$0x1] %vm292_vm0, %v1239_v31 }
0x18d6   : > { %v1300_v47 = vpop.permute.xlu1 %1299 }
0x18da   : > { %v1247_v32 = vld [vmem:[#allocation2] sm:$0x1] }
0x18db   : > { %2266 = vmatmul.mubr.msk.bf16.vlgmr.msra.gmra.mxu1 %vm1144_vm5, %v1247_v32 }
0x18dc   : > { %2278 = vmatpush3.bf16.msra.mxu1 %v2723_v57  ;;  %2281 = vmatprep.mubr.msk.bf16.mxu1 %vm2484_vm4, %v2483_v58 }
0x18dd   : > { %2279 = vmatprep.subr.bf16.mxu1 %v2483_v58 }
0x18e0   : > { %2280 = vmatpush3.bf16.msra.mxu1 %v2731_v35 }
0x18e1   : > { %2293 = vmatprep.subr.bf16.mxu1 %v2483_v58 }
0x199b   : > { %v1285_v34 = vpop.f32.mrf.mxu1 }
0x199c   : > { %v1291_v36 = vadd.f32 %v2118_v33, %v1285_v34 }
0x199d   : > { %v2267_v37 = vpop.f32.mrf.mxu1 }
0x199e   : > { %2409 = vtanh.f32 %v1291_v36  ;;  %v1292_v41 = vmul.f32 0.5, %v1291_v36 }
0x199f   : > { %v1288_v38 = vpop.f32.mrf.mxu1 }
0x19a0   : > { %2411 = vtanh.f32 %v1292_v41 }
0x19a1   : > { %v2268_v39 = vpop.f32.mrf.mxu1 }
0x19ab   : > { %v2410_v40 = vpop.eup %2409 }
0x19ac   : > { %1304 = vrot.lane.b32.xlu0 %v2410_v40, %s2485_s28 }
0x19ad   : > { %v2412_v42 = vpop.eup %2411 }
0x19ae   : > { %v1294_v43 = vadd.f32 1.0, %v2412_v42 }
0x19b0   : > { %v1295_v44 = vmul.f32 0.5, %v1294_v43 }
0x19b2   : > { %v1302_v6 = vmul.f32 %v1300_v47, %v1295_v44 }
0x1a1e   : > { %v1305_v45 = vpop.permute.xlu0 %1304 }
0x1a1f   : > { %v1307_v46 = vmul.f32 %v1305_v45, %v1295_v44 }
0x1a21   : > { %1309 = vrot.lane.b32.xlu0 %v1307_v46, %s2486_s29 }
0x1a93   : > { %v1310_v48 = vpop.permute.xlu0 %1309 }
0x1a94   : > { %v1312_v49 = vadd.f32 %v1310_v48, %v1302_v6 }
0x1a96   : > { %2413 = vtanh.f32 %v1312_v49 }
0x1aa3   : > { %v2414_v50 = vpop.eup %2413 }
0x1aa4   : > { %1315 = vrot.lane.b32.xlu1 %v2414_v50, %s2485_s28 }
0x1aa8   : > { %1321 = vrot.lane.b32.xlu1 %v1312_v49, %s2487_s30 }
0x1b16   : > { %v1316_v51 = vpop.permute.xlu1 %1315 }
0x1b17   : > { %v1318_v7 = vmul.f32 %v1316_v51, %v1295_v44 }
0x1b19   : > { %v1319_v8 = vpack.c.bf16 %v1318_v7, %v1318_v7 }
0x1b1a   : > { %v1322_v52 = vpop.permute.xlu1 %1321 }
0x1b1b   : > { %v1332_v53 = vrot.slane %v1319_v8, %v2756_v24  ;;  %1324 = vst.msk [vmem:[#allocation3] sm:$0x3] %vm294_vm1, %v1322_v52  ;;  %v2127_v52 = vld [vmem:[%s2531_s18 + $0x6] sm:$0x3] }
0x1b1d   : > { %v1339_v54 = vrot.slane %v1332_v53, %v2756_v24 }
0x1b1f   : > { %1340 = vrot.lane.b32.xlu0 %v1339_v54, %s2486_s29 }
0x1b22   : > { %v1398_v55 = vld [vmem:[#allocation3] sm:$0x3] }
0x1b23   : > { %1400 = vrot.lane.b32.xlu1 %v1398_v55, %s2486_s29 }
0x1b91   : > { %v1341_v56 = vpop.permute.xlu0 %1340 }
0x1b92   : > { %1343 = vst.msk [vmem:[#allocation2] sm:$0x1] %vm292_vm0, %v1341_v56  ;;  %2120 = vst.msk [vmem:[%s2539_s24 + $0x6] sm:$0x1] %vm292_vm0, %v1341_v56 }
0x1b95   : > { %v1401_v12 = vpop.permute.xlu1 %1400 }
0x1b99   : > { %v1348_v4 = vld [vmem:[#allocation2] sm:$0x1] }
0x1b9a   : > { %2274 = vmatmul.mubr.msk.bf16.vlgmr.msra.gmra.mxu0 %vm1144_vm5, %v1348_v4 }
0x1b9b   : > { %2286 = vmatpush3.bf16.msra.mxu0 %v2723_v57  ;;  %2289 = vmatprep.mubr.msk.bf16.mxu0 %vm2484_vm4, %v2483_v58 }
0x1b9c   : > { %2287 = vmatprep.subr.bf16.mxu0 %v2483_v58 }
0x1b9f   : > { %2288 = vmatpush3.bf16.msra.mxu0 %v2731_v35 }
0x1ba0   : > { %2301 = vmatprep.subr.bf16.mxu0 %v2483_v58 }
0x1c5a   : > { %v1386_v3 = vpop.f32.mrf.mxu0 }
0x1c5b   : > { %v1392_v5 = vadd.f32 %v2121_v2, %v1386_v3 }
0x1c5c   : > { %v2275_v59 = vpop.f32.mrf.mxu0 }
0x1c5d   : > { %2415 = vtanh.f32 %v1392_v5  ;;  %v1393_v63 = vmul.f32 0.5, %v1392_v5 }
0x1c5e   : > { %v1389_v60 = vpop.f32.mrf.mxu0 }
0x1c5f   : > { %2417 = vtanh.f32 %v1393_v63 }
0x1c60   : > { %v2276_v61 = vpop.f32.mrf.mxu0 }
0x1c6a   : > { %v2416_v62 = vpop.eup %2415 }
0x1c6b   : > { %1405 = vrot.lane.b32.xlu0 %v2416_v62, %s2485_s28 }
0x1c6c   : > { %v2418_v0 = vpop.eup %2417 }
0x1c6d   : > { %v1395_v1 = vadd.f32 1.0, %v2418_v0 }
0x1c6f   : > { %v1396_v9 = vmul.f32 0.5, %v1395_v1 }
0x1c71   : > { %v1403_v13 = vmul.f32 %v1401_v12, %v1396_v9 }
0x1cdd   : > { %v1406_v10 = vpop.permute.xlu0 %1405 }
0x1cde   : > { %v1408_v11 = vmul.f32 %v1406_v10, %v1396_v9 }
0x1ce0   : > { %1410 = vrot.lane.b32.xlu0 %v1408_v11, %s2486_s29 }
0x1d52   : > { %v1411_v14 = vpop.permute.xlu0 %1410 }
0x1d53   : > { %v1413_v15 = vadd.f32 %v1411_v14, %v1403_v13 }
0x1d55   : > { %2419 = vtanh.f32 %v1413_v15 }
0x1d62   : > { %v2420_v16 = vpop.eup %2419 }
0x1d63   : > { %1416 = vrot.lane.b32.xlu1 %v2420_v16, %s2485_s28 }
0x1d67   : > { %1422 = vrot.lane.b32.xlu1 %v1413_v15, %s2487_s30 }
0x1dd5   : > { %v1417_v17 = vpop.permute.xlu1 %1416 }
0x1dd6   : > { %v1419_v18 = vmul.f32 %v1417_v17, %v1396_v9 }
0x1dd8   : > { %v1420_v19 = vpack.c.bf16 %v1419_v18, %v1419_v18 }
0x1dd9   : > { %v1423_v20 = vpop.permute.xlu1 %1422 }
0x1dda   : > { %v1433_v21 = vrot.slane %v1420_v19, %v2756_v24  ;;  %1425 = vst.msk [vmem:[#allocation3] sm:$0x3] %vm294_vm1, %v1423_v20  ;;  %v2130_v20 = vld [vmem:[%s2531_s18 + $0x4] sm:$0x3] }
0x1ddc   : > { %v1440_v22 = vrot.slane %v1433_v21, %v2756_v24 }
0x1dde   : > { %1441 = vrot.lane.b32.xlu0 %v1440_v22, %s2486_s29 }
0x1de1   : > { %v1499_v23 = vld [vmem:[#allocation3] sm:$0x3] }
0x1de2   : > { %1501 = vrot.lane.b32.xlu1 %v1499_v23, %s2486_s29 }
0x1e50   : > { %v1442_v25 = vpop.permute.xlu0 %1441 }
0x1e51   : > { %1444 = vst.msk [vmem:[#allocation2] sm:$0x1] %vm292_vm0, %v1442_v25  ;;  %2123 = vst.msk [vmem:[%s2539_s24 + $0x5] sm:$0x1] %vm292_vm0, %v1442_v25 }
0x1e54   : > { %v1502_v41 = vpop.permute.xlu1 %1501 }
0x1e58   : > { %v1449_v26 = vld [vmem:[#allocation2] sm:$0x1] }
0x1e59   : > { %2282 = vmatmul.mubr.msk.bf16.vlgmr.msra.gmra.mxu1 %vm1144_vm5, %v1449_v26 }
0x1e5a   : > { %2294 = vmatpush3.bf16.msra.mxu1 %v2723_v57  ;;  %2297 = vmatprep.mubr.msk.bf16.mxu1 %vm2484_vm4, %v2483_v58 }
0x1e5b   : > { %2295 = vmatprep.subr.bf16.mxu1 %v2483_v58 }
0x1e5e   : > { %2296 = vmatpush3.bf16.msra.mxu1 %v2731_v35 }
0x1e5f   : > { %2309 = vmatprep.subr.bf16.mxu1 %v2483_v58 }
0x1f19   : > { %v1487_v28 = vpop.f32.mrf.mxu1 }
0x1f1a   : > { %v1493_v29 = vadd.f32 %v2124_v27, %v1487_v28 }
0x1f1b   : > { %v2283_v30 = vpop.f32.mrf.mxu1 }
0x1f1c   : > { %2421 = vtanh.f32 %v1493_v29  ;;  %v1494_v34 = vmul.f32 0.5, %v1493_v29 }
0x1f1d   : > { %v1490_v31 = vpop.f32.mrf.mxu1 }
0x1f1e   : > { %2423 = vtanh.f32 %v1494_v34 }
0x1f1f   : > { %v2284_v32 = vpop.f32.mrf.mxu1 }
0x1f29   : > { %v2422_v33 = vpop.eup %2421 }
0x1f2a   : > { %1506 = vrot.lane.b32.xlu0 %v2422_v33, %s2485_s28 }
0x1f2b   : > { %v2424_v36 = vpop.eup %2423 }
0x1f2c   : > { %v1496_v37 = vadd.f32 1.0, %v2424_v36 }
0x1f2e   : > { %v1497_v38 = vmul.f32 0.5, %v1496_v37 }
0x1f30   : > { %v1504_v42 = vmul.f32 %v1502_v41, %v1497_v38 }
0x1f9c   : > { %v1507_v39 = vpop.permute.xlu0 %1506 }
0x1f9d   : > { %v1509_v40 = vmul.f32 %v1507_v39, %v1497_v38 }
0x1f9f   : > { %1511 = vrot.lane.b32.xlu0 %v1509_v40, %s2486_s29 }
0x2011   : > { %v1512_v43 = vpop.permute.xlu0 %1511 }
0x2012   : > { %v1514_v44 = vadd.f32 %v1512_v43, %v1504_v42 }
0x2014   : > { %2425 = vtanh.f32 %v1514_v44 }
0x2021   : > { %v2426_v45 = vpop.eup %2425 }
0x2022   : > { %1517 = vrot.lane.b32.xlu1 %v2426_v45, %s2485_s28 }
0x2026   : > { %1523 = vrot.lane.b32.xlu1 %v1514_v44, %s2487_s30 }
0x2094   : > { %v1518_v46 = vpop.permute.xlu1 %1517 }
0x2095   : > { %v1520_v47 = vmul.f32 %v1518_v46, %v1497_v38  ;;  %v2133_v46 = vld [vmem:[%s2531_s18 + $0x2] sm:$0x3] }
0x2097   : > { %v1521_v6 = vpack.c.bf16 %v1520_v47, %v1520_v47 }
0x2098   : > { %v1524_v48 = vpop.permute.xlu1 %1523 }
0x2099   : > { %v1534_v49 = vrot.slane %v1521_v6, %v2756_v24  ;;  %1526 = vst.msk [vmem:[#allocation3] sm:$0x3] %vm294_vm1, %v1524_v48 }
0x209b   : > { %v1541_v50 = vrot.slane %v1534_v49, %v2756_v24 }
0x209d   : > { %1542 = vrot.lane.b32.xlu0 %v1541_v50, %s2486_s29 }
0x20a0   : > { %v1600_v51 = vld [vmem:[#allocation3] sm:$0x3] }
0x20a1   : > { %1602 = vrot.lane.b32.xlu1 %v1600_v51, %s2486_s29 }
0x210f   : > { %v1543_v7 = vpop.permute.xlu0 %1542 }
0x2110   : > { %1545 = vst.msk [vmem:[#allocation2] sm:$0x1] %vm292_vm0, %v1543_v7  ;;  %2126 = vst.msk [vmem:[%s2539_s24 + $0x4] sm:$0x1] %vm292_vm0, %v1543_v7 }
0x2113   : > { %v1603_v63 = vpop.permute.xlu1 %1602 }
0x2117   : > { %v1550_v8 = vld [vmem:[#allocation2] sm:$0x1] }
0x2118   : > { %2290 = vmatmul.mubr.msk.bf16.vlgmr.msra.gmra.mxu0 %vm1144_vm5, %v1550_v8 }
0x2119   : > { %2302 = vmatpush3.bf16.msra.mxu0 %v2723_v57  ;;  %2305 = vmatprep.mubr.msk.bf16.mxu0 %vm2484_vm4, %v2483_v58 }
0x211a   : > { %2303 = vmatprep.subr.bf16.mxu0 %v2483_v58 }
0x211d   : > { %2304 = vmatpush3.bf16.msra.mxu0 %v2731_v35 }
0x21d8   : > { %v1588_v53 = vpop.f32.mrf.mxu0 }
0x21d9   : > { %v1594_v54 = vadd.f32 %v2127_v52, %v1588_v53 }
0x21da   : > { %v2291_v55 = vpop.f32.mrf.mxu0 }
0x21db   : > { %2427 = vtanh.f32 %v1594_v54  ;;  %v1595_v3 = vmul.f32 0.5, %v1594_v54 }
0x21dc   : > { %v1591_v56 = vpop.f32.mrf.mxu0 }
0x21dd   : > { %2429 = vtanh.f32 %v1595_v3 }
0x21de   : > { %v2292_v4 = vpop.f32.mrf.mxu0 }
0x21e8   : > { %v2428_v2 = vpop.eup %2427 }
0x21e9   : > { %1607 = vrot.lane.b32.xlu0 %v2428_v2, %s2485_s28 }
0x21ea   : > { %v2430_v5 = vpop.eup %2429 }
0x21eb   : > { %v1597_v59 = vadd.f32 1.0, %v2430_v5 }
0x21ed   : > { %v1598_v60 = vmul.f32 0.5, %v1597_v59 }
0x21ef   : > { %v1605_v0 = vmul.f32 %v1603_v63, %v1598_v60 }
0x225b   : > { %v1608_v61 = vpop.permute.xlu0 %1607 }
0x225c   : > { %v1610_v62 = vmul.f32 %v1608_v61, %v1598_v60 }
0x225e   : > { %1612 = vrot.lane.b32.xlu0 %v1610_v62, %s2486_s29 }
0x22d0   : > { %v1613_v1 = vpop.permute.xlu0 %1612 }
0x22d1   : > { %v1615_v9 = vadd.f32 %v1613_v1, %v1605_v0 }
0x22d3   : > { %2431 = vtanh.f32 %v1615_v9 }
0x22e0   : > { %v2432_v10 = vpop.eup %2431 }
0x22e1   : > { %1618 = vrot.lane.b32.xlu1 %v2432_v10, %s2485_s28 }
0x22e5   : > { %1624 = vrot.lane.b32.xlu1 %v1615_v9, %s2487_s30 }
0x2353   : > { %v1619_v11 = vpop.permute.xlu1 %1618 }
0x2354   : > { %v1621_v12 = vmul.f32 %v1619_v11, %v1598_v60  ;;  %v1851_v11 = vld [vmem:[%s2531_s18] sm:$0x3] }
0x2356   : > { %v1622_v13 = vpack.c.bf16 %v1621_v12, %v1621_v12 }
0x2357   : > { %v1625_v14 = vpop.permute.xlu1 %1624 }
0x2358   : > { %v1635_v15 = vrot.slane %v1622_v13, %v2756_v24  ;;  %1627 = vst.msk [vmem:[#allocation3] sm:$0x3] %vm294_vm1, %v1625_v14 }
0x235a   : > { %v1642_v16 = vrot.slane %v1635_v15, %v2756_v24 }
0x235c   : > { %1643 = vrot.lane.b32.xlu0 %v1642_v16, %s2486_s29 }
0x235f   : > { %v1701_v17 = vld [vmem:[#allocation3] sm:$0x3] }
0x2360   : > { %1703 = vrot.lane.b32.xlu1 %v1701_v17, %s2486_s29 }
0x23ce   : > { %v1644_v18 = vpop.permute.xlu0 %1643 }
0x23cf   : > { %1646 = vst.msk [vmem:[#allocation2] sm:$0x1] %vm292_vm0, %v1644_v18  ;;  %2129 = vst.msk [vmem:[%s2539_s24 + $0x3] sm:$0x1] %vm292_vm0, %v1644_v18 }
0x23d6   : > { %v1651_v19 = vld [vmem:[#allocation2] sm:$0x1] }
0x23d7   : > { %2298 = vmatmul.mubr.msk.bf16.vlgmr.msra.gmra.mxu1 %vm1144_vm5, %v1651_v19 }
0x23d8   : > { %2310 = vmatpush3.bf16.msra.mxu1 %v2723_v57  ;;  %2313 = vmatprep.mubr.msk.bf16.mxu1 %vm2484_vm4, %v2483_v58 }
0x23d9   : > { %2311 = vmatprep.subr.bf16.mxu1 %v2483_v58  ;;  %v1704_v58 = vpop.permute.xlu1 %1703 }
0x23dc   : > { %2312 = vmatpush3.bf16.msra.mxu1 %v2731_v35 }
0x2497   : > { %v1689_v21 = vpop.f32.mrf.mxu1 }
0x2498   : > { %v1695_v22 = vadd.f32 %v2130_v20, %v1689_v21 }
0x2499   : > { %v2299_v23 = vpop.f32.mrf.mxu1 }
0x249a   : > { %2433 = vtanh.f32 %v1695_v22  ;;  %v1696_v28 = vmul.f32 0.5, %v1695_v22 }
0x249b   : > { %v1692_v25 = vpop.f32.mrf.mxu1 }
0x249c   : > { %2435 = vtanh.f32 %v1696_v28 }
0x249d   : > { %v2300_v26 = vpop.f32.mrf.mxu1 }
0x24a7   : > { %v2434_v27 = vpop.eup %2433 }
0x24a8   : > { %1708 = vrot.lane.b32.xlu0 %v2434_v27, %s2485_s28 }
0x24a9   : > { %v2436_v57 = vpop.eup %2435 }
0x24aa   : > { %v1698_v29 = vadd.f32 1.0, %v2436_v57 }
0x24ac   : > { %v1699_v30 = vmul.f32 0.5, %v1698_v29 }
0x24ae   : > { %v1706_v35 = vmul.f32 %v1704_v58, %v1699_v30 }
0x251a   : > { %v1709_v31 = vpop.permute.xlu0 %1708 }
0x251b   : > { %v1711_v32 = vmul.f32 %v1709_v31, %v1699_v30 }
0x251d   : > { %1713 = vrot.lane.b32.xlu0 %v1711_v32, %s2486_s29 }
0x258f   : > { %v1714_v33 = vpop.permute.xlu0 %1713 }
0x2590   : > { %v1716_v34 = vadd.f32 %v1714_v33, %v1706_v35 }
0x2592   : > { %2437 = vtanh.f32 %v1716_v34 }
0x259f   : > { %v2438_v36 = vpop.eup %2437 }
0x25a0   : > { %1719 = vrot.lane.b32.xlu1 %v2438_v36, %s2485_s28 }
0x25a4   : > { %1725 = vrot.lane.b32.xlu1 %v1716_v34, %s2487_s30 }
0x2612   : > { %v1720_v37 = vpop.permute.xlu1 %1719 }
0x2613   : > { %v1722_v38 = vmul.f32 %v1720_v37, %v1699_v30 }
0x2615   : > { %v1723_v39 = vpack.c.bf16 %v1722_v38, %v1722_v38 }
0x2616   : > { %v1726_v40 = vpop.permute.xlu1 %1725 }
0x2617   : > { %v1736_v41 = vrot.slane %v1723_v39, %v2756_v24  ;;  %1728 = vst.msk [vmem:[#allocation3] sm:$0x3] %vm294_vm1, %v1726_v40 }
0x2619   : > { %v1743_v42 = vrot.slane %v1736_v41, %v2756_v24 }
0x261b   : > { %1744 = vrot.lane.b32.xlu0 %v1743_v42, %s2486_s29 }
0x261e   : > { %v1802_v43 = vld [vmem:[#allocation3] sm:$0x3] }
0x261f   : > { %1804 = vrot.lane.b32.xlu1 %v1802_v43, %s2486_s29 }
0x268d   : > { %v1745_v44 = vpop.permute.xlu0 %1744 }
0x268e   : > { %1747 = vst.msk [vmem:[#allocation2] sm:$0x1] %vm292_vm0, %v1745_v44  ;;  %2132 = vst.msk [vmem:[%s2539_s24 + $0x2] sm:$0x1] %vm292_vm0, %v1745_v44 }
0x2691   : > { %v1805_v56 = vpop.permute.xlu1 %1804 }
0x2695   : > { %v1752_v45 = vld [vmem:[#allocation2] sm:$0x1] }
0x2696   : > { %2306 = vmatmul.mubr.msk.bf16.vlgmr.msra.gmra.mxu0 %vm1144_vm5, %v1752_v45 }
0x2756   : > { %v1790_v47 = vpop.f32.mrf.mxu0 }
0x2757   : > { %v1796_v6 = vadd.f32 %v2133_v46, %v1790_v47 }
0x2758   : > { %v2307_v48 = vpop.f32.mrf.mxu0 }
0x2759   : > { %2439 = vtanh.f32 %v1796_v6  ;;  %v1797_v7 = vmul.f32 0.5, %v1796_v6 }
0x275a   : > { %v1793_v49 = vpop.f32.mrf.mxu0 }
0x275b   : > { %2441 = vtanh.f32 %v1797_v7 }
0x275c   : > { %v2308_v50 = vpop.f32.mrf.mxu0 }
0x2766   : > { %v2440_v51 = vpop.eup %2439 }
0x2767   : > { %1809 = vrot.lane.b32.xlu0 %v2440_v51, %s2485_s28 }
0x2768   : > { %v2442_v8 = vpop.eup %2441 }
0x2769   : > { %v1799_v52 = vadd.f32 1.0, %v2442_v8 }
0x276b   : > { %v1800_v53 = vmul.f32 0.5, %v1799_v52 }
0x276d   : > { %v1807_v4 = vmul.f32 %v1805_v56, %v1800_v53 }
0x27d9   : > { %v1810_v54 = vpop.permute.xlu0 %1809 }
0x27da   : > { %v1812_v55 = vmul.f32 %v1810_v54, %v1800_v53 }
0x27dc   : > { %1814 = vrot.lane.b32.xlu0 %v1812_v55, %s2486_s29 }
0x284e   : > { %v1815_v2 = vpop.permute.xlu0 %1814 }
0x284f   : > { %v1817_v3 = vadd.f32 %v1815_v2, %v1807_v4 }
0x2851   : > { %2443 = vtanh.f32 %v1817_v3 }
0x285e   : > { %v2444_v5 = vpop.eup %2443 }
0x285f   : > { %1820 = vrot.lane.b32.xlu1 %v2444_v5, %s2485_s28 }
0x2863   : > { %1826 = vrot.lane.b32.xlu1 %v1817_v3, %s2487_s30 }
0x28d1   : > { %v1821_v59 = vpop.permute.xlu1 %1820 }
0x28d2   : > { %v1823_v60 = vmul.f32 %v1821_v59, %v1800_v53 }
0x28d4   : > { %v1824_v61 = vpack.c.bf16 %v1823_v60, %v1823_v60 }
0x28d5   : > { %v1827_v62 = vpop.permute.xlu1 %1826 }
0x28d6   : > { %v1837_v63 = vrot.slane %v1824_v61, %v2756_v24  ;;  %1829 = vst.msk [vmem:[#allocation3] sm:$0x3] %vm294_vm1, %v1827_v62 }
0x28d8   : > { %v1844_v0 = vrot.slane %v1837_v63, %v2756_v24 }
0x28da   : > { %1845 = vrot.lane.b32.xlu0 %v1844_v0, %s2486_s29 }
0x28dd   : > { %v1902_v1 = vld [vmem:[#allocation3] sm:$0x3] }
0x28de   : > { %1904 = vrot.lane.b32.xlu1 %v1902_v1, %s2486_s29 }
0x294c   : > { %v1846_v9 = vpop.permute.xlu0 %1845 }
0x294d   : > { %1848 = vst.msk [vmem:[#allocation2] sm:$0x1] %vm292_vm0, %v1846_v9  ;;  %2135 = vst.msk [vmem:[%s2539_s24 + $0x1] sm:$0x1] %vm292_vm0, %v1846_v9 }
0x2950   : > { %v1905_v25 = vpop.permute.xlu1 %1904 }
0x2954   : > { %v1852_v10 = vld [vmem:[#allocation2] sm:$0x1] }
0x2955   : > { %2314 = vmatmul.mubr.msk.bf16.vlgmr.msra.gmra.mxu1 %vm1144_vm5, %v1852_v10 }
0x2a15   : > { %v1890_v12 = vpop.f32.mrf.mxu1 }
0x2a16   : > { %v1896_v13 = vadd.f32 %v1890_v12, %v1851_v11 }
0x2a17   : > { %v2315_v14 = vpop.f32.mrf.mxu1 }
0x2a18   : > { %2445 = vtanh.f32 %v1896_v13  ;;  %v1897_v18 = vmul.f32 0.5, %v1896_v13 }
0x2a19   : > { %v1893_v15 = vpop.f32.mrf.mxu1 }
0x2a1a   : > { %2447 = vtanh.f32 %v1897_v18 }
0x2a1b   : > { %v2316_v16 = vpop.f32.mrf.mxu1 }
0x2a25   : > { %v2446_v17 = vpop.eup %2445 }
0x2a26   : > { %1909 = vrot.lane.b32.xlu0 %v2446_v17, %s2485_s28 }
0x2a27   : > { %v2448_v19 = vpop.eup %2447 }
0x2a28   : > { %v1899_v20 = vadd.f32 1.0, %v2448_v19 }
0x2a2a   : > { %v1900_v21 = vmul.f32 0.5, %v1899_v20 }
0x2a2c   : > { %v1907_v26 = vmul.f32 %v1905_v25, %v1900_v21 }
0x2a98   : > { %v1910_v22 = vpop.permute.xlu0 %1909 }
0x2a99   : > { %v1912_v23 = vmul.f32 %v1910_v22, %v1900_v21 }
0x2a9b   : > { %1914 = vrot.lane.b32.xlu0 %v1912_v23, %s2486_s29 }
0x2b0d   : > { %v1915_v27 = vpop.permute.xlu0 %1914 }
0x2b0e   : > { %v1917_v28 = vadd.f32 %v1915_v27, %v1907_v26 }
0x2b10   : > { %2449 = vtanh.f32 %v1917_v28  ;;  %1926 = vrot.lane.b32.xlu0 %v1917_v28, %s2487_s30 }
0x2b1d   : > { %v2450_v57 = vpop.eup %2449 }
0x2b1e   : > { %1920 = vrot.lane.b32.xlu1 %v2450_v57, %s2485_s28 }
0x2b82   : > { %v1927_v29 = vpop.permute.xlu0 %1926 }
0x2b83   : > { %1929 = vst.msk [vmem:[#allocation3] sm:$0x3] %vm294_vm1, %v1927_v29 }
0x2b90   : > { %v1921_v30 = vpop.permute.xlu1 %1920 }
0x2b91   : > { %v1923_v31 = vmul.f32 %v1921_v30, %v1900_v21 }
0x2b93   : > { %v1924_v32 = vpack.c.bf16 %v1923_v31, %v1923_v31 }
0x2b95   : > { %v1937_v58 = vrot.slane %v1924_v32, %v2756_v24 }
0x2b97   : > { %v1944_v35 = vrot.slane %v1937_v58, %v2756_v24 }
0x2b99   : > { %1945 = vrot.lane.b32.xlu1 %v1944_v35, %s2486_s29 }
0x2c0b   : > { %v1946_v33 = vpop.permute.xlu1 %1945 }
0x2c0c   : > { %1948 = vst.msk [vmem:[#allocation2] sm:$0x1] %vm292_vm0, %v1946_v33  ;;  %1949 = vst.msk [vmem:[%s2539_s24] sm:$0x1] %vm292_vm0, %v1946_v33 }
0x2c0d PF: > { %s12_s11 = sadd.s32 1, %s2473_s11   ;;  %s2903_s9 = smov %s2469_s10 }
0x2c0e   : > { %p9_p7 = scmp.ge.s32.totalorder %s12_s11, 4   ;;  %s2904_s10 = smov %s2906_s12 }
0x2c10   :  { %11 = sbr.rel (!%p9_p7) target bundleno = 2 (0x2), region = 101 }

</bundles_post_ra>
